<compile_context>
chip_gen: v7x
topology: tpu7x:2x2x1
jax: 0.10.0
libtpu: 0.0.40
codegen_flags: <defaults>
</compile_context>

<pallas_src>
import jax
import jax.numpy as jnp
from jax.experimental import pallas as pl
from jax.experimental.pallas import tpu as pltpu

NUM_LAYERS = 5              # total linear layers
HIDDEN = 50
OUTPUT = 2
INPUT = 1
OUT_PAD = 128               # lane-dense padded output width
LN_EPS = 1e-5
N_MATMUL_BLOCKS = NUM_LAYERS - 2   # hidden blocks with an HxH matmul (= 3)


def _ln_relu3(h, gamma, beta):
    """LayerNorm (biased variance, torch-style) then relu(h)**3, all f32."""
    mean = jnp.mean(h, axis=-1, keepdims=True)
    mean_sq = jnp.mean(h * h, axis=-1, keepdims=True)   # independent 2nd reduction
    var = mean_sq - mean * mean                          # E[x^2] - mean^2
    inv = jax.lax.rsqrt(var + LN_EPS)                    # EUP slot
    h = (h - mean) * (inv * gamma) + beta                # gamma folded into scale
    r = jnp.maximum(h, 0.0)
    return r * r * r


def _mlp_kernel(x_ref, vecs_ref, wh_ref, wout_ref, bout_ref, o_ref):
    x = x_ref[...].astype(jnp.float32)                   # (tm, INPUT)
    vecs = vecs_ref[...]                                 # (13, H) f32 param slab

    # --- block 0: Linear(1 -> H) is a pure VPU broadcast (contraction len 1) ---
    w0, b0 = vecs[0:1], vecs[1:2]
    g0, be0 = vecs[2:3], vecs[3:4]
    h = x * w0 + b0                                      # (tm, H)
    h = _ln_relu3(h, g0, be0)

    # --- blocks 1..L-2: Linear(H -> H) on the MXU, bf16 operands, f32 acc ---
    for i in range(N_MATMUL_BLOCKS):
        r = 4 + 3 * i
        b, g, be = vecs[r:r + 1], vecs[r + 1:r + 2], vecs[r + 2:r + 3]
        w = wh_ref[i]                                    # (H, H) bf16
        h = jnp.dot(h.astype(jnp.bfloat16), w,
                    preferred_element_type=jnp.float32) + b
        h = _ln_relu3(h, g, be)

    # --- final Linear(H -> OUTPUT), zero-padded to 128 lanes: dense store ---
    out = jnp.dot(h.astype(jnp.bfloat16), wout_ref[...],
                  preferred_element_type=jnp.float32) + bout_ref[...]
    o_ref[...] = out.astype(o_ref.dtype)                 # lane-dense (tm, 128) vst


def init_params(key, num_layers=NUM_LAYERS, hidden=HIDDEN, output=OUTPUT, inp=INPUT):
    """Flat list: [w, b, gamma, beta] per hidden block, then [w_out, b_out].

    Weights stored as (in, out); biases / LN params as (1, dim). f32.
    """
    params = []
    sizes = [inp] + [hidden] * (num_layers - 1)
    for i in range(num_layers - 1):
        key, k1, k2 = jax.random.split(key, 3)
        bound = 1.0 / (sizes[i] ** 0.5)
        w = jax.random.uniform(k1, (sizes[i], sizes[i + 1]), jnp.float32, -bound, bound)
        b = jax.random.uniform(k2, (1, sizes[i + 1]), jnp.float32, -bound, bound)
        gamma = jnp.ones((1, sizes[i + 1]), jnp.float32)
        beta = jnp.zeros((1, sizes[i + 1]), jnp.float32)
        params += [w, b, gamma, beta]
    key, k1, k2 = jax.random.split(key, 3)
    bound = 1.0 / (hidden ** 0.5)
    w_out = jax.random.uniform(k1, (hidden, output), jnp.float32, -bound, bound)
    b_out = jax.random.uniform(k2, (1, output), jnp.float32, -bound, bound)
    params += [w_out, b_out]
    return params


def pack_params(params):
    """One-time packing (hoisted out of the per-call path): 14 arrays -> 4 inputs.

    vecs : (4 + 3*(L-2), H) f32  rows = [w0, b0, g0, be0, (b, g, be) per matmul block]
    wh   : (L-2, H, H)      bf16 stacked hidden weights (MXU operands)
    wout : (H, OUT_PAD)     bf16 final weight, zero-padded to 128 lanes
    bout : (1, OUT_PAD)     f32  final bias, zero-padded
    """
    rows = [params[0], params[1], params[2], params[3]]
    whs = []
    idx = 4
    for _ in range(N_MATMUL_BLOCKS):
        w, b, g, be = params[idx:idx + 4]
        idx += 4
        whs.append(w)
        rows += [b, g, be]
    w_out, b_out = params[idx], params[idx + 1]
    vecs = jnp.concatenate(rows, axis=0)                         # (13, H) f32
    wh = jnp.stack(whs, axis=0).astype(jnp.bfloat16)             # (3, H, H) bf16
    pad = OUT_PAD - w_out.shape[1]
    wout = jnp.pad(w_out, ((0, 0), (0, pad))).astype(jnp.bfloat16)
    bout = jnp.pad(b_out, ((0, 0), (0, pad)))
    return vecs, wh, wout, bout


def _num_tensorcores():
    """Best-effort: v7x has 2 TensorCores per chip; v5e/v6e have 1."""
    try:
        kind = jax.devices()[0].device_kind.lower()
    except Exception:
        return 1
    return 2 if "v7" in kind else 1


def _choose_tm(n, num_cores, cap=4096):
    """Largest tile t (multiple of 8, divisor of n, <= cap) whose grid-step
    count is a multiple of num_cores. Single-core chips -> largest tile
    (fewest serial steps); v7x -> even step count so both cores get work."""
    best_any, best_balanced = None, None
    for t in range(8, min(n, cap) + 1, 8):
        if n % t:
            continue
        best_any = t
        if (n // t) % num_cores == 0:
            best_balanced = t
    return best_balanced if best_balanced is not None else best_any


def mlp_forward(x, packed, *, tm=None):
    """x: (N, INPUT) float32. `packed` from pack_params. Returns (N, OUTPUT) f32."""
    vecs, wh, wout, bout = packed
    n, in_dim = x.shape

    if tm is None:
        tm = _choose_tm(n, _num_tensorcores())
    assert tm is not None and tm % 8 == 0 and n % tm == 0, \
        "batch must be a multiple of 8 and divisible by the tile size"
    # TODO(synk): add a padded-tail path for batch sizes not divisible by 8.

    in_specs = [
        pl.BlockSpec((tm, in_dim), lambda i: (i, 0)),    # x: tiled over the grid
        pl.BlockSpec(vecs.shape, lambda i: (0, 0)),      # params: resident in VMEM
        pl.BlockSpec(wh.shape, lambda i: (0, 0, 0)),
        pl.BlockSpec(wout.shape, lambda i: (0, 0)),
        pl.BlockSpec(bout.shape, lambda i: (0, 0)),
    ]
    out_spec = pl.BlockSpec((tm, OUT_PAD), lambda i: (i, 0))

    # Advisory cost estimate: real work (OUTPUT, not the 128-lane pad).
    param_bytes = sum(int(p.size) * p.dtype.itemsize for p in packed)
    flops = n * (
        2 * in_dim * HIDDEN
        + 2 * HIDDEN * HIDDEN * N_MATMUL_BLOCKS
        + 2 * HIDDEN * OUTPUT
        + 10 * HIDDEN * (NUM_LAYERS - 1)                 # LN + relu^3 elementwise
    )
    cost = pl.CostEstimate(
        flops=int(flops),
        transcendentals=int(n * (NUM_LAYERS - 1)),       # one rsqrt per row per LN
        bytes_accessed=int(n * (in_dim + OUT_PAD) * 4 + param_bytes),
    )

    out_padded = pl.pallas_call(
        _mlp_kernel,
        out_shape=jax.ShapeDtypeStruct((n, OUT_PAD), jnp.float32),
        grid_spec=pltpu.PrefetchScalarGridSpec(
            num_scalar_prefetch=0,
            grid=(n // tm,),
            in_specs=in_specs,
            out_specs=out_spec,
        ),
        compiler_params=pltpu.CompilerParams(
            dimension_semantics=("parallel",),
            vmem_limit_bytes=32 * 1024 * 1024,           # raises v5e's 16 MiB default
        ),
        cost_estimate=cost,
    )(x, vecs, wh, wout, bout)

    return out_padded[:, :OUTPUT]


def mlp_forward_ref(x, params, *, matmul_dtype=jnp.float32):
    """Pure-JAX reference mirroring the kernel math; matmul_dtype=bfloat16
    reproduces the kernel's MXU casts, float32 is the torch-faithful path."""
    def ln_relu3(h, g, be):
        mean = jnp.mean(h, axis=-1, keepdims=True)
        var = jnp.mean(h * h, axis=-1, keepdims=True) - mean * mean
        h = (h - mean) * (g * jax.lax.rsqrt(var + LN_EPS)) + be
        return jnp.maximum(h, 0.0) ** 3

    w0, b0, g0, be0 = params[0:4]
    h = x @ w0 + b0                                      # first layer stays f32
    h = ln_relu3(h, g0, be0)
    idx = 4
    for _ in range(N_MATMUL_BLOCKS):
        w, b, g, be = params[idx:idx + 4]
        idx += 4
        h = jnp.dot(h.astype(matmul_dtype), w.astype(matmul_dtype),
                    preferred_element_type=jnp.float32) + b
        h = ln_relu3(h, g, be)
    w_out, b_out = params[idx], params[idx + 1]
    return jnp.dot(h.astype(matmul_dtype), w_out.astype(matmul_dtype),
                   preferred_element_type=jnp.float32) + b_out


if __name__ == "__main__":
    key = jax.random.PRNGKey(0)
    kx, kp = jax.random.split(key)

    N = 256  # batch; x has shape (N, input_size=1) like the torch module expects
    x = jax.random.normal(kx, (N, INPUT), jnp.float32)
    params = init_params(kp)
    packed = pack_params(params)        # one-time pad / pack / bf16 weight cast

    out = mlp_forward(x, packed)        # tm auto: 256 (1 step) single-core, 128x2 on v7x
    out = jax.block_until_ready(out)
    assert out.shape == (N, OUTPUT)

    # Strict check vs a reference that mirrors the kernel's bf16 MXU operands.
    ref_bf16 = mlp_forward_ref(x, params, matmul_dtype=jnp.bfloat16)
    assert jnp.allclose(out, ref_bf16, atol=1e-3, rtol=1e-3), \
        "mismatch vs bf16-matched reference"

    # Loose sanity check vs the full-f32 (torch-faithful) reference: bounds the
    # deliberate bf16 matmul error while still catching semantic bugs.
    ref_f32 = mlp_forward_ref(x, params, matmul_dtype=jnp.float32)
    assert jnp.allclose(out, ref_f32, atol=2.5e-1, rtol=1e-1), \
        "mismatch vs f32 reference"

    print("KERNEL_OK")
</pallas_src>

<mosaic_0001>
module attributes {stable_mosaic.version = 11 : i64} {
  func.func @_mlp_kernel(%arg0: i32, %arg1: memref<256x1xf32, #tpu.memory_space<vmem>>, %arg2: memref<13x50xf32, #tpu.memory_space<vmem>>, %arg3: memref<3x50x50xbf16, #tpu.memory_space<vmem>>, %arg4: memref<50x128xbf16, #tpu.memory_space<vmem>>, %arg5: memref<1x128xf32, #tpu.memory_space<vmem>>, %arg6: memref<256x128xf32, #tpu.memory_space<vmem>>) attributes {dimension_semantics = [#tpu.dimension_semantics<parallel>], iteration_bounds = array<i64: 1>, scalar_prefetch = 0 : i64, scratch_operands = 0 : i64, tpu.core_type = #tpu.core_type<tc>, window_params = [{transform_indices = @transform_0, window_bounds = array<i64: 256, 1>}, {pipeline_mode = #tpu.pipeline_mode<synchronous>, transform_indices = @transform_1, window_bounds = array<i64: 13, 50>}, {pipeline_mode = #tpu.pipeline_mode<synchronous>, transform_indices = @transform_2, window_bounds = array<i64: 3, 50, 50>}, {pipeline_mode = #tpu.pipeline_mode<synchronous>, transform_indices = @transform_3, window_bounds = array<i64: 50, 128>}, {pipeline_mode = #tpu.pipeline_mode<synchronous>, transform_indices = @transform_4, window_bounds = array<i64: 1, 128>}, {transform_indices = @transform_5, window_bounds = array<i64: 256, 128>}]} {
    %c0 = arith.constant 0 : index
    %c0_0 = arith.constant 0 : index
    %0 = vector.load %arg1[%c0, %c0_0] : memref<256x1xf32, #tpu.memory_space<vmem>>, vector<256x1xf32>
    %c0_1 = arith.constant 0 : index
    %c0_2 = arith.constant 0 : index
    %1 = vector.load %arg2[%c0_1, %c0_2] : memref<13x50xf32, #tpu.memory_space<vmem>>, vector<13x50xf32>
    %2 = vector.extract_strided_slice %1 {offsets = [0, 0], sizes = [1, 50], strides = [1, 1]} : vector<13x50xf32> to vector<1x50xf32>
    %3 = vector.extract_strided_slice %1 {offsets = [1, 0], sizes = [1, 50], strides = [1, 1]} : vector<13x50xf32> to vector<1x50xf32>
    %4 = vector.extract_strided_slice %1 {offsets = [2, 0], sizes = [1, 50], strides = [1, 1]} : vector<13x50xf32> to vector<1x50xf32>
    %5 = vector.extract_strided_slice %1 {offsets = [3, 0], sizes = [1, 50], strides = [1, 1]} : vector<13x50xf32> to vector<1x50xf32>
    %6 = vector.broadcast %0 : vector<256x1xf32> to vector<256x50xf32>
    %7 = vector.broadcast %2 : vector<1x50xf32> to vector<256x50xf32>
    %8 = arith.mulf %6, %7 : vector<256x50xf32>
    %9 = vector.broadcast %3 : vector<1x50xf32> to vector<256x50xf32>
    %10 = arith.addf %8, %9 : vector<256x50xf32>
    %cst = arith.constant dense<0.000000e+00> : vector<256xf32>
    %11 = vector.multi_reduction <add>, %10, %cst [1] : vector<256x50xf32> to vector<256xf32>
    %12 = vector.shape_cast %11 : vector<256xf32> to vector<256x1xf32>
    %cst_3 = arith.constant 5.000000e+01 : f32
    %13 = vector.broadcast %cst_3 : f32 to vector<256x1xf32>
    %14 = arith.divf %12, %13 : vector<256x1xf32>
    %15 = arith.mulf %10, %10 : vector<256x50xf32>
    %cst_4 = arith.constant dense<0.000000e+00> : vector<256xf32>
    %16 = vector.multi_reduction <add>, %15, %cst_4 [1] : vector<256x50xf32> to vector<256xf32>
    %17 = vector.shape_cast %16 : vector<256xf32> to vector<256x1xf32>
    %cst_5 = arith.constant 5.000000e+01 : f32
    %18 = vector.broadcast %cst_5 : f32 to vector<256x1xf32>
    %19 = arith.divf %17, %18 : vector<256x1xf32>
    %20 = arith.mulf %14, %14 : vector<256x1xf32>
    %21 = arith.subf %19, %20 : vector<256x1xf32>
    %cst_6 = arith.constant 9.99999974E-6 : f32
    %22 = vector.broadcast %cst_6 : f32 to vector<256x1xf32>
    %23 = arith.addf %21, %22 : vector<256x1xf32>
    %24 = math.rsqrt %23 : vector<256x1xf32>
    %25 = vector.broadcast %14 : vector<256x1xf32> to vector<256x50xf32>
    %26 = arith.subf %10, %25 : vector<256x50xf32>
    %27 = vector.broadcast %24 : vector<256x1xf32> to vector<256x50xf32>
    %28 = vector.broadcast %4 : vector<1x50xf32> to vector<256x50xf32>
    %29 = arith.mulf %27, %28 : vector<256x50xf32>
    %30 = arith.mulf %26, %29 : vector<256x50xf32>
    %31 = vector.broadcast %5 : vector<1x50xf32> to vector<256x50xf32>
    %32 = arith.addf %30, %31 : vector<256x50xf32>
    %cst_7 = arith.constant 0.000000e+00 : f32
    %33 = vector.broadcast %cst_7 : f32 to vector<256x50xf32>
    %34 = arith.maximumf %32, %33 : vector<256x50xf32>
    %35 = arith.mulf %34, %34 : vector<256x50xf32>
    %36 = arith.mulf %35, %34 : vector<256x50xf32>
    %37 = vector.extract_strided_slice %1 {offsets = [4, 0], sizes = [1, 50], strides = [1, 1]} : vector<13x50xf32> to vector<1x50xf32>
    %38 = vector.extract_strided_slice %1 {offsets = [5, 0], sizes = [1, 50], strides = [1, 1]} : vector<13x50xf32> to vector<1x50xf32>
    %39 = vector.extract_strided_slice %1 {offsets = [6, 0], sizes = [1, 50], strides = [1, 1]} : vector<13x50xf32> to vector<1x50xf32>
    %c0_8 = arith.constant 0 : index
    %c0_9 = arith.constant 0 : index
    %c0_10 = arith.constant 0 : index
    %40 = vector.load %arg3[%c0_8, %c0_9, %c0_10] : memref<3x50x50xbf16, #tpu.memory_space<vmem>>, vector<1x50x50xbf16>
    %41 = vector.shape_cast %40 : vector<1x50x50xbf16> to vector<50x50xbf16>
    %42 = arith.truncf %36 : vector<256x50xf32> to vector<256x50xbf16>
    %cst_11 = arith.constant dense<0.000000e+00> : vector<256x50xf32>
    %43 = tpu.matmul %42, %41, %cst_11 {dimension_numbers = #tpu.dot_dimension_numbers<[1], [0], [0], [1], [0, 0, 1, 1], [], []>} : vector<256x50xbf16>, vector<50x50xbf16>, vector<256x50xf32> -> vector<256x50xf32>
    %44 = vector.broadcast %37 : vector<1x50xf32> to vector<256x50xf32>
    %45 = arith.addf %43, %44 : vector<256x50xf32>
    %cst_12 = arith.constant dense<0.000000e+00> : vector<256xf32>
    %46 = vector.multi_reduction <add>, %45, %cst_12 [1] : vector<256x50xf32> to vector<256xf32>
    %47 = vector.shape_cast %46 : vector<256xf32> to vector<256x1xf32>
    %cst_13 = arith.constant 5.000000e+01 : f32
    %48 = vector.broadcast %cst_13 : f32 to vector<256x1xf32>
    %49 = arith.divf %47, %48 : vector<256x1xf32>
    %50 = arith.mulf %45, %45 : vector<256x50xf32>
    %cst_14 = arith.constant dense<0.000000e+00> : vector<256xf32>
    %51 = vector.multi_reduction <add>, %50, %cst_14 [1] : vector<256x50xf32> to vector<256xf32>
    %52 = vector.shape_cast %51 : vector<256xf32> to vector<256x1xf32>
    %cst_15 = arith.constant 5.000000e+01 : f32
    %53 = vector.broadcast %cst_15 : f32 to vector<256x1xf32>
    %54 = arith.divf %52, %53 : vector<256x1xf32>
    %55 = arith.mulf %49, %49 : vector<256x1xf32>
    %56 = arith.subf %54, %55 : vector<256x1xf32>
    %cst_16 = arith.constant 9.99999974E-6 : f32
    %57 = vector.broadcast %cst_16 : f32 to vector<256x1xf32>
    %58 = arith.addf %56, %57 : vector<256x1xf32>
    %59 = math.rsqrt %58 : vector<256x1xf32>
    %60 = vector.broadcast %49 : vector<256x1xf32> to vector<256x50xf32>
    %61 = arith.subf %45, %60 : vector<256x50xf32>
    %62 = vector.broadcast %59 : vector<256x1xf32> to vector<256x50xf32>
    %63 = vector.broadcast %38 : vector<1x50xf32> to vector<256x50xf32>
    %64 = arith.mulf %62, %63 : vector<256x50xf32>
    %65 = arith.mulf %61, %64 : vector<256x50xf32>
    %66 = vector.broadcast %39 : vector<1x50xf32> to vector<256x50xf32>
    %67 = arith.addf %65, %66 : vector<256x50xf32>
    %cst_17 = arith.constant 0.000000e+00 : f32
    %68 = vector.broadcast %cst_17 : f32 to vector<256x50xf32>
    %69 = arith.maximumf %67, %68 : vector<256x50xf32>
    %70 = arith.mulf %69, %69 : vector<256x50xf32>
    %71 = arith.mulf %70, %69 : vector<256x50xf32>
    %72 = vector.extract_strided_slice %1 {offsets = [7, 0], sizes = [1, 50], strides = [1, 1]} : vector<13x50xf32> to vector<1x50xf32>
    %73 = vector.extract_strided_slice %1 {offsets = [8, 0], sizes = [1, 50], strides = [1, 1]} : vector<13x50xf32> to vector<1x50xf32>
    %74 = vector.extract_strided_slice %1 {offsets = [9, 0], sizes = [1, 50], strides = [1, 1]} : vector<13x50xf32> to vector<1x50xf32>
    %c1 = arith.constant 1 : index
    %c0_18 = arith.constant 0 : index
    %c0_19 = arith.constant 0 : index
    %75 = vector.load %arg3[%c1, %c0_18, %c0_19] : memref<3x50x50xbf16, #tpu.memory_space<vmem>>, vector<1x50x50xbf16>
    %76 = vector.shape_cast %75 : vector<1x50x50xbf16> to vector<50x50xbf16>
    %77 = arith.truncf %71 : vector<256x50xf32> to vector<256x50xbf16>
    %cst_20 = arith.constant dense<0.000000e+00> : vector<256x50xf32>
    %78 = tpu.matmul %77, %76, %cst_20 {dimension_numbers = #tpu.dot_dimension_numbers<[1], [0], [0], [1], [0, 0, 1, 1], [], []>} : vector<256x50xbf16>, vector<50x50xbf16>, vector<256x50xf32> -> vector<256x50xf32>
    %79 = vector.broadcast %72 : vector<1x50xf32> to vector<256x50xf32>
    %80 = arith.addf %78, %79 : vector<256x50xf32>
    %cst_21 = arith.constant dense<0.000000e+00> : vector<256xf32>
    %81 = vector.multi_reduction <add>, %80, %cst_21 [1] : vector<256x50xf32> to vector<256xf32>
    %82 = vector.shape_cast %81 : vector<256xf32> to vector<256x1xf32>
    %cst_22 = arith.constant 5.000000e+01 : f32
    %83 = vector.broadcast %cst_22 : f32 to vector<256x1xf32>
    %84 = arith.divf %82, %83 : vector<256x1xf32>
    %85 = arith.mulf %80, %80 : vector<256x50xf32>
    %cst_23 = arith.constant dense<0.000000e+00> : vector<256xf32>
    %86 = vector.multi_reduction <add>, %85, %cst_23 [1] : vector<256x50xf32> to vector<256xf32>
    %87 = vector.shape_cast %86 : vector<256xf32> to vector<256x1xf32>
    %cst_24 = arith.constant 5.000000e+01 : f32
    %88 = vector.broadcast %cst_24 : f32 to vector<256x1xf32>
    %89 = arith.divf %87, %88 : vector<256x1xf32>
    %90 = arith.mulf %84, %84 : vector<256x1xf32>
    %91 = arith.subf %89, %90 : vector<256x1xf32>
    %cst_25 = arith.constant 9.99999974E-6 : f32
    %92 = vector.broadcast %cst_25 : f32 to vector<256x1xf32>
    %93 = arith.addf %91, %92 : vector<256x1xf32>
    %94 = math.rsqrt %93 : vector<256x1xf32>
    %95 = vector.broadcast %84 : vector<256x1xf32> to vector<256x50xf32>
    %96 = arith.subf %80, %95 : vector<256x50xf32>
    %97 = vector.broadcast %94 : vector<256x1xf32> to vector<256x50xf32>
    %98 = vector.broadcast %73 : vector<1x50xf32> to vector<256x50xf32>
    %99 = arith.mulf %97, %98 : vector<256x50xf32>
    %100 = arith.mulf %96, %99 : vector<256x50xf32>
    %101 = vector.broadcast %74 : vector<1x50xf32> to vector<256x50xf32>
    %102 = arith.addf %100, %101 : vector<256x50xf32>
    %cst_26 = arith.constant 0.000000e+00 : f32
    %103 = vector.broadcast %cst_26 : f32 to vector<256x50xf32>
    %104 = arith.maximumf %102, %103 : vector<256x50xf32>
    %105 = arith.mulf %104, %104 : vector<256x50xf32>
    %106 = arith.mulf %105, %104 : vector<256x50xf32>
    %107 = vector.extract_strided_slice %1 {offsets = [10, 0], sizes = [1, 50], strides = [1, 1]} : vector<13x50xf32> to vector<1x50xf32>
    %108 = vector.extract_strided_slice %1 {offsets = [11, 0], sizes = [1, 50], strides = [1, 1]} : vector<13x50xf32> to vector<1x50xf32>
    %109 = vector.extract_strided_slice %1 {offsets = [12, 0], sizes = [1, 50], strides = [1, 1]} : vector<13x50xf32> to vector<1x50xf32>
    %c2 = arith.constant 2 : index
    %c0_27 = arith.constant 0 : index
    %c0_28 = arith.constant 0 : index
    %110 = vector.load %arg3[%c2, %c0_27, %c0_28] : memref<3x50x50xbf16, #tpu.memory_space<vmem>>, vector<1x50x50xbf16>
    %111 = vector.shape_cast %110 : vector<1x50x50xbf16> to vector<50x50xbf16>
    %112 = arith.truncf %106 : vector<256x50xf32> to vector<256x50xbf16>
    %cst_29 = arith.constant dense<0.000000e+00> : vector<256x50xf32>
    %113 = tpu.matmul %112, %111, %cst_29 {dimension_numbers = #tpu.dot_dimension_numbers<[1], [0], [0], [1], [0, 0, 1, 1], [], []>} : vector<256x50xbf16>, vector<50x50xbf16>, vector<256x50xf32> -> vector<256x50xf32>
    %114 = vector.broadcast %107 : vector<1x50xf32> to vector<256x50xf32>
    %115 = arith.addf %113, %114 : vector<256x50xf32>
    %cst_30 = arith.constant dense<0.000000e+00> : vector<256xf32>
    %116 = vector.multi_reduction <add>, %115, %cst_30 [1] : vector<256x50xf32> to vector<256xf32>
    %117 = vector.shape_cast %116 : vector<256xf32> to vector<256x1xf32>
    %cst_31 = arith.constant 5.000000e+01 : f32
    %118 = vector.broadcast %cst_31 : f32 to vector<256x1xf32>
    %119 = arith.divf %117, %118 : vector<256x1xf32>
    %120 = arith.mulf %115, %115 : vector<256x50xf32>
    %cst_32 = arith.constant dense<0.000000e+00> : vector<256xf32>
    %121 = vector.multi_reduction <add>, %120, %cst_32 [1] : vector<256x50xf32> to vector<256xf32>
    %122 = vector.shape_cast %121 : vector<256xf32> to vector<256x1xf32>
    %cst_33 = arith.constant 5.000000e+01 : f32
    %123 = vector.broadcast %cst_33 : f32 to vector<256x1xf32>
    %124 = arith.divf %122, %123 : vector<256x1xf32>
    %125 = arith.mulf %119, %119 : vector<256x1xf32>
    %126 = arith.subf %124, %125 : vector<256x1xf32>
    %cst_34 = arith.constant 9.99999974E-6 : f32
    %127 = vector.broadcast %cst_34 : f32 to vector<256x1xf32>
    %128 = arith.addf %126, %127 : vector<256x1xf32>
    %129 = math.rsqrt %128 : vector<256x1xf32>
    %130 = vector.broadcast %119 : vector<256x1xf32> to vector<256x50xf32>
    %131 = arith.subf %115, %130 : vector<256x50xf32>
    %132 = vector.broadcast %129 : vector<256x1xf32> to vector<256x50xf32>
    %133 = vector.broadcast %108 : vector<1x50xf32> to vector<256x50xf32>
    %134 = arith.mulf %132, %133 : vector<256x50xf32>
    %135 = arith.mulf %131, %134 : vector<256x50xf32>
    %136 = vector.broadcast %109 : vector<1x50xf32> to vector<256x50xf32>
    %137 = arith.addf %135, %136 : vector<256x50xf32>
    %cst_35 = arith.constant 0.000000e+00 : f32
    %138 = vector.broadcast %cst_35 : f32 to vector<256x50xf32>
    %139 = arith.maximumf %137, %138 : vector<256x50xf32>
    %140 = arith.mulf %139, %139 : vector<256x50xf32>
    %141 = arith.mulf %140, %139 : vector<256x50xf32>
    %142 = arith.truncf %141 : vector<256x50xf32> to vector<256x50xbf16>
    %c0_36 = arith.constant 0 : index
    %c0_37 = arith.constant 0 : index
    %143 = vector.load %arg4[%c0_36, %c0_37] : memref<50x128xbf16, #tpu.memory_space<vmem>>, vector<50x128xbf16>
    %cst_38 = arith.constant dense<0.000000e+00> : vector<256x128xf32>
    %144 = tpu.matmul %142, %143, %cst_38 {dimension_numbers = #tpu.dot_dimension_numbers<[1], [0], [0], [1], [0, 0, 1, 1], [], []>} : vector<256x50xbf16>, vector<50x128xbf16>, vector<256x128xf32> -> vector<256x128xf32>
    %c0_39 = arith.constant 0 : index
    %c0_40 = arith.constant 0 : index
    %145 = vector.load %arg5[%c0_39, %c0_40] : memref<1x128xf32, #tpu.memory_space<vmem>>, vector<1x128xf32>
    %146 = vector.broadcast %145 : vector<1x128xf32> to vector<256x128xf32>
    %147 = arith.addf %144, %146 : vector<256x128xf32>
    %c0_41 = arith.constant 0 : index
    %c0_42 = arith.constant 0 : index
    %148 = vector.load %arg6[%c0_41, %c0_42] : memref<256x128xf32, #tpu.memory_space<vmem>>, vector<256x128xf32>
    tpu.vector_store %arg6[%c0_41, %c0_42], %147 {strides = array<i32>} : memref<256x128xf32, #tpu.memory_space<vmem>>, vector<256x128xf32>,
    return
  }
  func.func @transform_0(%arg0: i32) -> (i32, i32) {
    %c0_i32 = arith.constant 0 : i32
    %c0_i32_0 = arith.constant 0 : i32
    return %arg0, %c0_i32 : i32, i32
  }
  func.func @transform_1(%arg0: i32) -> (i32, i32) {
    %c0_i32 = arith.constant 0 : i32
    %c0_i32_0 = arith.constant 0 : i32
    %c0_i32_1 = arith.constant 0 : i32
    return %c0_i32, %c0_i32_0 : i32, i32
  }
  func.func @transform_2(%arg0: i32) -> (i32, i32, i32) {
    %c0_i32 = arith.constant 0 : i32
    %c0_i32_0 = arith.constant 0 : i32
    %c0_i32_1 = arith.constant 0 : i32
    %c0_i32_2 = arith.constant 0 : i32
    return %c0_i32, %c0_i32_0, %c0_i32_1 : i32, i32, i32
  }
  func.func @transform_3(%arg0: i32) -> (i32, i32) {
    %c0_i32 = arith.constant 0 : i32
    %c0_i32_0 = arith.constant 0 : i32
    %c0_i32_1 = arith.constant 0 : i32
    return %c0_i32, %c0_i32_0 : i32, i32
  }
  func.func @transform_4(%arg0: i32) -> (i32, i32) {
    %c0_i32 = arith.constant 0 : i32
    %c0_i32_0 = arith.constant 0 : i32
    %c0_i32_1 = arith.constant 0 : i32
    return %c0_i32, %c0_i32_0 : i32, i32
  }
  func.func @transform_5(%arg0: i32) -> (i32, i32) {
    %c0_i32 = arith.constant 0 : i32
    %c0_i32_0 = arith.constant 0 : i32
    return %arg0, %c0_i32 : i32, i32
  }
}

</mosaic_0001>

<bundles_post_ra>
// kernel: tpu_custom_call.1
= control target key start
LH: loop header
LB: loop body
LE: loop exit
PB: predicated region body
PF: predicated region fallthrough
CT: control target
= control target key end

     0   :  { %v4620_v2 = vmov 0   ;;  %s7079_s0 = inlined_call_operand.vmem [shape: f32[256,1], index: 0, kind: input, shape index: {}]   ;;  %s7080_s1 = inlined_call_operand.vmem [shape: f32[13,50], index: 1, kind: input, shape index: {}]   ;;  %s7081_s2 = inlined_call_operand.vmem [shape: bf16[3,50,50], index: 2, kind: input, shape index: {}]   ;;  %s7082_s3 = inlined_call_operand.vmem [shape: bf16[50,128], index: 3, kind: input, shape index: {}]   ;;  %s7083_s4 = inlined_call_operand.vmem [shape: f32[1,128], index: 4, kind: input, shape index: {}]   ;;  %s7084_s5 = inlined_call_operand.hbm [shape: f32[256,128], index: 5, kind: output, shape index: {}]  }
   0x1   :  { %v24_v0 = vld [vmem:[%s7079_s0 + $0x10] sm:$0xff]  ;;  %v22_v1 = vld [vmem:[%s7079_s0] sm:$0xff]  ;;  %4320 = vset.pattern.permute.xlu1 %v4620_v2  ;;  %4319 = vset.pattern.permute.xlu0 %v4620_v2  ;;  %v25_v3 = vld [vmem:[%s7079_s0 + $0x18] sm:$0xff] }
   0x2   :  { %68 = vperm.xlu1 %4320, %v24_v0   ;;  %58 = vperm.xlu0 %4319, %v22_v1   ;;  %v23_v4 = vld [vmem:[%s7079_s0 + $0x8] sm:$0xff]  ;;  %v26_v6 = vld [vmem:[%s7079_s0 + $0x20] sm:$0xff]  ;;  %v29_v7 = vld [vmem:[%s7079_s0 + $0x38] sm:$0xff] }
   0x3   :  { %v27_v5 = vld [vmem:[%s7079_s0 + $0x28] sm:$0xff]  ;;  %v28_v8 = vld [vmem:[%s7079_s0 + $0x30] sm:$0xff]  ;;  %v30_v10 = vld [vmem:[%s7079_s0 + $0x40] sm:$0xff] }
   0x4   :  { %v31_v9 = vld [vmem:[%s7079_s0 + $0x48] sm:$0xff]  ;;  %v33_v11 = vld [vmem:[%s7079_s0 + $0x58] sm:$0xff]  ;;  %v32_v12 = vld [vmem:[%s7079_s0 + $0x50] sm:$0xff] }
   0x6   :  { %73 = vperm.xlu1 %4320, %v25_v3   ;;  %63 = vperm.xlu0 %4319, %v23_v4  }
   0xa   :  { %83 = vperm.xlu1 %4320, %v27_v5   ;;  %78 = vperm.xlu0 %4319, %v26_v6  }
   0xe   :  { %93 = vperm.xlu1 %4320, %v29_v7   ;;  %88 = vperm.xlu0 %4319, %v28_v8  }
  0x12   :  { %103 = vperm.xlu1 %4320, %v31_v9   ;;  %98 = vperm.xlu0 %4319, %v30_v10  }
  0x13   :  { %10 = vsyncpa [#allocation3], 0  ;;  %v35_v13 = vld [vmem:[%s7079_s0 + $0x68] sm:$0xff]  ;;  %v34_v14 = vld [vmem:[%s7079_s0 + $0x60] sm:$0xff]  ;;  %v216_v33 = vlaneseq  ;;  %vm288_vm0 = vcmask 408576   ;;  %vm1034_vm1 = vcmask 1040384  }
  0x14   :  { %v37_v15 = vld [vmem:[%s7079_s0 + $0x78] sm:$0xff]  ;;  %v36_v16 = vld [vmem:[%s7079_s0 + $0x70] sm:$0xff]  ;;  %v39_v17 = vld [vmem:[%s7079_s0 + $0x88] sm:$0xff] }
  0x15   :  { %v38_v18 = vld [vmem:[%s7079_s0 + $0x80] sm:$0xff]  ;;  %v41_v19 = vld [vmem:[%s7079_s0 + $0x98] sm:$0xff]  ;;  %v40_v20 = vld [vmem:[%s7079_s0 + $0x90] sm:$0xff]  ;;  %v4750_v34 = vshrl.u32 %v216_v33, 7 }
  0x16   :  { %113 = vperm.xlu1 %4320, %v33_v11   ;;  %108 = vperm.xlu0 %4319, %v32_v12   ;;  %v43_v21 = vld [vmem:[%s7079_s0 + $0xa8] sm:$0xff]  ;;  %v42_v22 = vld [vmem:[%s7079_s0 + $0xa0] sm:$0xff]  ;;  %v45_v23 = vld [vmem:[%s7079_s0 + $0xb8] sm:$0xff] }
  0x17   :  { %v44_v24 = vld [vmem:[%s7079_s0 + $0xb0] sm:$0xff]  ;;  %v47_v25 = vld [vmem:[%s7079_s0 + $0xc8] sm:$0xff]  ;;  %v46_v26 = vld [vmem:[%s7079_s0 + $0xc0] sm:$0xff]  ;;  %7097 = vst [vmem:[#allocation5_spill] sm:$0xff] %v4750_v34  ;;  %v7086_v35 = vsub.s32 0, %v4750_v34  ;;  %v7085_v37 = vsub.s32 1, %v4750_v34 }
  0x18   :  { %v49_v27 = vld [vmem:[%s7079_s0 + $0xd8] sm:$0xff]  ;;  %v48_v28 = vld [vmem:[%s7079_s0 + $0xd0] sm:$0xff]  ;;  %v51_v29 = vld [vmem:[%s7079_s0 + $0xe8] sm:$0xff] }
  0x19   :  { %v50_v30 = vld [vmem:[%s7079_s0 + $0xe0] sm:$0xff]  ;;  %v53_v31 = vld [vmem:[%s7079_s0 + $0xf8] sm:$0xff]  ;;  %v52_v32 = vld [vmem:[%s7079_s0 + $0xf0] sm:$0xff] }
  0x1a   :  { %123 = vperm.xlu1 %4320, %v35_v13   ;;  %118 = vperm.xlu0 %4319, %v34_v14   ;;  %v4756_v36 = vld [vmem:[%s7080_s1] sm:$0xff] }
  0x1b   :  { %v4762_v38 = vrot.slane %v4756_v36, %v7086_v35  ;;  %v4767_v39 = vrot.slane %v4756_v36, %v7085_v37 }
  0x1e   :  { %133 = vperm.xlu1 %4320, %v37_v15   ;;  %128 = vperm.xlu0 %4319, %v36_v16  }
  0x22   :  { %143 = vperm.xlu1 %4320, %v39_v17   ;;  %138 = vperm.xlu0 %4319, %v38_v18  }
  0x26   :  { %153 = vperm.xlu1 %4320, %v41_v19   ;;  %148 = vperm.xlu0 %4319, %v40_v20  }
  0x2a   :  { %163 = vperm.xlu1 %4320, %v43_v21   ;;  %158 = vperm.xlu0 %4319, %v42_v22  }
  0x2e   :  { %173 = vperm.xlu1 %4320, %v45_v23   ;;  %168 = vperm.xlu0 %4319, %v44_v24  }
  0x32   :  { %183 = vperm.xlu1 %4320, %v47_v25   ;;  %178 = vperm.xlu0 %4319, %v46_v26  }
  0x36   :  { %193 = vperm.xlu1 %4320, %v49_v27   ;;  %188 = vperm.xlu0 %4319, %v48_v28  }
  0x3a   :  { %203 = vperm.xlu1 %4320, %v51_v29   ;;  %198 = vperm.xlu0 %4319, %v50_v30  }
  0x3e   :  { %213 = vperm.xlu1 %4320, %v53_v31   ;;  %208 = vperm.xlu0 %4319, %v52_v32  }
  0x81   :  { %v69_v40 = vpop.permute.xlu1 %68  ;;  %v59_v41 = vpop.permute.xlu0 %58 }
  0x82   :  { %v222_v42 = vmul.f32 %v4762_v38, %v69_v40  ;;  %v220_v43 = vmul.f32 %v4762_v38, %v59_v41 }
  0x84   :  { %v4772_v44 = vadd.f32 %v4767_v39, %v222_v42  ;;  %v4775_v45 = vadd.f32 %v4767_v39, %v220_v43 }
  0x85   :  { %v74_v46 = vpop.permute.xlu1 %73  ;;  %v64_v47 = vpop.permute.xlu0 %63 }
  0x86   :  { %v223_v48 = vmul.f32 %v4762_v38, %v74_v46  ;;  %v221_v49 = vmul.f32 %v4762_v38, %v64_v47  ;;  %v289_v50 = vsel %vm288_vm0, %v4775_v45, 0.0  ;;  %v295_v52 = vsel %vm288_vm0, %v4772_v44, 0.0 }
  0x87   :  { %290 = vadd.xlane.f32.xlu0 %v289_v50  ;;  %v418_v25 = vmul.f32 %v4775_v45, %v4775_v45  ;;  %v420_v28 = vmul.f32 %v4772_v44, %v4772_v44 }
  0x88   :  { %v4782_v51 = vadd.f32 %v4767_v39, %v221_v49  ;;  %v4787_v53 = vadd.f32 %v4767_v39, %v223_v48 }
  0x89   :  { %v84_v54 = vpop.permute.xlu1 %83  ;;  %v79_v55 = vpop.permute.xlu0 %78  ;;  %v450_v30 = vsel %vm288_vm0, %v418_v25, 0.0  ;;  %v456_v40 = vsel %vm288_vm0, %v420_v28, 0.0 }
  0x8a   :  { %v225_v56 = vmul.f32 %v4762_v38, %v84_v54  ;;  %v224_v57 = vmul.f32 %v4762_v38, %v79_v55  ;;  %v292_v58 = vsel %vm288_vm0, %v4782_v51, 0.0  ;;  %v298_v62 = vsel %vm288_vm0, %v4787_v53, 0.0 }
  0x8b   :  { %296 = vadd.xlane.f32.xlu0 %v295_v52  ;;  %293 = vadd.xlane.f32.xlu1 %v292_v58  ;;  %v419_v31 = vmul.f32 %v4782_v51, %v4782_v51  ;;  %v421_v41 = vmul.f32 %v4787_v53, %v4787_v53 }
  0x8c   :  { %v4794_v59 = vadd.f32 %v4767_v39, %v224_v57  ;;  %v4799_v63 = vadd.f32 %v4767_v39, %v225_v56 }
  0x8d   :  { %v94_v60 = vpop.permute.xlu1 %93  ;;  %v89_v61 = vpop.permute.xlu0 %88  ;;  %v453_v46 = vsel %vm288_vm0, %v419_v31, 0.0  ;;  %v459_v54 = vsel %vm288_vm0, %v421_v41, 0.0 }
  0x8e   :  { %v227_v0 = vmul.f32 %v4762_v38, %v94_v60  ;;  %v226_v1 = vmul.f32 %v4762_v38, %v89_v61  ;;  %v301_v2 = vsel %vm288_vm0, %v4794_v59, 0.0  ;;  %v304_v9 = vsel %vm288_vm0, %v4799_v63, 0.0 }
  0x8f   :  { %299 = vadd.xlane.f32.xlu0 %v298_v62  ;;  %302 = vadd.xlane.f32.xlu1 %v301_v2  ;;  %v422_v47 = vmul.f32 %v4794_v59, %v4794_v59  ;;  %v423_v55 = vmul.f32 %v4799_v63, %v4799_v63 }
  0x90   :  { %v4806_v3 = vadd.f32 %v4767_v39, %v226_v1  ;;  %v4809_v4 = vadd.f32 %v4767_v39, %v227_v0 }
  0x91   :  { %v104_v5 = vpop.permute.xlu1 %103  ;;  %v99_v6 = vpop.permute.xlu0 %98  ;;  %v462_v58 = vsel %vm288_vm0, %v422_v47, 0.0  ;;  %v465_v2 = vsel %vm288_vm0, %v423_v55, 0.0 }
  0x92   :  { %v229_v7 = vmul.f32 %v4762_v38, %v104_v5  ;;  %v228_v8 = vmul.f32 %v4762_v38, %v99_v6  ;;  %v307_v10 = vsel %vm288_vm0, %v4806_v3, 0.0  ;;  %v310_v14 = vsel %vm288_vm0, %v4809_v4, 0.0 }
  0x93   :  { %305 = vadd.xlane.f32.xlu0 %v304_v9  ;;  %308 = vadd.xlane.f32.xlu1 %v307_v10  ;;  %v424_v60 = vmul.f32 %v4806_v3, %v4806_v3  ;;  %v425_v5 = vmul.f32 %v4809_v4, %v4809_v4 }
  0x94   :  { %v4818_v11 = vadd.f32 %v4767_v39, %v228_v8  ;;  %v4823_v15 = vadd.f32 %v4767_v39, %v229_v7 }
  0x95   :  { %v114_v12 = vpop.permute.xlu1 %113  ;;  %v109_v13 = vpop.permute.xlu0 %108  ;;  %v468_v8 = vsel %vm288_vm0, %v424_v60, 0.0 }
  0x96   :  { %v231_v16 = vmul.f32 %v4762_v38, %v114_v12  ;;  %v230_v17 = vmul.f32 %v4762_v38, %v109_v13  ;;  %v313_v18 = vsel %vm288_vm0, %v4818_v11, 0.0  ;;  %v316_v23 = vsel %vm288_vm0, %v4823_v15, 0.0 }
  0x97   :  { %311 = vadd.xlane.f32.xlu0 %v310_v14  ;;  %314 = vadd.xlane.f32.xlu1 %v313_v18  ;;  %v426_v9 = vmul.f32 %v4818_v11, %v4818_v11  ;;  %v427_v18 = vmul.f32 %v4823_v15, %v4823_v15 }
  0x98   :  { %v4830_v19 = vadd.f32 %v4767_v39, %v230_v17  ;;  %v4835_v22 = vadd.f32 %v4767_v39, %v231_v16  ;;  %v471_v17 = vsel %vm288_vm0, %v425_v5, 0.0 }
  0x99   :  { %v4832_v20 = vpop.permute.xlu1 %123  ;;  %v119_v21 = vpop.permute.xlu0 %118  ;;  %v474_v25 = vsel %vm288_vm0, %v426_v9, 0.0 }
  0x9a   :  { %v319_v24 = vsel %vm288_vm0, %v4830_v19, 0.0  ;;  %v322_v29 = vsel %vm288_vm0, %v4835_v22, 0.0  ;;  %v232_v13 = vmul.f32 %v4762_v38, %v119_v21  ;;  %v428_v28 = vmul.f32 %v4830_v19, %v4830_v19 }
  0x9b   :  { %317 = vadd.xlane.f32.xlu0 %v316_v23  ;;  %320 = vadd.xlane.f32.xlu1 %v319_v24  ;;  %v429_v41 = vmul.f32 %v4835_v22, %v4835_v22 }
  0x9c   :  { %v4912_v31 = vadd.f32 %v4767_v39, %v232_v13  ;;  %v480_v47 = vsel %vm288_vm0, %v428_v28, 0.0 }
  0x9d   :  { %v4843_v26 = vpop.permute.xlu1 %133  ;;  %v129_v27 = vpop.permute.xlu0 %128 }
  0x9f   :  { %323 = vadd.xlane.f32.xlu0 %v322_v29  ;;  %451 = vadd.xlane.f32.xlu1 %v450_v30  ;;  %v233_v30 = vmul.f32 %v4762_v38, %v4832_v20 }
  0xa1   :  { %v144_v32 = vpop.permute.xlu1 %143  ;;  %v139_v33 = vpop.permute.xlu0 %138 }
  0xa2   :  { %v237_v42 = vmul.f32 %v4762_v38, %v144_v32  ;;  %v236_v43 = vmul.f32 %v4762_v38, %v139_v33 }
  0xa3   :  { %454 = vadd.xlane.f32.xlu0 %v453_v46  ;;  %457 = vadd.xlane.f32.xlu1 %v456_v40  ;;  %v477_v40 = vsel %vm288_vm0, %v427_v18, 0.0 }
  0xa4   :  { %v4861_v48 = vadd.f32 %v4767_v39, %v237_v42  ;;  %v4864_v49 = vadd.f32 %v4767_v39, %v236_v43  ;;  %v234_v42 = vmul.f32 %v4762_v38, %v129_v27  ;;  %v235_v27 = vmul.f32 %v4762_v38, %v4843_v26 }
  0xa5   :  { %v154_v50 = vpop.permute.xlu1 %153  ;;  %v149_v52 = vpop.permute.xlu0 %148 }
  0xa6   :  { %v239_v56 = vmul.f32 %v4762_v38, %v154_v50  ;;  %v238_v57 = vmul.f32 %v4762_v38, %v149_v52  ;;  %v4928_v52 = vadd.f32 %v4767_v39, %v233_v30 }
  0xa7   :  { %460 = vadd.xlane.f32.xlu0 %v459_v54  ;;  %463 = vadd.xlane.f32.xlu1 %v462_v58 }
  0xa8   :  { %v4875_v61 = vadd.f32 %v4767_v39, %v239_v56  ;;  %v4878_v62 = vadd.f32 %v4767_v39, %v238_v57  ;;  %v483_v56 = vsel %vm288_vm0, %v429_v41, 0.0  ;;  %v4934_v57 = vadd.f32 %v4767_v39, %v234_v42 }
  0xa9   :  { %v164_v0 = vpop.permute.xlu1 %163  ;;  %v159_v1 = vpop.permute.xlu0 %158 }
  0xaa   :  { %v241_v6 = vmul.f32 %v4762_v38, %v164_v0  ;;  %v240_v7 = vmul.f32 %v4762_v38, %v159_v1  ;;  %v325_v0 = vsel %vm288_vm0, %v4912_v31, 0.0 }
  0xab   :  { %466 = vadd.xlane.f32.xlu0 %v465_v2  ;;  %469 = vadd.xlane.f32.xlu1 %v468_v8  ;;  %v4951_v8 = vadd.f32 %v4767_v39, %v235_v27  ;;  %v4322_v27 = vld [vmem:[%s7081_s2 + $0x8] sm:$0xff]  }
  0xac   :  { %v4889_v10 = vadd.f32 %v4767_v39, %v241_v6  ;;  %v4892_v12 = vadd.f32 %v4767_v39, %v240_v7  ;;  %v328_v6 = vsel %vm288_vm0, %v4928_v52, 0.0  ;;  %v430_v7 = vmul.f32 %v4912_v31, %v4912_v31 }
  0xad   :  { %v174_v14 = vpop.permute.xlu1 %173  ;;  %v169_v16 = vpop.permute.xlu0 %168 }
  0xae   :  { %v243_v23 = vmul.f32 %v4762_v38, %v174_v14  ;;  %v242_v24 = vmul.f32 %v4762_v38, %v169_v16  ;;  %v331_v14 = vsel %vm288_vm0, %v4934_v57, 0.0 }
  0xaf   :  { %472 = vadd.xlane.f32.xlu0 %v471_v17  ;;  %475 = vadd.xlane.f32.xlu1 %v474_v25  ;;  %v431_v25 = vmul.f32 %v4928_v52, %v4928_v52 }
  0xb0   :  { %v4904_v21 = vadd.f32 %v4767_v39, %v243_v23  ;;  %v4907_v29 = vadd.f32 %v4767_v39, %v242_v24  ;;  %v486_v24 = vsel %vm288_vm0, %v430_v7, 0.0 }
  0xb1   :  { %v184_v32 = vpop.permute.xlu1 %183  ;;  %v179_v33 = vpop.permute.xlu0 %178  ;;  %v489_v42 = vsel %vm288_vm0, %v431_v25, 0.0 }
  0xb2   :  { %v245_v43 = vmul.f32 %v4762_v38, %v184_v32  ;;  %v244_v46 = vmul.f32 %v4762_v38, %v179_v33  ;;  %v334_v32 = vsel %vm288_vm0, %v4951_v8, 0.0  ;;  %v432_v33 = vmul.f32 %v4934_v57, %v4934_v57 }
  0xb3   :  { %478 = vadd.xlane.f32.xlu0 %v477_v40  ;;  %481 = vadd.xlane.f32.xlu1 %v480_v47  ;;  %v355_v25 = vsel %vm288_vm0, %v4907_v29, 0.0 }
  0xb4   :  { %v4922_v20 = vadd.f32 %v4767_v39, %v245_v43  ;;  %v4925_v50 = vadd.f32 %v4767_v39, %v244_v46  ;;  %v492_v43 = vsel %vm288_vm0, %v432_v33, 0.0  ;;  %v4321_v46 = vld [vmem:[%s7081_s2] sm:$0xff]   ;;  %v439_v33 = vmul.f32 %v4889_v10, %v4889_v10 }
  0xb5   :  { %v194_v54 = vpop.permute.xlu1 %193  ;;  %v189_v55 = vpop.permute.xlu0 %188  ;;  %4151 = vmatprep.subr.bf16.mxu0 %v4321_v46 }
  0xb6   :  { %7098 = vst [vmem:[#allocation6_spill] sm:$0xff] %v4922_v20  ;;  %v247_v58 = vmul.f32 %v4762_v38, %v194_v54  ;;  %v246_v60 = vmul.f32 %v4762_v38, %v189_v55  ;;  %4152 = vmatpush3.bf16.msra.mxu0 %v4321_v46  ;;  %v340_v54 = vsel %vm288_vm0, %v4861_v48, 0.0  ;;  %v343_v55 = vsel %vm288_vm0, %v4878_v62, 0.0 }
  0xb7   :  { %484 = vadd.xlane.f32.xlu0 %v483_v56  ;;  %326 = vadd.xlane.f32.xlu1 %v325_v0  ;;  %v434_v56 = vmul.f32 %v4864_v49, %v4864_v49  ;;  %v441_v46 = vmul.f32 %v4904_v21, %v4904_v21 }
  0xb8   :  { %v4941_v1 = vadd.f32 %v4767_v39, %v247_v58  ;;  %v4944_v26 = vadd.f32 %v4767_v39, %v246_v60  ;;  %4153 = vmatprep.subr.bf16.mxu0 %v4322_v27  ;;  %v4323_v58 = vld [vmem:[%s7081_s2 + $0x10] sm:$0xff]   ;;  %v346_v60 = vsel %vm288_vm0, %v4875_v61, 0.0 }
  0xb9   :  { %v204_v2 = vpop.permute.xlu1 %203  ;;  %v199_v5 = vpop.permute.xlu0 %198  ;;  %v498_v0 = vsel %vm288_vm0, %v434_v56, 0.0 }
  0xba   :  { %7099 = vst [vmem:[#allocation7_spill] sm:$0xff] %v4941_v1  ;;  %v249_v9 = vmul.f32 %v4762_v38, %v204_v2  ;;  %v248_v13 = vmul.f32 %v4762_v38, %v199_v5  ;;  %4154 = vmatpush3.bf16.msra.mxu0 %v4322_v27  ;;  %v435_v2 = vmul.f32 %v4861_v48, %v4861_v48  ;;  %v364_v27 = vsel %vm288_vm0, %v4922_v20, 0.0 }
  0xbb   :  { %329 = vadd.xlane.f32.xlu0 %v328_v6  ;;  %332 = vadd.xlane.f32.xlu1 %v331_v14  ;;  %v436_v5 = vmul.f32 %v4878_v62, %v4878_v62  ;;  %v4324_v6 = vld [vmem:[%s7081_s2 + $0x18] ss:$0 sps:$4 sm:$0x11]   ;;  %v370_v56 = vsel %vm288_vm0, %v4941_v1, 0.0 }
  0xbc   :  { %v4958_v16 = vadd.f32 %v4767_v39, %v249_v9  ;;  %v4961_v17 = vadd.f32 %v4767_v39, %v248_v13  ;;  %4155 = vmatprep.subr.bf16.mxu0 %v4323_v58  ;;  %v501_v7 = vsel %vm288_vm0, %v435_v2, 0.0  ;;  %v437_v13 = vmul.f32 %v4875_v61, %v4875_v61 }
  0xbd   :  { %v214_v18 = vpop.permute.xlu1 %213  ;;  %v209_v23 = vpop.permute.xlu0 %208  ;;  %v504_v9 = vsel %vm288_vm0, %v436_v5, 0.0  ;;  %v1036_v14 = vsel %vm1034_vm1, %v4324_v6, 0 }
  0xbe   :  { %7100 = vst [vmem:[#allocation8_spill] sm:$0xff] %v4958_v16  ;;  %7101 = vst [vmem:[#allocation9_spill] sm:$0xff] %v4961_v17  ;;  %v251_v28 = vmul.f32 %v4762_v38, %v214_v18  ;;  %v250_v30 = vmul.f32 %v4762_v38, %v209_v23  ;;  %v433_v38 = vmul.f32 %v4951_v8, %v4951_v8  ;;  %4156 = vmatpush3.bf16.msra.mxu0 %v4323_v58 }
  0xbf   :  { %335 = vadd.xlane.f32.xlu0 %v334_v32  ;;  %487 = vadd.xlane.f32.xlu1 %v486_v24  ;;  %v507_v18 = vsel %vm288_vm0, %v437_v13, 0.0  ;;  %v349_v23 = vsel %vm288_vm0, %v4892_v12, 0.0  ;;  %v352_v24 = vsel %vm288_vm0, %v4889_v10, 0.0  ;;  %v376_v13 = vsel %vm288_vm0, %v4958_v16, 0.0 }
  0xc0   :  { %v4973_v40 = vadd.f32 %v4767_v39, %v251_v28  ;;  %v4976_v41 = vadd.f32 %v4767_v39, %v250_v30  ;;  %v495_v47 = vsel %vm288_vm0, %v433_v38, 0.0  ;;  %v337_v39 = vsel %vm288_vm0, %v4864_v49, 0.0  ;;  %4311 = vmatprep.subr.msk.bf16.mxu0 %vm1034_vm1, %v4324_v6 }
  0xc1   :  { %v438_v28 = vmul.f32 %v4892_v12, %v4892_v12  ;;  %v358_v30 = vsel %vm288_vm0, %v4904_v21, 0.0  ;;  %v445_v6 = vmul.f32 %v4941_v1, %v4941_v1 }
  0xc2   :  { %7102 = vst [vmem:[#allocation10_spill] sm:$0xff] %v4973_v40  ;;  %7103 = vst [vmem:[#allocation11_spill] sm:$0xff] %v4976_v41  ;;  %4158 = vmatpush3.bf16.msra.mxu0 %v1036_v14  ;;  %v379_v14 = vsel %vm288_vm0, %v4976_v41, 0.0 }
  0xc3   :  { %490 = vadd.xlane.f32.xlu0 %v489_v42  ;;  %493 = vadd.xlane.f32.xlu1 %v492_v43  ;;  %v510_v32 = vsel %vm288_vm0, %v438_v28, 0.0  ;;  %v440_v42 = vmul.f32 %v4907_v29, %v4907_v29  ;;  %v513_v43 = vsel %vm288_vm0, %v439_v33, 0.0  ;;  %v448_v28 = vmul.f32 %v4976_v41, %v4976_v41 }
  0xc4   :  { %v449_v33 = vmul.f32 %v4973_v40, %v4973_v40 }
  0xc5   :  { %v516_v38 = vsel %vm288_vm0, %v440_v42, 0.0 }
  0xc6   :  { %v543_v42 = vsel %vm288_vm0, %v449_v33, 0.0 }
  0xc7   :  { %496 = vadd.xlane.f32.xlu0 %v495_v47  ;;  %338 = vadd.xlane.f32.xlu1 %v337_v39  ;;  %v519_v47 = vsel %vm288_vm0, %v441_v46, 0.0  ;;  %v361_v39 = vsel %vm288_vm0, %v4925_v50, 0.0 }
  0xcb   :  { %341 = vadd.xlane.f32.xlu0 %v340_v54  ;;  %344 = vadd.xlane.f32.xlu1 %v343_v55  ;;  %v367_v54 = vsel %vm288_vm0, %v4944_v26, 0.0  ;;  %v442_v55 = vmul.f32 %v4925_v50, %v4925_v50 }
  0xcd   :  { %v522_v58 = vsel %vm288_vm0, %v442_v55, 0.0 }
  0xcf   :  { %347 = vadd.xlane.f32.xlu0 %v346_v60  ;;  %499 = vadd.xlane.f32.xlu1 %v498_v0  ;;  %v443_v60 = vmul.f32 %v4922_v20, %v4922_v20  ;;  %v444_v0 = vmul.f32 %v4944_v26, %v4944_v26 }
  0xd1   :  { %v525_v2 = vsel %vm288_vm0, %v443_v60, 0.0  ;;  %v528_v5 = vsel %vm288_vm0, %v444_v0, 0.0 }
  0xd3   :  { %502 = vadd.xlane.f32.xlu0 %v501_v7  ;;  %505 = vadd.xlane.f32.xlu1 %v504_v9  ;;  %v531_v7 = vsel %vm288_vm0, %v445_v6, 0.0  ;;  %v373_v9 = vsel %vm288_vm0, %v4961_v17, 0.0 }
  0xd7   :  { %508 = vadd.xlane.f32.xlu0 %v507_v18  ;;  %350 = vadd.xlane.f32.xlu1 %v349_v23  ;;  %v446_v18 = vmul.f32 %v4961_v17, %v4961_v17  ;;  %v382_v23 = vsel %vm288_vm0, %v4973_v40, 0.0 }
  0xdb   :  { %353 = vadd.xlane.f32.xlu0 %v352_v24  ;;  %356 = vadd.xlane.f32.xlu1 %v355_v25  ;;  %v534_v24 = vsel %vm288_vm0, %v446_v18, 0.0  ;;  %v447_v25 = vmul.f32 %v4958_v16, %v4958_v16 }
  0xdf   :  { %359 = vadd.xlane.f32.xlu0 %v358_v30  ;;  %511 = vadd.xlane.f32.xlu1 %v510_v32  ;;  %v537_v30 = vsel %vm288_vm0, %v447_v25, 0.0  ;;  %v540_v32 = vsel %vm288_vm0, %v448_v28, 0.0 }
  0xe3   :  { %514 = vadd.xlane.f32.xlu0 %v513_v43  ;;  %517 = vadd.xlane.f32.xlu1 %v516_v38 }
  0xe7   :  { %520 = vadd.xlane.f32.xlu0 %v519_v47  ;;  %362 = vadd.xlane.f32.xlu1 %v361_v39 }
  0xeb   :  { %365 = vadd.xlane.f32.xlu0 %v364_v27  ;;  %368 = vadd.xlane.f32.xlu1 %v367_v54 }
  0xef   :  { %371 = vadd.xlane.f32.xlu0 %v370_v56  ;;  %523 = vadd.xlane.f32.xlu1 %v522_v58 }
  0xf3   :  { %526 = vadd.xlane.f32.xlu0 %v525_v2  ;;  %529 = vadd.xlane.f32.xlu1 %v528_v5 }
  0xf7   :  { %532 = vadd.xlane.f32.xlu0 %v531_v7  ;;  %374 = vadd.xlane.f32.xlu1 %v373_v9 }
  0xfb   :  { %377 = vadd.xlane.f32.xlu0 %v376_v13  ;;  %380 = vadd.xlane.f32.xlu1 %v379_v14 }
  0xff   :  { %383 = vadd.xlane.f32.xlu0 %v382_v23  ;;  %535 = vadd.xlane.f32.xlu1 %v534_v24 }
 0x103   :  { %538 = vadd.xlane.f32.xlu0 %v537_v30  ;;  %541 = vadd.xlane.f32.xlu1 %v540_v32 }
 0x107   :  { %544 = vadd.xlane.f32.xlu0 %v543_v42 }
 0x114   :  { %v291_v43 = vpop.xlane.xlu0 %290 }
 0x115   :  { %v5077_v0 = vmul.f32 0.02, %v291_v43 }
 0x117   :  { %v578_v7 = vmul.f32 %v5077_v0, %v5077_v0 }
 0x118   :  { %v294_v38 = vpop.xlane.xlu1 %293  ;;  %v297_v46 = vpop.xlane.xlu0 %296 }
 0x119   :  { %v5079_v2 = vmul.f32 0.02, %v294_v38  ;;  %v5085_v9 = vmul.f32 0.02, %v297_v46 }
 0x11b   :  { %v579_v18 = vmul.f32 %v5079_v2, %v5079_v2  ;;  %v580_v28 = vmul.f32 %v5085_v9, %v5085_v9 }
 0x11c   :  { %v303_v47 = vpop.xlane.xlu1 %302  ;;  %v300_v39 = vpop.xlane.xlu0 %299 }
 0x11d   :  { %v5089_v23 = vmul.f32 0.02, %v303_v47  ;;  %v5093_v42 = vmul.f32 0.02, %v300_v39  ;;  %v7089_v39 = vsub.s32 2, %v4750_v34 }
 0x120   :  { %v309_v27 = vpop.xlane.xlu1 %308  ;;  %v306_v54 = vpop.xlane.xlu0 %305 }
 0x121   :  { %v5095_v46 = vmul.f32 0.02, %v309_v27 }
 0x124   :  { %v315_v55 = vpop.xlane.xlu1 %314  ;;  %v312_v56 = vpop.xlane.xlu0 %311 }
 0x128   :  { %v321_v58 = vpop.xlane.xlu1 %320  ;;  %v318_v60 = vpop.xlane.xlu0 %317 }
 0x12c   :  { %v452_v5 = vpop.xlane.xlu1 %451  ;;  %v5081_v6 = vpop.xlane.xlu0 %323 }
 0x12d   :  { %v546_v13 = vmul.f32 0.02, %v452_v5  ;;  %v5097_v5 = vmul.f32 0.02, %v306_v54  ;;  %v584_v54 = vmul.f32 %v5095_v46, %v5095_v46 }
 0x12f   :  { %v610_v14 = vsub.f32 %v546_v13, %v578_v7  ;;  %v582_v13 = vmul.f32 %v5089_v23, %v5089_v23 }
 0x130   :  { %v458_v24 = vpop.xlane.xlu1 %457  ;;  %v455_v25 = vpop.xlane.xlu0 %454 }
 0x131   :  { %v642_v30 = vadd.f32 1e-05, %v610_v14  ;;  %v548_v32 = vmul.f32 0.02, %v458_v24  ;;  %v547_v33 = vmul.f32 0.02, %v455_v25  ;;  %v581_v14 = vmul.f32 %v5093_v42, %v5093_v42 }
 0x132   :  { %v5107_v25 = vmul.f32 0.02, %v315_v55  ;;  %v706_v55 = vsub.f32 %v4775_v45, %v5077_v0  ;;  %v708_v0 = vsub.f32 %v4772_v44, %v5085_v9 }
 0x133   :  { %4337 = vrsqrt.f32 %v642_v30  ;;  %v612_v43 = vsub.f32 %v548_v32, %v580_v28  ;;  %v611_v38 = vsub.f32 %v547_v33, %v579_v18  ;;  %v7088_v18 = vsub.s32 3, %v4750_v34 }
 0x134   :  { %v464_v7 = vpop.xlane.xlu1 %463  ;;  %v461_v47 = vpop.xlane.xlu0 %460  ;;  %v583_v33 = vmul.f32 %v5097_v5, %v5097_v5 }
 0x135   :  { %v644_v37 = vadd.f32 1e-05, %v612_v43  ;;  %v643_v35 = vadd.f32 1e-05, %v611_v38  ;;  %v550_v40 = vmul.f32 0.02, %v464_v7 }
 0x136   :  { %v549_v24 = vmul.f32 0.02, %v461_v47  ;;  %v5111_v47 = vmul.f32 0.02, %v312_v56  ;;  %v707_v56 = vsub.f32 %v4782_v51, %v5079_v2  ;;  %v710_v2 = vsub.f32 %v4794_v59, %v5089_v23 }
 0x137   :  { %4339 = vrsqrt.f32 %v644_v37  ;;  %v614_v27 = vsub.f32 %v550_v40, %v582_v13  ;;  %v5116_v37 = vrot.slane %v4756_v36, %v7089_v39 }
 0x138   :  { %4341 = vrsqrt.f32 %v643_v35  ;;  %v613_v28 = vsub.f32 %v549_v24, %v581_v14  ;;  %v470_v30 = vpop.xlane.xlu1 %469  ;;  %v467_v32 = vpop.xlane.xlu0 %466  ;;  %v5121_v35 = vrot.slane %v4756_v36, %v7088_v18  ;;  %v5127_v24 = vmul.f32 0.02, %v321_v58 }
 0x139   :  { %v646_v43 = vadd.f32 1e-05, %v614_v27  ;;  %v552_v38 = vmul.f32 0.02, %v470_v30  ;;  %v551_v7 = vmul.f32 0.02, %v467_v32  ;;  %v586_v36 = vmul.f32 %v5107_v25, %v5107_v25 }
 0x13a   :  { %v645_v40 = vadd.f32 1e-05, %v613_v28  ;;  %v5129_v27 = vmul.f32 0.02, %v318_v60  ;;  %v585_v51 = vmul.f32 %v5111_v47, %v5111_v47 }
 0x13b   :  { %4343 = vrsqrt.f32 %v646_v43  ;;  %v616_v13 = vsub.f32 %v552_v38, %v584_v54  ;;  %v615_v14 = vsub.f32 %v551_v7, %v583_v33  ;;  %v709_v54 = vsub.f32 %v4787_v53, %v5093_v42 }
 0x13c   :  { %4345 = vrsqrt.f32 %v645_v40  ;;  %v476_v28 = vpop.xlane.xlu1 %475  ;;  %v473_v30 = vpop.xlane.xlu0 %472  ;;  %v588_v43 = vmul.f32 %v5127_v24, %v5127_v24  ;;  %v5147_v53 = vmul.f32 0.02, %v5081_v6 }
 0x13d   :  { %v4338_v32 = vpop.eup %4337  ;;  %v648_v18 = vadd.f32 1e-05, %v616_v13  ;;  %v647_v39 = vadd.f32 1e-05, %v615_v14  ;;  %v554_v45 = vmul.f32 0.02, %v476_v28  ;;  %v587_v13 = vmul.f32 %v5129_v27, %v5129_v27 }
 0x13e   :  { %v553_v58 = vmul.f32 0.02, %v473_v30  ;;  %v742_v60 = vmul.f32 %v4338_v32, %v5116_v37 }
 0x13f   :  { %4347 = vrsqrt.f32 %v648_v18  ;;  %v618_v33 = vsub.f32 %v554_v45, %v586_v36 }
 0x140   :  { %4349 = vrsqrt.f32 %v647_v39  ;;  %v617_v38 = vsub.f32 %v553_v58, %v585_v51  ;;  %v482_v44 = vpop.xlane.xlu1 %481  ;;  %v479_v9 = vpop.xlane.xlu0 %478  ;;  %v774_v7 = vmul.f32 %v742_v60, %v706_v55 }
 0x141   :  { %v4340_v40 = vpop.eup %4339  ;;  %v650_v14 = vadd.f32 1e-05, %v618_v33  ;;  %v556_v28 = vmul.f32 0.02, %v482_v44  ;;  %v555_v59 = vmul.f32 0.02, %v479_v9  ;;  %v711_v33 = vsub.f32 %v4799_v63, %v5097_v5 }
 0x142   :  { %v4342_v23 = vpop.eup %4341  ;;  %v744_v42 = vmul.f32 %v4340_v40, %v5116_v37  ;;  %v649_v18 = vadd.f32 1e-05, %v617_v38  ;;  %v810_v39 = vadd.f32 %v5121_v35, %v774_v7 }
 0x143   :  { %4351 = vrsqrt.f32 %v650_v14  ;;  %v620_v30 = vsub.f32 %v556_v28, %v588_v43  ;;  %v619_v32 = vsub.f32 %v555_v59, %v587_v13  ;;  %v743_v55 = vmul.f32 %v4342_v23, %v5116_v37 }
 0x144   :  { %4353 = vrsqrt.f32 %v649_v18  ;;  %v327_v45 = vpop.xlane.xlu1 %326  ;;  %v485_v51 = vpop.xlane.xlu0 %484  ;;  %v842_v58 = vmax.f32 %v810_v39, 0.0  ;;  %v776_v60 = vmul.f32 %v744_v42, %v708_v0  ;;  %v589_v43 = vmul.f32 %v5147_v53, %v5147_v53 }
 0x145   :  { %v4344_v6 = vpop.eup %4343  ;;  %v652_v38 = vadd.f32 1e-05, %v620_v30  ;;  %v651_v44 = vadd.f32 1e-05, %v619_v32  ;;  %v775_v9 = vmul.f32 %v743_v55, %v707_v56  ;;  %v557_v13 = vmul.f32 0.02, %v485_v51 }
 0x146   :  { %v4346_v7 = vpop.eup %4345  ;;  %v746_v40 = vmul.f32 %v4344_v6, %v5116_v37  ;;  %v812_v14 = vadd.f32 %v5121_v35, %v776_v60  ;;  %v5161_v0 = vmul.f32 0.02, %v327_v45  ;;  %v874_v59 = vmul.f32 %v842_v58, %v842_v58 }
 0x147   :  { %v745_v28 = vmul.f32 %v4346_v7, %v5116_v37  ;;  %4355 = vrsqrt.f32 %v652_v38  ;;  %v621_v5 = vsub.f32 %v557_v13, %v589_v43  ;;  %v811_v42 = vadd.f32 %v5121_v35, %v775_v9 }
 0x148   :  { %4357 = vrsqrt.f32 %v651_v44  ;;  %v333_v56 = vpop.xlane.xlu1 %332  ;;  %v330_v23 = vpop.xlane.xlu0 %329  ;;  %v713_v39 = vsub.f32 %v4809_v4, %v5111_v47  ;;  %v844_v6 = vmax.f32 %v812_v14, 0.0  ;;  %v778_v38 = vmul.f32 %v746_v40, %v710_v2 }
 0x149   :  { %v4348_v18 = vpop.eup %4347  ;;  %v5170_v32 = vmul.f32 0.02, %v333_v56  ;;  %v777_v55 = vmul.f32 %v745_v28, %v709_v54  ;;  %v653_v51 = vadd.f32 1e-05, %v621_v5  ;;  %v843_v60 = vmax.f32 %v811_v42, 0.0 }
 0x14a   :  { %v4350_v45 = vpop.eup %4349  ;;  %v590_v9 = vmul.f32 %v5161_v0, %v5161_v0  ;;  %v5175_v7 = vmul.f32 0.02, %v330_v23  ;;  %v906_v43 = vmul.f32 %v874_v59, %v842_v58  ;;  %v748_v4 = vmul.f32 %v4348_v18, %v5116_v37 }
 0x14b   :  { %v747_v44 = vmul.f32 %v4350_v45, %v5116_v37  ;;  %4359 = vrsqrt.f32 %v653_v51  ;;  %v875_v56 = vmul.f32 %v843_v60, %v843_v60  ;;  %v813_v54 = vadd.f32 %v5121_v35, %v777_v55 }
 0x14c   :  { %v488_v47 = vpop.xlane.xlu1 %487  ;;  %v336_v13 = vpop.xlane.xlu0 %335  ;;  %v592_v2 = vmul.f32 %v5170_v32, %v5170_v32  ;;  %v876_v58 = vmul.f32 %v844_v6, %v844_v6  ;;  %v814_v59 = vadd.f32 %v5121_v35, %v778_v38  ;;  %v591_v55 = vmul.f32 %v5175_v7, %v5175_v7 }
 0x14d   :  { %v4352_v28 = vpop.eup %4351  ;;  %v558_v40 = vmul.f32 0.02, %v488_v47  ;;  %v5181_v14 = vmul.f32 0.02, %v336_v13  ;;  %v779_v5 = vmul.f32 %v747_v44, %v711_v33  ;;  %v907_v23 = vmul.f32 %v875_v56, %v843_v60 }
 0x14e   :  { %v4354_v42 = vpop.eup %4353  ;;  %v845_v45 = vmax.f32 %v813_v54, 0.0  ;;  %v750_v18 = vmul.f32 %v4352_v28, %v5116_v37  ;;  %v7104_v28 = vsub.f32 %v4806_v3, %v5095_v46  ;;  %v846_v16 = vmax.f32 %v814_v59, 0.0 }
 0x14f   :  { %v749_v51 = vmul.f32 %v4354_v42, %v5116_v37  ;;  %v622_v30 = vsub.f32 %v558_v40, %v590_v9  ;;  %v593_v47 = vmul.f32 %v5181_v14, %v5181_v14  ;;  %v945_v63 = vpack.c.bf16 %v907_v23, %v906_v43 }
 0x150   :  { %v494_v13 = vpop.xlane.xlu1 %493  ;;  %v491_v33 = vpop.xlane.xlu0 %490  ;;  %v877_v44 = vmul.f32 %v845_v45, %v845_v45  ;;  %v815_v60 = vadd.f32 %v5121_v35, %v779_v5  ;;  %v780_v42 = vmul.f32 %v748_v4, %v7104_v28  ;;  %v908_v9 = vmul.f32 %v876_v58, %v844_v6 }
 0x151   :  { %v4356_v56 = vpop.eup %4355  ;;  %v654_v54 = vadd.f32 1e-05, %v622_v30  ;;  %v560_v38 = vmul.f32 0.02, %v494_v13  ;;  %v559_v36 = vmul.f32 0.02, %v491_v33  ;;  %4159 = vmatprep.mubr.msk.bf16.mxu0 %vm288_vm0, %v945_v63  ;;  %v878_v33 = vmul.f32 %v846_v16, %v846_v16 }
 0x152   :  { %v4358_v34 = vpop.eup %4357  ;;  %v909_v40 = vmul.f32 %v877_v44, %v845_v45  ;;  %v847_v41 = vmax.f32 %v815_v60, 0.0  ;;  %v752_v43 = vmul.f32 %v4356_v56, %v5116_v37  ;;  %v781_v20 = vmul.f32 %v749_v51, %v713_v39 }
 0x153   :  { %4361 = vrsqrt.f32 %v654_v54  ;;  %v624_v23 = vsub.f32 %v560_v38, %v592_v2  ;;  %v623_v5 = vsub.f32 %v559_v36, %v591_v55  ;;  %v751_v3 = vmul.f32 %v4358_v34, %v5116_v37 }
 0x154   :  { %v339_v17 = vpop.xlane.xlu1 %338  ;;  %v946_v30 = vpack.c.bf16 %v909_v40, %v908_v9  ;;  %v497_v13 = vpop.xlane.xlu0 %496  ;;  %v879_v1 = vmul.f32 %v847_v41, %v847_v41  ;;  %v816_v63 = vadd.f32 %v5121_v35, %v780_v42  ;;  %v910_v58 = vmul.f32 %v878_v33, %v846_v16 }
 0x155   :  { %v656_v46 = vadd.f32 1e-05, %v624_v23  ;;  %v655_v4 = vadd.f32 1e-05, %v623_v5  ;;  %v4360_v6 = vpop.eup %4359  ;;  %v561_v45 = vmul.f32 0.02, %v497_v13  ;;  %v817_v36 = vadd.f32 %v5121_v35, %v781_v20 }
 0x156   :  { %4160 = vmatmul.mubr.msk.bf16.vlgmr.msra.gmra.mrb[0].mxu0 %vm288_vm0, %v946_v30  ;;  %v911_v59 = vmul.f32 %v879_v1, %v847_v41  ;;  %v715_v2 = vsub.f32 %v4823_v15, %v5129_v27  ;;  %v717_v39 = vsub.f32 %v4835_v22, %v5147_v53  ;;  %v5204_v34 = vmul.f32 0.02, %v339_v17 }
 0x157   :  { %4363 = vrsqrt.f32 %v656_v46  ;;  %v625_v51 = vsub.f32 %v561_v45, %v593_v47  ;;  %v848_v56 = vmax.f32 %v816_v63, 0.0  ;;  %v753_v16 = vmul.f32 %v4360_v6, %v5116_v37 }
 0x158   :  { %4365 = vrsqrt.f32 %v655_v4  ;;  %v345_v55 = vpop.xlane.xlu1 %344  ;;  %v947_v44 = vpack.c.bf16 %v911_v59, %v910_v58  ;;  %v342_v60 = vpop.xlane.xlu0 %341  ;;  %v849_v20 = vmax.f32 %v817_v36, 0.0  ;;  %v7105_v15 = vsub.f32 %v4818_v11, %v5107_v25 }
 0x159   :  { %v5207_v1 = vmul.f32 0.02, %v345_v55  ;;  %v657_v27 = vadd.f32 1e-05, %v625_v51  ;;  %v880_v22 = vmul.f32 %v848_v56, %v848_v56  ;;  %v783_v17 = vmul.f32 %v751_v3, %v715_v2 }
 0x15a   :  { %v782_v41 = vmul.f32 %v750_v18, %v7105_v15  ;;  %4163 = vmatprep.mubr.msk.bf16.mxu0 %vm288_vm0, %v947_v44  ;;  %v7106_v53 = vsub.f32 %v4830_v19, %v5127_v24  ;;  %v718_v54 = vsub.f32 %v4912_v31, %v5161_v0  ;;  %v719_v38 = vsub.f32 %v4928_v52, %v5175_v7 }
 0x15b   :  { %v594_v28 = vmul.f32 %v5204_v34, %v5204_v34  ;;  %v5222_v11 = vmul.f32 0.02, %v342_v60  ;;  %4367 = vrsqrt.f32 %v657_v27  ;;  %v596_v25 = vmul.f32 %v5207_v1, %v5207_v1 }
 0x15c   :  { %v784_v47 = vmul.f32 %v752_v43, %v7106_v53  ;;  %v500_v18 = vpop.xlane.xlu1 %499  ;;  %v881_v42 = vmul.f32 %v849_v20, %v849_v20  ;;  %v348_v9 = vpop.xlane.xlu0 %347  ;;  %v818_v19 = vadd.f32 %v5121_v35, %v782_v41  ;;  %v912_v31 = vmul.f32 %v880_v22, %v848_v56 }
 0x15d   :  { %v4362_v24 = vpop.eup %4361  ;;  %v562_v40 = vmul.f32 0.02, %v500_v18  ;;  %v819_v0 = vadd.f32 %v5121_v35, %v783_v17  ;;  %v785_v52 = vmul.f32 %v753_v16, %v717_v39  ;;  %v5228_v43 = vmul.f32 0.02, %v348_v9 }
 0x15e   :  { %v913_v7 = vmul.f32 %v881_v42, %v849_v20  ;;  %v850_v23 = vmax.f32 %v818_v19, 0.0  ;;  %v820_v5 = vadd.f32 %v5121_v35, %v784_v47  ;;  %v754_v30 = vmul.f32 %v4362_v24, %v5116_v37 }
 0x15f   :  { %v595_v13 = vmul.f32 %v5222_v11, %v5222_v11  ;;  %v626_v33 = vsub.f32 %v562_v40, %v594_v28  ;;  %v851_v3 = vmax.f32 %v819_v0, 0.0  ;;  %v821_v45 = vadd.f32 %v5121_v35, %v785_v52 }
 0x160   :  { %v948_v46 = vpack.c.bf16 %v913_v7, %v912_v31  ;;  %v506_v4 = vpop.xlane.xlu1 %505  ;;  %v882_v63 = vmul.f32 %v850_v23, %v850_v23  ;;  %v503_v6 = vpop.xlane.xlu0 %502  ;;  %v852_v58 = vmax.f32 %v820_v5, 0.0  ;;  %v597_v44 = vmul.f32 %v5228_v43, %v5228_v43 }
 0x161   :  { %v4364_v59 = vpop.eup %4363  ;;  %v658_v36 = vadd.f32 1e-05, %v626_v33  ;;  %v564_v2 = vmul.f32 0.02, %v506_v4  ;;  %v883_v39 = vmul.f32 %v851_v3, %v851_v3  ;;  %v563_v51 = vmul.f32 0.02, %v503_v6 }
 0x162   :  { %v4366_v55 = vpop.eup %4365  ;;  %4164 = vmatmul.mubr.msk.bf16.gmra.mrb[4].mxu0 %vm288_vm0, %v948_v46  ;;  %v914_v60 = vmul.f32 %v882_v63, %v850_v23  ;;  %v853_v56 = vmax.f32 %v821_v45, 0.0  ;;  %v884_v16 = vmul.f32 %v852_v58, %v852_v58  ;;  %v756_v27 = vmul.f32 %v4364_v59, %v5116_v37 }
 0x163   :  { %v755_v20 = vmul.f32 %v4366_v55, %v5116_v37  ;;  %4369 = vrsqrt.f32 %v658_v36  ;;  %v628_v15 = vsub.f32 %v564_v2, %v596_v25  ;;  %v915_v41 = vmul.f32 %v883_v39, %v851_v3 }
 0x164   :  { %v627_v22 = vsub.f32 %v563_v51, %v595_v13  ;;  %v351_v17 = vpop.xlane.xlu1 %350  ;;  %v885_v53 = vmul.f32 %v853_v56, %v853_v56  ;;  %v509_v47 = vpop.xlane.xlu0 %508  ;;  %v786_v28 = vmul.f32 %v754_v30, %v718_v54  ;;  %v916_v9 = vmul.f32 %v884_v16, %v852_v58 }
 0x165   :  { %v660_v18 = vadd.f32 1e-05, %v628_v15  ;;  %v949_v42 = vpack.c.bf16 %v915_v41, %v914_v60  ;;  %v565_v19 = vmul.f32 0.02, %v509_v47  ;;  %v4368_v24 = vpop.eup %4367  ;;  %v787_v0 = vmul.f32 %v755_v20, %v719_v38 }
 0x166   :  { %v659_v40 = vadd.f32 1e-05, %v627_v22  ;;  %v917_v31 = vmul.f32 %v885_v53, %v853_v56  ;;  %v822_v52 = vadd.f32 %v5121_v35, %v786_v28  ;;  %v720_v25 = vsub.f32 %v4934_v57, %v5170_v32 }
 0x167   :  { %v721_v7 = vsub.f32 %v4951_v8, %v5181_v14  ;;  %v757_v23 = vmul.f32 %v4368_v24, %v5116_v37  ;;  %4371 = vrsqrt.f32 %v660_v18  ;;  %4167 = vmatprep.mubr.msk.bf16.mxu0 %vm288_vm0, %v949_v42  ;;  %v629_v5 = vsub.f32 %v565_v19, %v597_v44 }
 0x168   :  { %4373 = vrsqrt.f32 %v659_v40  ;;  %v950_v54 = vpack.c.bf16 %v917_v31, %v916_v9  ;;  %v357_v30 = vpop.xlane.xlu1 %356  ;;  %v354_v13 = vpop.xlane.xlu0 %353  ;;  %v823_v38 = vadd.f32 %v5121_v35, %v787_v0  ;;  %v5248_v33 = vmul.f32 0.02, %v351_v17 }
 0x169   :  { %v854_v3 = vmax.f32 %v822_v52, 0.0  ;;  %v788_v46 = vmul.f32 %v756_v27, %v720_v25  ;;  %v661_v57 = vadd.f32 1e-05, %v629_v5  ;;  %v789_v32 = vmul.f32 %v757_v23, %v721_v7 }
 0x16a   :  { %4168 = vmatmul.mubr.msk.bf16.gmra.mrb[8].mxu0 %vm288_vm0, %v950_v54  ;;  %v855_v8 = vmax.f32 %v823_v38, 0.0  ;;  %v5251_v14 = vmul.f32 0.02, %v357_v30  ;;  %v5253_v4 = vmul.f32 0.02, %v354_v13  ;;  %v722_v2 = vsub.f32 %v4864_v49, %v5204_v34 }
 0x16b   :  { %4375 = vrsqrt.f32 %v661_v57  ;;  %v886_v45 = vmul.f32 %v854_v3, %v854_v3  ;;  %v824_v59 = vadd.f32 %v5121_v35, %v788_v46  ;;  %v598_v39 = vmul.f32 %v5248_v33, %v5248_v33 }
 0x16c   :  { %v512_v63 = vpop.xlane.xlu1 %511  ;;  %v360_v6 = vpop.xlane.xlu0 %359  ;;  %v887_v58 = vmul.f32 %v855_v8, %v855_v8  ;;  %v825_v55 = vadd.f32 %v5121_v35, %v789_v32  ;;  %v724_v20 = vsub.f32 %v4878_v62, %v5207_v1  ;;  %v600_v15 = vmul.f32 %v5251_v14, %v5251_v14 }
 0x16d   :  { %v4370_v36 = vpop.eup %4369  ;;  %v566_v51 = vmul.f32 0.02, %v512_v63  ;;  %v918_v60 = vmul.f32 %v886_v45, %v854_v3  ;;  %v856_v16 = vmax.f32 %v824_v59, 0.0  ;;  %v599_v49 = vmul.f32 %v5253_v4, %v5253_v4 }
 0x16e   :  { %v758_v44 = vmul.f32 %v4370_v36, %v5116_v37  ;;  %v919_v56 = vmul.f32 %v887_v58, %v855_v8  ;;  %v857_v27 = vmax.f32 %v825_v55, 0.0  ;;  %v723_v62 = vsub.f32 %v4861_v48, %v5222_v11 }
 0x16f   :  { %v630_v41 = vsub.f32 %v566_v51, %v598_v39  ;;  %v888_v53 = vmul.f32 %v856_v16, %v856_v16  ;;  %v5271_v40 = vmul.f32 0.02, %v360_v6  ;;  %v725_v63 = vsub.f32 %v4875_v61, %v5228_v43 }
 0x170   :  { %v518_v34 = vpop.xlane.xlu1 %517  ;;  %v951_v22 = vpack.c.bf16 %v919_v56, %v918_v60  ;;  %v515_v17 = vpop.xlane.xlu0 %514  ;;  %v790_v47 = vmul.f32 %v758_v44, %v722_v2  ;;  %v889_v19 = vmul.f32 %v857_v27, %v857_v27  ;;  %v726_v61 = vsub.f32 %v4892_v12, %v5248_v33 }
 0x171   :  { %v4372_v28 = vpop.eup %4371  ;;  %v662_v18 = vadd.f32 1e-05, %v630_v41  ;;  %v568_v42 = vmul.f32 0.02, %v518_v34  ;;  %v567_v9 = vmul.f32 0.02, %v515_v17  ;;  %v920_v23 = vmul.f32 %v888_v53, %v856_v16 }
 0x172   :  { %v4374_v24 = vpop.eup %4373  ;;  %v760_v1 = vmul.f32 %v4372_v28, %v5116_v37  ;;  %4171 = vmatprep.mubr.msk.bf16.mxu0 %vm288_vm0, %v951_v22  ;;  %v826_v31 = vadd.f32 %v5121_v35, %v790_v47  ;;  %v921_v54 = vmul.f32 %v889_v19, %v857_v27  ;;  %v601_v46 = vmul.f32 %v5271_v40, %v5271_v40 }
 0x173   :  { %v759_v0 = vmul.f32 %v4374_v24, %v5116_v37  ;;  %4377 = vrsqrt.f32 %v662_v18  ;;  %v632_v52 = vsub.f32 %v568_v42, %v600_v15  ;;  %v631_v25 = vsub.f32 %v567_v9, %v599_v49 }
 0x174   :  { %v363_v7 = vpop.xlane.xlu1 %362  ;;  %v521_v5 = vpop.xlane.xlu0 %520  ;;  %v792_v30 = vmul.f32 %v760_v1, %v724_v20  ;;  %v858_v38 = vmax.f32 %v826_v31, 0.0  ;;  %v952_v57 = vpack.c.bf16 %v921_v54, %v920_v23  ;;  %v728_v12 = vsub.f32 %v4907_v29, %v5251_v14 }
 0x175   :  { %v664_v13 = vadd.f32 1e-05, %v632_v52  ;;  %v663_v48 = vadd.f32 1e-05, %v631_v25  ;;  %v791_v11 = vmul.f32 %v759_v0, %v723_v62  ;;  %v4376_v3 = vpop.eup %4375  ;;  %v569_v8 = vmul.f32 0.02, %v521_v5 }
 0x176   :  { %v828_v32 = vadd.f32 %v5121_v35, %v792_v30  ;;  %v761_v6 = vmul.f32 %v4376_v3, %v5116_v37  ;;  %4172 = vmatmul.mubr.msk.bf16.gmra.mrb[12].mxu0 %vm288_vm0, %v952_v57  ;;  %v5284_v2 = vmul.f32 0.02, %v363_v7  ;;  %v890_v39 = vmul.f32 %v858_v38, %v858_v38 }
 0x177   :  { %4379 = vrsqrt.f32 %v664_v13  ;;  %v633_v45 = vsub.f32 %v569_v8, %v601_v46  ;;  %v827_v36 = vadd.f32 %v5121_v35, %v791_v11  ;;  %v727_v33 = vsub.f32 %v4889_v10, %v5253_v4 }
 0x178   :  { %4381 = vrsqrt.f32 %v663_v48  ;;  %v369_v58 = vpop.xlane.xlu1 %368  ;;  %v366_v59 = vpop.xlane.xlu0 %365  ;;  %v793_v51 = vmul.f32 %v761_v6, %v725_v63  ;;  %v860_v60 = vmax.f32 %v828_v32, 0.0  ;;  %v602_v27 = vmul.f32 %v5284_v2, %v5284_v2 }
 0x179   :  { %v665_v55 = vadd.f32 1e-05, %v633_v45  ;;  %v859_v44 = vmax.f32 %v827_v36, 0.0  ;;  %v5286_v56 = vmul.f32 0.02, %v369_v58  ;;  %v922_v22 = vmul.f32 %v890_v39, %v858_v38 }
 0x17a   :  { %v829_v15 = vadd.f32 %v5121_v35, %v793_v51  ;;  %v5293_v49 = vmul.f32 0.02, %v366_v59  ;;  %v892_v28 = vmul.f32 %v860_v60, %v860_v60  ;;  %v729_v59 = vsub.f32 %v4904_v21, %v5271_v40 }
 0x17b   :  { %4383 = vrsqrt.f32 %v665_v55  ;;  %v891_v20 = vmul.f32 %v859_v44, %v859_v44  ;;  %v604_v18 = vmul.f32 %v5286_v56, %v5286_v56  ;;  %v730_v21 = vsub.f32 %v4925_v50, %v5284_v2  ;;  %v7107_v2 = vld [vmem:[#allocation6_spill] sm:$0xff] }
 0x17c   :  { %v524_v43 = vpop.xlane.xlu1 %523  ;;  %v372_v16 = vpop.xlane.xlu0 %371  ;;  %v861_v47 = vmax.f32 %v829_v15, 0.0  ;;  %v603_v52 = vmul.f32 %v5293_v49, %v5293_v49  ;;  %v924_v4 = vmul.f32 %v892_v28, %v860_v60  ;;  %v732_v50 = vsub.f32 %v4944_v26, %v5286_v56 }
 0x17d   :  { %v4378_v41 = vpop.eup %4377  ;;  %v570_v34 = vmul.f32 0.02, %v524_v43  ;;  %v923_v53 = vmul.f32 %v891_v20, %v859_v44  ;;  %v5302_v9 = vmul.f32 0.02, %v372_v16 }
 0x17e   :  { %v762_v17 = vmul.f32 %v4378_v41, %v5116_v37  ;;  %v893_v1 = vmul.f32 %v861_v47, %v861_v47 }
 0x17f   :  { %v634_v42 = vsub.f32 %v570_v34, %v602_v27  ;;  %v953_v24 = vpack.c.bf16 %v923_v53, %v922_v22  ;;  %v605_v6 = vmul.f32 %v5302_v9, %v5302_v9 }
 0x180   :  { %v530_v19 = vpop.xlane.xlu1 %529  ;;  %v527_v62 = vpop.xlane.xlu0 %526  ;;  %v794_v31 = vmul.f32 %v762_v17, %v726_v61  ;;  %v925_v23 = vmul.f32 %v893_v1, %v861_v47 }
 0x181   :  { %v4380_v0 = vpop.eup %4379  ;;  %v666_v25 = vadd.f32 1e-05, %v634_v42  ;;  %v572_v29 = vmul.f32 0.02, %v530_v19  ;;  %v571_v14 = vmul.f32 0.02, %v527_v62  ;;  %4175 = vmatprep.mubr.msk.bf16.mxu0 %vm288_vm0, %v953_v24  ;;  %v731_v24 = vsub.f32 %v7107_v2, %v5293_v49 }
 0x182   :  { %v4382_v7 = vpop.eup %4381  ;;  %v764_v10 = vmul.f32 %v4380_v0, %v5116_v37  ;;  %v830_v54 = vadd.f32 %v5121_v35, %v794_v31  ;;  %v954_v11 = vpack.c.bf16 %v925_v23, %v924_v4 }
 0x183   :  { %v763_v5 = vmul.f32 %v4382_v7, %v5116_v37  ;;  %4385 = vrsqrt.f32 %v666_v25  ;;  %v636_v30 = vsub.f32 %v572_v29, %v604_v18  ;;  %v635_v13 = vsub.f32 %v571_v14, %v603_v52 }
 0x184   :  { %v375_v48 = vpop.xlane.xlu1 %374  ;;  %v533_v38 = vpop.xlane.xlu0 %532  ;;  %v796_v3 = vmul.f32 %v764_v10, %v728_v12  ;;  %v862_v32 = vmax.f32 %v830_v54, 0.0  ;;  %4176 = vmatmul.mubr.msk.bf16.gmra.mrb[16].mxu0 %vm288_vm0, %v954_v11 }
 0x185   :  { %v668_v46 = vadd.f32 1e-05, %v636_v30  ;;  %v667_v57 = vadd.f32 1e-05, %v635_v13  ;;  %v795_v8 = vmul.f32 %v763_v5, %v727_v33  ;;  %v4384_v63 = vpop.eup %4383  ;;  %v573_v45 = vmul.f32 0.02, %v533_v38 }
 0x186   :  { %v832_v58 = vadd.f32 %v5121_v35, %v796_v3  ;;  %v765_v36 = vmul.f32 %v4384_v63, %v5116_v37  ;;  %v5318_v60 = vmul.f32 0.02, %v375_v48  ;;  %v894_v61 = vmul.f32 %v862_v32, %v862_v32 }
 0x187   :  { %4387 = vrsqrt.f32 %v668_v46  ;;  %v637_v39 = vsub.f32 %v573_v45, %v605_v6  ;;  %v831_v44 = vadd.f32 %v5121_v35, %v795_v8 }
 0x188   :  { %4389 = vrsqrt.f32 %v667_v57  ;;  %v381_v51 = vpop.xlane.xlu1 %380  ;;  %v378_v55 = vpop.xlane.xlu0 %377  ;;  %v797_v43 = vmul.f32 %v765_v36, %v729_v59  ;;  %v864_v15 = vmax.f32 %v832_v58, 0.0  ;;  %v606_v53 = vmul.f32 %v5318_v60, %v5318_v60  ;;  %v7108_v59 = vld [vmem:[#allocation7_spill] sm:$0xff] }
 0x189   :  { %v669_v16 = vadd.f32 1e-05, %v637_v39  ;;  %v863_v20 = vmax.f32 %v831_v44, 0.0  ;;  %v5320_v41 = vmul.f32 0.02, %v381_v51  ;;  %v926_v12 = vmul.f32 %v894_v61, %v862_v32 }
 0x18a   :  { %v833_v22 = vadd.f32 %v5121_v35, %v797_v43  ;;  %v5327_v47 = vmul.f32 0.02, %v378_v55  ;;  %v896_v19 = vmul.f32 %v864_v15, %v864_v15  ;;  %v733_v36 = vsub.f32 %v7108_v59, %v5302_v9 }
 0x18b   :  { %4391 = vrsqrt.f32 %v669_v16  ;;  %v895_v34 = vmul.f32 %v863_v20, %v863_v20  ;;  %v608_v62 = vmul.f32 %v5320_v41, %v5320_v41 }
 0x18c   :  { %v536_v40 = vpop.xlane.xlu1 %535  ;;  %v384_v27 = vpop.xlane.xlu0 %383  ;;  %v865_v42 = vmax.f32 %v833_v22, 0.0  ;;  %v607_v10 = vmul.f32 %v5327_v47, %v5327_v47  ;;  %v928_v54 = vmul.f32 %v896_v19, %v864_v15 }
 0x18d   :  { %v4386_v17 = vpop.eup %4385  ;;  %v574_v28 = vmul.f32 0.02, %v536_v40  ;;  %v927_v18 = vmul.f32 %v895_v34, %v863_v20  ;;  %v5336_v31 = vmul.f32 0.02, %v384_v27 }
 0x18e   :  { %v766_v33 = vmul.f32 %v4386_v17, %v5116_v37  ;;  %v897_v29 = vmul.f32 %v865_v42, %v865_v42 }
 0x18f   :  { %v638_v1 = vsub.f32 %v574_v28, %v606_v53  ;;  %v955_v52 = vpack.c.bf16 %v927_v18, %v926_v12  ;;  %v609_v38 = vmul.f32 %v5336_v31, %v5336_v31  ;;  %v7109_v53 = vld [vmem:[#allocation9_spill] sm:$0xff] }
 0x190   :  { %v542_v0 = vpop.xlane.xlu1 %541  ;;  %v539_v25 = vpop.xlane.xlu0 %538  ;;  %v798_v14 = vmul.f32 %v766_v33, %v730_v21  ;;  %v929_v5 = vmul.f32 %v897_v29, %v865_v42  ;;  %v734_v28 = vsub.f32 %v7109_v53, %v5318_v60  ;;  %v7111_v60 = vld [vmem:[#allocation8_spill] sm:$0xff] }
 0x191   :  { %v4388_v7 = vpop.eup %4387  ;;  %v670_v4 = vadd.f32 1e-05, %v638_v1  ;;  %v576_v26 = vmul.f32 0.02, %v542_v0  ;;  %v575_v56 = vmul.f32 0.02, %v539_v25  ;;  %4179 = vmatprep.mubr.msk.bf16.mxu0 %vm288_vm0, %v955_v52  ;;  %v735_v25 = vsub.f32 %v7111_v60, %v5327_v47 }
 0x192   :  { %v4390_v23 = vpop.eup %4389  ;;  %v768_v49 = vmul.f32 %v4388_v7, %v5116_v37  ;;  %v834_v30 = vadd.f32 %v5121_v35, %v798_v14  ;;  %v956_v3 = vpack.c.bf16 %v929_v5, %v928_v54 }
 0x193   :  { %v767_v13 = vmul.f32 %v4390_v23, %v5116_v37  ;;  %4393 = vrsqrt.f32 %v670_v4  ;;  %v640_v48 = vsub.f32 %v576_v26, %v608_v62  ;;  %v639_v11 = vsub.f32 %v575_v56, %v607_v10  ;;  %v7110_v62 = vld [vmem:[#allocation11_spill] sm:$0xff]  ;;  %v7112_v56 = vld [vmem:[#allocation10_spill] sm:$0xff] }
 0x194   :  { %v545_v46 = vpop.xlane.xlu0 %544  ;;  %v866_v57 = vmax.f32 %v834_v30, 0.0  ;;  %v800_v8 = vmul.f32 %v768_v49, %v732_v50  ;;  %4180 = vmatmul.mubr.msk.bf16.gmra.mrb[20].mxu0 %vm288_vm0, %v956_v3  ;;  %v736_v1 = vsub.f32 %v7110_v62, %v5320_v41  ;;  %v737_v23 = vsub.f32 %v7112_v56, %v5336_v31 }
 0x195   :  { %v672_v32 = vadd.f32 1e-05, %v640_v48  ;;  %v671_v63 = vadd.f32 1e-05, %v639_v11  ;;  %v577_v6 = vmul.f32 0.02, %v545_v46  ;;  %v799_v45 = vmul.f32 %v767_v13, %v731_v24  ;;  %v4392_v58 = vpop.eup %4391 }
 0x196   :  { %v836_v39 = vadd.f32 %v5121_v35, %v800_v8  ;;  %v769_v51 = vmul.f32 %v4392_v58, %v5116_v37  ;;  %v898_v61 = vmul.f32 %v866_v57, %v866_v57 }
 0x197   :  { %4395 = vrsqrt.f32 %v672_v32  ;;  %v641_v55 = vsub.f32 %v577_v6, %v609_v38  ;;  %v835_v44 = vadd.f32 %v5121_v35, %v799_v45  ;;  %v7113_v6 = vld [vmem:[#allocation5_spill] sm:$0xff] }
 0x198   :  { %4397 = vrsqrt.f32 %v671_v63  ;;  %v801_v20 = vmul.f32 %v769_v51, %v733_v36  ;;  %v868_v15 = vmax.f32 %v836_v39, 0.0  ;;  %v930_v27 = vmul.f32 %v898_v61, %v866_v57 }
 0x199   :  { %v673_v43 = vadd.f32 1e-05, %v641_v55  ;;  %v867_v16 = vmax.f32 %v835_v44, 0.0  ;;  %v963_v45 = vsub.s32 4, %v7113_v6 }
 0x19a   :  { %v837_v9 = vadd.f32 %v5121_v35, %v801_v20  ;;  %v900_v17 = vmul.f32 %v868_v15, %v868_v15 }
 0x19b   :  { %4399 = vrsqrt.f32 %v673_v43  ;;  %v899_v21 = vmul.f32 %v867_v16, %v867_v16 }
 0x19c   :  { %v869_v22 = vmax.f32 %v837_v9, 0.0  ;;  %v932_v50 = vmul.f32 %v900_v17, %v868_v15 }
 0x19d   :  { %v4394_v40 = vpop.eup %4393  ;;  %v931_v34 = vmul.f32 %v899_v21, %v867_v16 }
 0x19e   :  { %v770_v12 = vmul.f32 %v4394_v40, %v5116_v37  ;;  %v901_v18 = vmul.f32 %v869_v22, %v869_v22 }
 0x19f   :  { %v957_v33 = vpack.c.bf16 %v931_v34, %v930_v27 }
 0x1a0   :  { %v802_v42 = vmul.f32 %v770_v12, %v734_v28  ;;  %v933_v2 = vmul.f32 %v901_v18, %v869_v22 }
 0x1a1   :  { %v4396_v19 = vpop.eup %4395  ;;  %4183 = vmatprep.mubr.msk.bf16.mxu0 %vm288_vm0, %v957_v33 }
 0x1a2   :  { %v4398_v24 = vpop.eup %4397  ;;  %v772_v0 = vmul.f32 %v4396_v19, %v5116_v37  ;;  %v838_v52 = vadd.f32 %v5121_v35, %v802_v42  ;;  %v958_v14 = vpack.c.bf16 %v933_v2, %v932_v50 }
 0x1a3   :  { %v771_v29 = vmul.f32 %v4398_v24, %v5116_v37 }
 0x1a4   :  { %v804_v7 = vmul.f32 %v772_v0, %v736_v1  ;;  %4184 = vmatmul.mubr.msk.bf16.gmra.mrb[24].mxu0 %vm288_vm0, %v958_v14  ;;  %v870_v26 = vmax.f32 %v838_v52, 0.0 }
 0x1a5   :  { %v4400_v10 = vpop.eup %4399  ;;  %v803_v4 = vmul.f32 %v771_v29, %v735_v25 }
 0x1a6   :  { %v773_v41 = vmul.f32 %v4400_v10, %v5116_v37  ;;  %v840_v49 = vadd.f32 %v5121_v35, %v804_v7  ;;  %v902_v13 = vmul.f32 %v870_v26, %v870_v26 }
 0x1a7   :  { %v839_v54 = vadd.f32 %v5121_v35, %v803_v4 }
 0x1a8   :  { %v805_v5 = vmul.f32 %v773_v41, %v737_v23  ;;  %v872_v47 = vmax.f32 %v840_v49, 0.0  ;;  %v934_v46 = vmul.f32 %v902_v13, %v870_v26 }
 0x1a9   :  { %v871_v30 = vmax.f32 %v839_v54, 0.0 }
 0x1aa   :  { %v841_v48 = vadd.f32 %v5121_v35, %v805_v5  ;;  %v904_v3 = vmul.f32 %v872_v47, %v872_v47  ;;  %v5377_v35 = vld [vmem:[%s7080_s1] sm:$0xff] }
 0x1ab   :  { %v903_v11 = vmul.f32 %v871_v30, %v871_v30  ;;  %v5382_v58 = vrot.slane %v5377_v35, %v963_v45 }
 0x1ac   :  { %v873_v38 = vmax.f32 %v841_v48, 0.0  ;;  %v936_v31 = vmul.f32 %v904_v3, %v872_v47 }
 0x1ad   :  { %v935_v57 = vmul.f32 %v903_v11, %v871_v30 }
 0x1ae   :  { %v905_v8 = vmul.f32 %v873_v38, %v873_v38 }
 0x1af   :  { %v959_v32 = vpack.c.bf16 %v935_v57, %v934_v46 }
 0x1b0   :  { %v937_v63 = vmul.f32 %v905_v8, %v873_v38 }
 0x1b1   :  { %4187 = vmatprep.mubr.msk.bf16.mxu0 %vm288_vm0, %v959_v32 }
 0x1b2   :  { %v960_v37 = vpack.c.bf16 %v937_v63, %v936_v31 }
 0x1b4   :  { %4188 = vmatmul.mubr.msk.bf16.gmra.mrb[28].mxu0 %vm288_vm0, %v960_v37 }
 0x229   :  { %v4161_v59 = vpop.f32.mrb[0].mxu0 }
 0x22a   :  { %v5385_v36 = vadd.f32 %v4161_v59, %v5382_v58  ;;  %v1072_v39 = vpop.f32.mrb[1].mxu0 }
 0x22b   :  { %v4162_v51 = vpop.f32.mrb[2].mxu0  ;;  %v5388_v55 = vadd.f32 %v1072_v39, %v5382_v58 }
 0x22c   :  { %v5391_v44 = vadd.f32 %v4162_v51, %v5382_v58  ;;  %v1075_v61 = vpop.f32.mrb[3].mxu0  ;;  %v1205_v43 = vsel %vm288_vm0, %v5385_v36, 0.0  ;;  %v1329_v21 = vmul.f32 %v5385_v36, %v5385_v36 }
 0x22d   :  { %1206 = vadd.xlane.f32.xlu1 %v1205_v43  ;;  %v5396_v16 = vadd.f32 %v1075_v61, %v5382_v58  ;;  %v1199_v15 = vsel %vm288_vm0, %v5388_v55, 0.0  ;;  %v1327_v34 = vmul.f32 %v5388_v55, %v5388_v55 }
 0x22e   :  { %v1208_v20 = vsel %vm288_vm0, %v5391_v44, 0.0  ;;  %v1330_v40 = vmul.f32 %v5391_v44, %v5391_v44  ;;  %v1365_v27 = vsel %vm288_vm0, %v1329_v21, 0.0 }
 0x22f   :  { %1209 = vadd.xlane.f32.xlu0 %v1208_v20  ;;  %v1202_v9 = vsel %vm288_vm0, %v5396_v16, 0.0  ;;  %v1328_v28 = vmul.f32 %v5396_v16, %v5396_v16  ;;  %v1359_v42 = vsel %vm288_vm0, %v1327_v34, 0.0 }
 0x230   :  { %v1368_v53 = vsel %vm288_vm0, %v1330_v40, 0.0 }
 0x231   :  { %1200 = vadd.xlane.f32.xlu1 %v1199_v15  ;;  %v1362_v50 = vsel %vm288_vm0, %v1328_v28, 0.0 }
 0x233   :  { %1203 = vadd.xlane.f32.xlu0 %v1202_v9 }
 0x235   :  { %v4165_v22 = vpop.f32.mrb[4].mxu0  ;;  %1366 = vadd.xlane.f32.xlu1 %v1365_v27 }
 0x236   :  { %v1088_v17 = vpop.f32.mrb[5].mxu0  ;;  %v5415_v33 = vadd.f32 %v4165_v22, %v5382_v58 }
 0x237   :  { %v4166_v12 = vpop.f32.mrb[6].mxu0  ;;  %1369 = vadd.xlane.f32.xlu0 %v1368_v53  ;;  %v5423_v2 = vadd.f32 %v1088_v17, %v5382_v58  ;;  %v4325_v53 = vld [vmem:[%s7081_s2 + $0x1c] sm:$0xff]  }
 0x238   :  { %v1091_v18 = vpop.f32.mrb[7].mxu0  ;;  %v5419_v19 = vadd.f32 %v4166_v12, %v5382_v58  ;;  %v1217_v24 = vsel %vm288_vm0, %v5415_v33, 0.0  ;;  %v1333_v14 = vmul.f32 %v5415_v33, %v5415_v33  ;;  %4191 = vmatprep.subr.bf16.mxu1 %v4325_v53 }
 0x239   :  { %1360 = vadd.xlane.f32.xlu1 %v1359_v42  ;;  %v5428_v1 = vadd.f32 %v1091_v18, %v5382_v58  ;;  %v1211_v29 = vsel %vm288_vm0, %v5423_v2, 0.0  ;;  %v1331_v26 = vmul.f32 %v5423_v2, %v5423_v2  ;;  %4192 = vmatpush3.bf16.msra.mxu1 %v4325_v53 }
 0x23a   :  { %v1220_v52 = vsel %vm288_vm0, %v5419_v19, 0.0  ;;  %v1334_v10 = vmul.f32 %v5419_v19, %v5419_v19  ;;  %v1377_v4 = vsel %vm288_vm0, %v1333_v14, 0.0 }
 0x23b   :  { %1363 = vadd.xlane.f32.xlu0 %v1362_v50  ;;  %v1214_v7 = vsel %vm288_vm0, %v5428_v1, 0.0  ;;  %v1332_v23 = vmul.f32 %v5428_v1, %v5428_v1  ;;  %v1371_v49 = vsel %vm288_vm0, %v1331_v26, 0.0  ;;  %v4326_v50 = vld [vmem:[%s7081_s2 + $0x24] sm:$0xff]  }
 0x23c   :  { %v1380_v56 = vsel %vm288_vm0, %v1334_v10, 0.0  ;;  %4193 = vmatprep.subr.bf16.mxu1 %v4326_v50 }
 0x23d   :  { %v4169_v62 = vpop.f32.mrb[8].mxu0  ;;  %1218 = vadd.xlane.f32.xlu1 %v1217_v24  ;;  %v1374_v5 = vsel %vm288_vm0, %v1332_v23, 0.0  ;;  %4194 = vmatpush3.bf16.msra.mxu1 %v4326_v50 }
 0x23e   :  { %v1104_v0 = vpop.f32.mrb[9].mxu0  ;;  %v5447_v41 = vadd.f32 %v4169_v62, %v5382_v58 }
 0x23f   :  { %v4170_v60 = vpop.f32.mrb[10].mxu0  ;;  %1221 = vadd.xlane.f32.xlu0 %v1220_v52  ;;  %v5455_v30 = vadd.f32 %v1104_v0, %v5382_v58 }
 0x240   :  { %v1107_v25 = vpop.f32.mrb[11].mxu0  ;;  %v5451_v54 = vadd.f32 %v4170_v60, %v5382_v58  ;;  %v1229_v48 = vsel %vm288_vm0, %v5447_v41, 0.0  ;;  %v1337_v8 = vmul.f32 %v5447_v41, %v5447_v41  ;;  %v4327_v60 = vld [vmem:[%s7081_s2 + $0x2c] sm:$0xff]  }
 0x241   :  { %1212 = vadd.xlane.f32.xlu1 %v1211_v29  ;;  %v5460_v38 = vadd.f32 %v1107_v25, %v5382_v58  ;;  %v1223_v57 = vsel %vm288_vm0, %v5455_v30, 0.0  ;;  %v1335_v37 = vmul.f32 %v5455_v30, %v5455_v30  ;;  %4195 = vmatprep.subr.bf16.mxu1 %v4327_v60 }
 0x242   :  { %v1232_v46 = vsel %vm288_vm0, %v5451_v54, 0.0  ;;  %v1338_v31 = vmul.f32 %v5451_v54, %v5451_v54  ;;  %v1389_v63 = vsel %vm288_vm0, %v1337_v8, 0.0  ;;  %4196 = vmatpush3.bf16.msra.mxu1 %v4327_v60 }
 0x243   :  { %1215 = vadd.xlane.f32.xlu0 %v1214_v7  ;;  %v1226_v32 = vsel %vm288_vm0, %v5460_v38, 0.0  ;;  %v1336_v39 = vmul.f32 %v5460_v38, %v5460_v38  ;;  %v1383_v61 = vsel %vm288_vm0, %v1335_v37, 0.0 }
 0x244   :  { %v1392_v59 = vsel %vm288_vm0, %v1338_v31, 0.0 }
 0x245   :  { %1378 = vadd.xlane.f32.xlu1 %v1377_v4  ;;  %v1386_v21 = vsel %vm288_vm0, %v1336_v39, 0.0 }
 0x247   :  { %1381 = vadd.xlane.f32.xlu0 %v1380_v56  ;;  %v4328_v56 = vld [vmem:[%s7081_s2 + $0x34] ss:$0 sps:$4 sm:$0x11]  }
 0x248   :  { %4312 = vmatprep.subr.msk.bf16.mxu1 %vm1034_vm1, %v4328_v56 }
 0x249   :  { %1372 = vadd.xlane.f32.xlu1 %v1371_v49  ;;  %v4173_v47 = vpop.f32.mrb[12].mxu0 }
 0x24a   :  { %v1120_v13 = vpop.f32.mrb[13].mxu0  ;;  %v5479_v51 = vadd.f32 %v4173_v47, %v5382_v58  ;;  %v1945_v47 = vsel %vm1034_vm1, %v4328_v56, 0 }
 0x24b   :  { %1375 = vadd.xlane.f32.xlu0 %v1374_v5  ;;  %v4174_v11 = vpop.f32.mrb[14].mxu0  ;;  %v5487_v40 = vadd.f32 %v1120_v13, %v5382_v58  ;;  %4198 = vmatpush3.bf16.msra.mxu1 %v1945_v47 }
 0x24c   :  { %v1123_v3 = vpop.f32.mrb[15].mxu0  ;;  %v5483_v20 = vadd.f32 %v4174_v11, %v5382_v58  ;;  %v1241_v34 = vsel %vm288_vm0, %v5479_v51, 0.0  ;;  %v1341_v12 = vmul.f32 %v5479_v51, %v5479_v51 }
 0x24d   :  { %1230 = vadd.xlane.f32.xlu1 %v1229_v48  ;;  %v5492_v22 = vadd.f32 %v1123_v3, %v5382_v58  ;;  %v1235_v28 = vsel %vm288_vm0, %v5487_v40, 0.0  ;;  %v1339_v62 = vmul.f32 %v5487_v40, %v5487_v40 }
 0x24e   :  { %v1244_v17 = vsel %vm288_vm0, %v5483_v20, 0.0  ;;  %v1342_v42 = vmul.f32 %v5483_v20, %v5483_v20  ;;  %v1401_v24 = vsel %vm288_vm0, %v1341_v12, 0.0 }
 0x24f   :  { %1233 = vadd.xlane.f32.xlu0 %v1232_v46  ;;  %v1238_v18 = vsel %vm288_vm0, %v5492_v22, 0.0  ;;  %v1340_v52 = vmul.f32 %v5492_v22, %v5492_v22  ;;  %v1395_v29 = vsel %vm288_vm0, %v1339_v62, 0.0 }
 0x250   :  { %v1404_v0 = vsel %vm288_vm0, %v1342_v42, 0.0 }
 0x251   :  { %1224 = vadd.xlane.f32.xlu1 %v1223_v57  ;;  %v1398_v4 = vsel %vm288_vm0, %v1340_v52, 0.0 }
 0x253   :  { %1227 = vadd.xlane.f32.xlu0 %v1226_v32 }
 0x255   :  { %1390 = vadd.xlane.f32.xlu1 %v1389_v63 }
 0x257   :  { %1393 = vadd.xlane.f32.xlu0 %v1392_v59  ;;  %v4177_v43 = vpop.f32.mrb[16].mxu0 }
 0x258   :  { %v1136_v15 = vpop.f32.mrb[17].mxu0  ;;  %v5520_v25 = vadd.f32 %v4177_v43, %v5382_v58 }
 0x259   :  { %1384 = vadd.xlane.f32.xlu1 %v1383_v61  ;;  %v4178_v9 = vpop.f32.mrb[18].mxu0  ;;  %v5531_v23 = vadd.f32 %v1136_v15, %v5382_v58 }
 0x25a   :  { %v1139_v27 = vpop.f32.mrb[19].mxu0  ;;  %v5524_v7 = vadd.f32 %v4178_v9, %v5382_v58  ;;  %v1253_v5 = vsel %vm288_vm0, %v5520_v25, 0.0  ;;  %v1345_v3 = vmul.f32 %v5520_v25, %v5520_v25 }
 0x25b   :  { %1387 = vadd.xlane.f32.xlu0 %v1386_v21  ;;  %v5538_v13 = vadd.f32 %v1139_v27, %v5382_v58  ;;  %v1247_v11 = vsel %vm288_vm0, %v5531_v23, 0.0  ;;  %v1343_v32 = vmul.f32 %v5531_v23, %v5531_v23 }
 0x25c   :  { %v1256_v48 = vsel %vm288_vm0, %v5524_v7, 0.0  ;;  %v1346_v57 = vmul.f32 %v5524_v7, %v5524_v7  ;;  %v1413_v8 = vsel %vm288_vm0, %v1345_v3, 0.0 }
 0x25d   :  { %1242 = vadd.xlane.f32.xlu1 %v1241_v34  ;;  %v1250_v46 = vsel %vm288_vm0, %v5538_v13, 0.0  ;;  %v1344_v63 = vmul.f32 %v5538_v13, %v5538_v13  ;;  %v1407_v59 = vsel %vm288_vm0, %v1343_v32, 0.0 }
 0x25e   :  { %v1416_v31 = vsel %vm288_vm0, %v1346_v57, 0.0 }
 0x25f   :  { %1245 = vadd.xlane.f32.xlu0 %v1244_v17  ;;  %v1410_v15 = vsel %vm288_vm0, %v1344_v63, 0.0 }
 0x261   :  { %1236 = vadd.xlane.f32.xlu1 %v1235_v28 }
 0x263   :  { %1239 = vadd.xlane.f32.xlu0 %v1238_v18 }
 0x265   :  { %1402 = vadd.xlane.f32.xlu1 %v1401_v24 }
 0x267   :  { %1405 = vadd.xlane.f32.xlu0 %v1404_v0  ;;  %v4181_v14 = vpop.f32.mrb[20].mxu0 }
 0x268   :  { %v1152_v10 = vpop.f32.mrb[21].mxu0  ;;  %v5557_v37 = vadd.f32 %v4181_v14, %v5382_v58 }
 0x269   :  { %1396 = vadd.xlane.f32.xlu1 %v1395_v29  ;;  %v4182_v26 = vpop.f32.mrb[22].mxu0  ;;  %v5565_v27 = vadd.f32 %v1152_v10, %v5382_v58 }
 0x26a   :  { %v1155_v49 = vpop.f32.mrb[23].mxu0  ;;  %v5561_v43 = vadd.f32 %v4182_v26, %v5382_v58  ;;  %v1265_v34 = vsel %vm288_vm0, %v5557_v37, 0.0  ;;  %v1349_v12 = vmul.f32 %v5557_v37, %v5557_v37 }
 0x26b   :  { %1399 = vadd.xlane.f32.xlu0 %v1398_v4  ;;  %v5570_v17 = vadd.f32 %v1155_v49, %v5382_v58  ;;  %v1259_v28 = vsel %vm288_vm0, %v5565_v27, 0.0  ;;  %v1347_v24 = vmul.f32 %v5565_v27, %v5565_v27 }
 0x26c   :  { %v1268_v53 = vsel %vm288_vm0, %v5561_v43, 0.0  ;;  %v1350_v42 = vmul.f32 %v5561_v43, %v5561_v43  ;;  %v1425_v50 = vsel %vm288_vm0, %v1349_v12, 0.0 }
 0x26d   :  { %1254 = vadd.xlane.f32.xlu1 %v1253_v5  ;;  %v1262_v18 = vsel %vm288_vm0, %v5570_v17, 0.0  ;;  %v1348_v0 = vmul.f32 %v5570_v17, %v5570_v17  ;;  %v1419_v29 = vsel %vm288_vm0, %v1347_v24, 0.0 }
 0x26e   :  { %v1428_v62 = vsel %vm288_vm0, %v1350_v42, 0.0 }
 0x26f   :  { %1257 = vadd.xlane.f32.xlu0 %v1256_v48  ;;  %v1422_v26 = vsel %vm288_vm0, %v1348_v0, 0.0 }
 0x271   :  { %1248 = vadd.xlane.f32.xlu1 %v1247_v11 }
 0x273   :  { %1251 = vadd.xlane.f32.xlu0 %v1250_v46 }
 0x275   :  { %1414 = vadd.xlane.f32.xlu1 %v1413_v8 }
 0x277   :  { %1417 = vadd.xlane.f32.xlu0 %v1416_v31  ;;  %v4185_v39 = vpop.f32.mrb[24].mxu0 }
 0x278   :  { %v1168_v61 = vpop.f32.mrb[25].mxu0  ;;  %v5589_v60 = vadd.f32 %v4185_v39, %v5382_v58 }
 0x279   :  { %1408 = vadd.xlane.f32.xlu1 %v1407_v59  ;;  %v4186_v21 = vpop.f32.mrb[26].mxu0  ;;  %v5597_v49 = vadd.f32 %v1168_v61, %v5382_v58 }
 0x27a   :  { %v1171_v9 = vpop.f32.mrb[27].mxu0  ;;  %v5593_v4 = vadd.f32 %v4186_v21, %v5382_v58  ;;  %v1277_v5 = vsel %vm288_vm0, %v5589_v60, 0.0  ;;  %v1353_v3 = vmul.f32 %v5589_v60, %v5589_v60 }
 0x27b   :  { %1411 = vadd.xlane.f32.xlu0 %v1410_v15  ;;  %v5602_v47 = vadd.f32 %v1171_v9, %v5382_v58  ;;  %v1271_v11 = vsel %vm288_vm0, %v5597_v49, 0.0  ;;  %v1351_v32 = vmul.f32 %v5597_v49, %v5597_v49 }
 0x27c   :  { %v1280_v48 = vsel %vm288_vm0, %v5593_v4, 0.0  ;;  %v1354_v57 = vmul.f32 %v5593_v4, %v5593_v4  ;;  %v1437_v8 = vsel %vm288_vm0, %v1353_v3, 0.0 }
 0x27d   :  { %1266 = vadd.xlane.f32.xlu1 %v1265_v34  ;;  %v1274_v46 = vsel %vm288_vm0, %v5602_v47, 0.0  ;;  %v1352_v63 = vmul.f32 %v5602_v47, %v5602_v47  ;;  %v1431_v39 = vsel %vm288_vm0, %v1351_v32, 0.0 }
 0x27e   :  { %v1440_v31 = vsel %vm288_vm0, %v1354_v57, 0.0 }
 0x27f   :  { %1269 = vadd.xlane.f32.xlu0 %v1268_v53  ;;  %v1434_v15 = vsel %vm288_vm0, %v1352_v63, 0.0 }
 0x281   :  { %1260 = vadd.xlane.f32.xlu1 %v1259_v28 }
 0x283   :  { %1263 = vadd.xlane.f32.xlu0 %v1262_v18 }
 0x285   :  { %1426 = vadd.xlane.f32.xlu1 %v1425_v50 }
 0x287   :  { %1429 = vadd.xlane.f32.xlu0 %v1428_v62  ;;  %v4189_v52 = vpop.f32.mrb[28].mxu0 }
 0x288   :  { %v1184_v14 = vpop.f32.mrb[29].mxu0  ;;  %v5621_v59 = vadd.f32 %v4189_v52, %v5382_v58 }
 0x289   :  { %1420 = vadd.xlane.f32.xlu1 %v1419_v29  ;;  %v4190_v10 = vpop.f32.mrb[30].mxu0  ;;  %v5629_v21 = vadd.f32 %v1184_v14, %v5382_v58 }
 0x28a   :  { %v1187_v56 = vpop.f32.mrb[31].mxu0  ;;  %v5625_v61 = vadd.f32 %v4190_v10, %v5382_v58  ;;  %v1289_v9 = vsel %vm288_vm0, %v5621_v59, 0.0  ;;  %v1357_v50 = vmul.f32 %v5621_v59, %v5621_v59 }
 0x28b   :  { %1423 = vadd.xlane.f32.xlu0 %v1422_v26  ;;  %v5634_v34 = vadd.f32 %v1187_v56, %v5382_v58  ;;  %v1283_v28 = vsel %vm288_vm0, %v5629_v21, 0.0  ;;  %v1355_v12 = vmul.f32 %v5629_v21, %v5629_v21 }
 0x28c   :  { %v1292_v53 = vsel %vm288_vm0, %v5625_v61, 0.0  ;;  %v1358_v62 = vmul.f32 %v5625_v61, %v5625_v61  ;;  %v1449_v0 = vsel %vm288_vm0, %v1357_v50, 0.0 }
 0x28d   :  { %1278 = vadd.xlane.f32.xlu1 %v1277_v5  ;;  %v1286_v18 = vsel %vm288_vm0, %v5634_v34, 0.0  ;;  %v1356_v42 = vmul.f32 %v5634_v34, %v5634_v34  ;;  %v1443_v58 = vsel %vm288_vm0, %v1355_v12, 0.0 }
 0x28e   :  { %v1452_v52 = vsel %vm288_vm0, %v1358_v62, 0.0 }
 0x28f   :  { %1281 = vadd.xlane.f32.xlu0 %v1280_v48  ;;  %v1446_v24 = vsel %vm288_vm0, %v1356_v42, 0.0 }
 0x291   :  { %1272 = vadd.xlane.f32.xlu1 %v1271_v11 }
 0x293   :  { %1275 = vadd.xlane.f32.xlu0 %v1274_v46 }
 0x295   :  { %1438 = vadd.xlane.f32.xlu1 %v1437_v8 }
 0x297   :  { %1441 = vadd.xlane.f32.xlu0 %v1440_v31 }
 0x299   :  { %1432 = vadd.xlane.f32.xlu1 %v1431_v39 }
 0x29b   :  { %1435 = vadd.xlane.f32.xlu0 %v1434_v15 }
 0x29d   :  { %1290 = vadd.xlane.f32.xlu1 %v1289_v9 }
 0x29f   :  { %1293 = vadd.xlane.f32.xlu0 %v1292_v53 }
 0x2a1   :  { %1284 = vadd.xlane.f32.xlu1 %v1283_v28 }
 0x2a3   :  { %1287 = vadd.xlane.f32.xlu0 %v1286_v18 }
 0x2a5   :  { %1444 = vadd.xlane.f32.xlu1 %v1443_v58 }
 0x2a7   :  { %1447 = vadd.xlane.f32.xlu0 %v1446_v24 }
 0x2a9   :  { %1450 = vadd.xlane.f32.xlu1 %v1449_v0 }
 0x2ab   :  { %1453 = vadd.xlane.f32.xlu0 %v1452_v52  ;;  %v1649_v52 = vsub.s32 5, %v7113_v6 }
 0x2ba   :  { %v1207_v29 = vpop.xlane.xlu1 %1206 }
 0x2bb   :  { %v1297_v26 = vmul.f32 0.02, %v1207_v29 }
 0x2bc   :  { %v1210_v14 = vpop.xlane.xlu0 %1209 }
 0x2bd   :  { %v5654_v5 = vmul.f32 0.02, %v1210_v14  ;;  %v1489_v11 = vmul.f32 %v1297_v26, %v1297_v26 }
 0x2be   :  { %v1201_v10 = vpop.xlane.xlu1 %1200 }
 0x2bf   :  { %v5656_v3 = vmul.f32 0.02, %v1201_v10  ;;  %v1490_v32 = vmul.f32 %v5654_v5, %v5654_v5 }
 0x2c0   :  { %v1204_v56 = vpop.xlane.xlu0 %1203 }
 0x2c1   :  { %v5658_v57 = vmul.f32 0.02, %v1204_v56  ;;  %v1487_v15 = vmul.f32 %v5656_v3, %v5656_v3 }
 0x2c2   :  { %v1367_v48 = vpop.xlane.xlu1 %1366 }
 0x2c3   :  { %v1457_v46 = vmul.f32 0.02, %v1367_v48  ;;  %v1488_v12 = vmul.f32 %v5658_v57, %v5658_v57  ;;  %v5670_v48 = vrot.slane %v5377_v35, %v1649_v52 }
 0x2c4   :  { %v1370_v8 = vpop.xlane.xlu0 %1369 }
 0x2c5   :  { %v1521_v31 = vsub.f32 %v1457_v46, %v1489_v11  ;;  %v1458_v63 = vmul.f32 0.02, %v1370_v8  ;;  %v1717_v46 = vsub.s32 6, %v7113_v6 }
 0x2c6   :  { %v1361_v39 = vpop.xlane.xlu1 %1360 }
 0x2c7   :  { %v1553_v9 = vadd.f32 1e-05, %v1521_v31  ;;  %v1522_v53 = vsub.f32 %v1458_v63, %v1490_v32  ;;  %v1455_v28 = vmul.f32 0.02, %v1361_v39 }
 0x2c8   :  { %v1364_v18 = vpop.xlane.xlu0 %1363 }
 0x2c9   :  { %4401 = vrsqrt.f32 %v1553_v9  ;;  %v1554_v42 = vadd.f32 1e-05, %v1522_v53  ;;  %v1519_v58 = vsub.f32 %v1455_v28, %v1487_v15  ;;  %v1456_v50 = vmul.f32 0.02, %v1364_v18 }
 0x2ca   :  { %v1219_v24 = vpop.xlane.xlu1 %1218  ;;  %v1617_v9 = vsub.f32 %v5385_v36, %v1297_v26  ;;  %v5684_v18 = vrot.slane %v5377_v35, %v1717_v46  ;;  %v1615_v36 = vsub.f32 %v5388_v55, %v5656_v3 }
 0x2cb   :  { %4403 = vrsqrt.f32 %v1554_v42  ;;  %v1551_v62 = vadd.f32 1e-05, %v1519_v58  ;;  %v1520_v0 = vsub.f32 %v1456_v50, %v1488_v12  ;;  %v5667_v56 = vmul.f32 0.02, %v1219_v24 }
 0x2cc   :  { %v1222_v29 = vpop.xlane.xlu0 %1221 }
 0x2cd   :  { %4405 = vrsqrt.f32 %v1551_v62  ;;  %v1552_v14 = vadd.f32 1e-05, %v1520_v0  ;;  %v5673_v8 = vmul.f32 0.02, %v1222_v29  ;;  %v1493_v63 = vmul.f32 %v5667_v56, %v5667_v56 }
 0x2ce   :  { %v1213_v10 = vpop.xlane.xlu1 %1212  ;;  %v1618_v62 = vsub.f32 %v5391_v44, %v5654_v5 }
 0x2cf   :  { %4407 = vrsqrt.f32 %v1552_v14  ;;  %v5677_v39 = vmul.f32 0.02, %v1213_v10  ;;  %v1494_v58 = vmul.f32 %v5673_v8, %v5673_v8 }
 0x2d0   :  { %v1216_v11 = vpop.xlane.xlu0 %1215 }
 0x2d1   :  { %v5681_v28 = vmul.f32 0.02, %v1216_v11  ;;  %v1491_v35 = vmul.f32 %v5677_v39, %v5677_v39 }
 0x2d2   :  { %v1379_v32 = vpop.xlane.xlu1 %1378 }
 0x2d3   :  { %v4402_v31 = vpop.eup %4401  ;;  %v1461_v15 = vmul.f32 0.02, %v1379_v32  ;;  %v1492_v46 = vmul.f32 %v5681_v28, %v5681_v28 }
 0x2d4   :  { %v1653_v53 = vmul.f32 %v4402_v31, %v5670_v48  ;;  %v1382_v12 = vpop.xlane.xlu0 %1381 }
 0x2d5   :  { %v4404_v42 = vpop.eup %4403  ;;  %v1525_v50 = vsub.f32 %v1461_v15, %v1493_v63  ;;  %v1462_v24 = vmul.f32 0.02, %v1382_v12 }
 0x2d6   :  { %v1654_v26 = vmul.f32 %v4404_v42, %v5670_v48  ;;  %v1373_v0 = vpop.xlane.xlu1 %1372  ;;  %v1685_v52 = vmul.f32 %v1653_v53, %v1617_v9  ;;  %v1616_v9 = vsub.f32 %v5396_v16, %v5658_v57 }
 0x2d7   :  { %v4406_v29 = vpop.eup %4405  ;;  %v1557_v14 = vadd.f32 1e-05, %v1525_v50  ;;  %v1526_v10 = vsub.f32 %v1462_v24, %v1494_v58  ;;  %v1459_v11 = vmul.f32 0.02, %v1373_v0 }
 0x2d8   :  { %v1376_v32 = vpop.xlane.xlu0 %1375  ;;  %v1651_v44 = vmul.f32 %v4406_v29, %v5670_v48  ;;  %v1686_v5 = vmul.f32 %v1654_v26, %v1618_v62  ;;  %v1721_v55 = vadd.f32 %v5684_v18, %v1685_v52 }
 0x2d9   :  { %v4408_v3 = vpop.eup %4407  ;;  %4409 = vrsqrt.f32 %v1557_v14  ;;  %v1558_v31 = vadd.f32 1e-05, %v1526_v10  ;;  %v1523_v63 = vsub.f32 %v1459_v11, %v1491_v35  ;;  %v1460_v15 = vmul.f32 0.02, %v1376_v32 }
 0x2da   :  { %v1231_v53 = vpop.xlane.xlu1 %1230  ;;  %v1652_v12 = vmul.f32 %v4408_v3, %v5670_v48  ;;  %v1683_v42 = vmul.f32 %v1651_v44, %v1615_v36  ;;  %v1722_v58 = vadd.f32 %v5684_v18, %v1686_v5  ;;  %v1753_v35 = vmax.f32 %v1721_v55, 0.0 }
 0x2db   :  { %4411 = vrsqrt.f32 %v1558_v31  ;;  %v1555_v50 = vadd.f32 1e-05, %v1523_v63  ;;  %v1524_v24 = vsub.f32 %v1460_v15, %v1492_v46  ;;  %v5705_v10 = vmul.f32 0.02, %v1231_v53 }
 0x2dc   :  { %v1234_v62 = vpop.xlane.xlu0 %1233  ;;  %v1684_v26 = vmul.f32 %v1652_v12, %v1616_v9  ;;  %v1719_v0 = vadd.f32 %v5684_v18, %v1683_v42  ;;  %v1754_v52 = vmax.f32 %v1722_v58, 0.0  ;;  %v1785_v5 = vmul.f32 %v1753_v35, %v1753_v35 }
 0x2dd   :  { %4413 = vrsqrt.f32 %v1555_v50  ;;  %v1556_v29 = vadd.f32 1e-05, %v1524_v24  ;;  %v5707_v46 = vmul.f32 0.02, %v1234_v62  ;;  %v1621_v3 = vsub.f32 %v5415_v33, %v5667_v56 }
 0x2de   :  { %v1225_v14 = vpop.xlane.xlu1 %1224  ;;  %v1720_v16 = vadd.f32 %v5684_v18, %v1684_v26  ;;  %v1751_v57 = vmax.f32 %v1719_v0, 0.0  ;;  %v1786_v36 = vmul.f32 %v1754_v52, %v1754_v52  ;;  %v1622_v55 = vsub.f32 %v5419_v19, %v5673_v8 }
 0x2df   :  { %4415 = vrsqrt.f32 %v1556_v29  ;;  %v5713_v31 = vmul.f32 0.02, %v1225_v14  ;;  %v1619_v53 = vsub.f32 %v5423_v2, %v5677_v39  ;;  %v1497_v12 = vmul.f32 %v5705_v10, %v5705_v10 }
 0x2e0   :  { %v1228_v11 = vpop.xlane.xlu0 %1227  ;;  %v1752_v32 = vmax.f32 %v1720_v16, 0.0  ;;  %v1783_v44 = vmul.f32 %v1751_v57, %v1751_v57  ;;  %v1818_v58 = vmul.f32 %v1786_v36, %v1754_v52  ;;  %v1498_v62 = vmul.f32 %v5707_v46, %v5707_v46 }
 0x2e1   :  { %v5720_v24 = vmul.f32 0.02, %v1228_v11  ;;  %v1817_v29 = vmul.f32 %v1785_v5, %v1753_v35  ;;  %v1495_v39 = vmul.f32 %v5713_v31, %v5713_v31 }
 0x2e2   :  { %v1391_v63 = vpop.xlane.xlu1 %1390  ;;  %v1784_v15 = vmul.f32 %v1752_v32, %v1752_v32  ;;  %v1815_v56 = vmul.f32 %v1783_v44, %v1751_v57 }
 0x2e3   :  { %v4410_v9 = vpop.eup %4409  ;;  %v1465_v42 = vmul.f32 0.02, %v1391_v63 }
 0x2e4   :  { %v1657_v50 = vmul.f32 %v4410_v9, %v5670_v48  ;;  %v1394_v33 = vpop.xlane.xlu0 %1393  ;;  %v1816_v19 = vmul.f32 %v1784_v15, %v1752_v32  ;;  %v1856_v32 = vpack.c.bf16 %v1818_v58, %v1817_v29  ;;  %v1496_v15 = vmul.f32 %v5720_v24, %v5720_v24 }
 0x2e5   :  { %v4412_v8 = vpop.eup %4411  ;;  %v1529_v26 = vsub.f32 %v1465_v42, %v1497_v12  ;;  %v1466_v0 = vmul.f32 0.02, %v1394_v33  ;;  %v1620_v58 = vsub.f32 %v5428_v1, %v5681_v28 }
 0x2e6   :  { %v1658_v2 = vmul.f32 %v4412_v8, %v5670_v48  ;;  %v1385_v52 = vpop.xlane.xlu1 %1384  ;;  %v1855_v14 = vpack.c.bf16 %v1816_v19, %v1815_v56  ;;  %v1689_v16 = vmul.f32 %v1657_v50, %v1621_v3 }
 0x2e7   :  { %v4414_v36 = vpop.eup %4413  ;;  %v1561_v11 = vadd.f32 1e-05, %v1529_v26  ;;  %v1530_v63 = vsub.f32 %v1466_v0, %v1498_v62  ;;  %v1463_v57 = vmul.f32 0.02, %v1385_v52 }
 0x2e8   :  { %v1655_v44 = vmul.f32 %v4414_v36, %v5670_v48  ;;  %4199 = vmatprep.mubr.msk.bf16.mxu1 %vm288_vm0, %v1855_v14  ;;  %v1388_v35 = vpop.xlane.xlu0 %1387  ;;  %v1690_v5 = vmul.f32 %v1658_v2, %v1622_v55  ;;  %v1725_v9 = vadd.f32 %v5684_v18, %v1689_v16 }
 0x2e9   :  { %v4416_v12 = vpop.eup %4415  ;;  %4417 = vrsqrt.f32 %v1561_v11  ;;  %v1562_v42 = vadd.f32 1e-05, %v1530_v63  ;;  %v1527_v3 = vsub.f32 %v1463_v57, %v1495_v39  ;;  %v1464_v50 = vmul.f32 0.02, %v1388_v35  ;;  %4200 = vmatmul.mubr.msk.bf16.vlgmr.msra.gmra.mrb[0].mxu1 %vm288_vm0, %v1856_v32 }
 0x2ea   :  { %v1656_v33 = vmul.f32 %v4416_v12, %v5670_v48  ;;  %v1243_v56 = vpop.xlane.xlu1 %1242  ;;  %v1687_v19 = vmul.f32 %v1655_v44, %v1619_v53  ;;  %v1726_v8 = vadd.f32 %v5684_v18, %v1690_v5  ;;  %v1757_v52 = vmax.f32 %v1725_v9, 0.0 }
 0x2eb   :  { %4419 = vrsqrt.f32 %v1562_v42  ;;  %v1559_v55 = vadd.f32 1e-05, %v1527_v3  ;;  %v1528_v62 = vsub.f32 %v1464_v50, %v1496_v15  ;;  %v5739_v16 = vmul.f32 0.02, %v1243_v56 }
 0x2ec   :  { %v1246_v26 = vpop.xlane.xlu0 %1245  ;;  %v1688_v0 = vmul.f32 %v1656_v33, %v1620_v58  ;;  %v1723_v29 = vadd.f32 %v5684_v18, %v1687_v19  ;;  %v1758_v2 = vmax.f32 %v1726_v8, 0.0  ;;  %v1789_v32 = vmul.f32 %v1757_v52, %v1757_v52 }
 0x2ed   :  { %4421 = vrsqrt.f32 %v1559_v55  ;;  %v1560_v39 = vadd.f32 1e-05, %v1528_v62  ;;  %v5741_v57 = vmul.f32 0.02, %v1246_v26  ;;  %v1625_v44 = vsub.f32 %v5447_v41, %v5705_v10 }
 0x2ee   :  { %v1237_v14 = vpop.xlane.xlu1 %1236  ;;  %v1724_v1 = vadd.f32 %v5684_v18, %v1688_v0  ;;  %v1755_v28 = vmax.f32 %v1723_v29, 0.0  ;;  %v1790_v53 = vmul.f32 %v1758_v2, %v1758_v2  ;;  %v1626_v15 = vsub.f32 %v5451_v54, %v5707_v46 }
 0x2ef   :  { %4423 = vrsqrt.f32 %v1560_v39  ;;  %v5747_v35 = vmul.f32 0.02, %v1237_v14  ;;  %v1623_v42 = vsub.f32 %v5455_v30, %v5713_v31  ;;  %v1501_v3 = vmul.f32 %v5739_v16, %v5739_v16 }
 0x2f0   :  { %v1240_v36 = vpop.xlane.xlu0 %1239  ;;  %v1756_v11 = vmax.f32 %v1724_v1, 0.0  ;;  %v1787_v63 = vmul.f32 %v1755_v28, %v1755_v28  ;;  %v1822_v58 = vmul.f32 %v1790_v53, %v1758_v2  ;;  %v1502_v19 = vmul.f32 %v5741_v57, %v5741_v57 }
 0x2f1   :  { %v5754_v56 = vmul.f32 0.02, %v1240_v36  ;;  %v1821_v62 = vmul.f32 %v1789_v32, %v1757_v52  ;;  %v1499_v31 = vmul.f32 %v5747_v35, %v5747_v35 }
 0x2f2   :  { %v1403_v5 = vpop.xlane.xlu1 %1402  ;;  %v1788_v9 = vmul.f32 %v1756_v11, %v1756_v11  ;;  %v1819_v10 = vmul.f32 %v1787_v63, %v1755_v28 }
 0x2f3   :  { %v4418_v12 = vpop.eup %4417  ;;  %v1469_v50 = vmul.f32 0.02, %v1403_v5  ;;  %v1858_v28 = vpack.c.bf16 %v1822_v58, %v1821_v62  ;;  %v1500_v36 = vmul.f32 %v5754_v56, %v5754_v56 }
 0x2f4   :  { %v1661_v33 = vmul.f32 %v4418_v12, %v5670_v48  ;;  %v1406_v41 = vpop.xlane.xlu0 %1405  ;;  %v1820_v54 = vmul.f32 %v1788_v9, %v1756_v11  ;;  %v1624_v12 = vsub.f32 %v5460_v38, %v5720_v24 }
 0x2f5   :  { %v4420_v46 = vpop.eup %4419  ;;  %v1533_v8 = vsub.f32 %v1469_v50, %v1501_v3  ;;  %v1470_v55 = vmul.f32 0.02, %v1406_v41 }
 0x2f6   :  { %v1662_v30 = vmul.f32 %v4420_v46, %v5670_v48  ;;  %v1397_v26 = vpop.xlane.xlu1 %1396  ;;  %v1857_v0 = vpack.c.bf16 %v1820_v54, %v1819_v10  ;;  %v1693_v29 = vmul.f32 %v1661_v33, %v1625_v44 }
 0x2f7   :  { %v4422_v2 = vpop.eup %4421  ;;  %v1565_v39 = vadd.f32 1e-05, %v1533_v8  ;;  %v1534_v14 = vsub.f32 %v1470_v55, %v1502_v19  ;;  %v1467_v1 = vmul.f32 0.02, %v1397_v26 }
 0x2f8   :  { %v1659_v53 = vmul.f32 %v4422_v2, %v5670_v48  ;;  %4203 = vmatprep.mubr.msk.bf16.mxu1 %vm288_vm0, %v1857_v0  ;;  %v1400_v52 = vpop.xlane.xlu0 %1399  ;;  %v1694_v11 = vmul.f32 %v1662_v30, %v1626_v15  ;;  %v1729_v63 = vadd.f32 %v5684_v18, %v1693_v29 }
 0x2f9   :  { %v4424_v32 = vpop.eup %4423  ;;  %4425 = vrsqrt.f32 %v1565_v39  ;;  %v1566_v5 = vadd.f32 1e-05, %v1534_v14  ;;  %v1531_v44 = vsub.f32 %v1467_v1, %v1499_v31  ;;  %v1468_v9 = vmul.f32 0.02, %v1400_v52  ;;  %4204 = vmatmul.mubr.msk.bf16.gmra.mrb[4].mxu1 %vm288_vm0, %v1858_v28 }
 0x2fa   :  { %v1660_v3 = vmul.f32 %v4424_v32, %v5670_v48  ;;  %v1255_v50 = vpop.xlane.xlu1 %1254  ;;  %v1691_v58 = vmul.f32 %v1659_v53, %v1623_v42  ;;  %v1730_v33 = vadd.f32 %v5684_v18, %v1694_v11  ;;  %v1761_v55 = vmax.f32 %v1729_v63, 0.0 }
 0x2fb   :  { %4427 = vrsqrt.f32 %v1566_v5  ;;  %v1563_v15 = vadd.f32 1e-05, %v1531_v44  ;;  %v1532_v41 = vsub.f32 %v1468_v9, %v1500_v36  ;;  %v5773_v30 = vmul.f32 0.02, %v1255_v50 }
 0x2fc   :  { %v1258_v10 = vpop.xlane.xlu0 %1257  ;;  %v1692_v54 = vmul.f32 %v1660_v3, %v1624_v12  ;;  %v1727_v46 = vadd.f32 %v5684_v18, %v1691_v58  ;;  %v1762_v19 = vmax.f32 %v1730_v33, 0.0  ;;  %v1793_v2 = vmul.f32 %v1761_v55, %v1761_v55 }
 0x2fd   :  { %4429 = vrsqrt.f32 %v1563_v15  ;;  %v1564_v8 = vadd.f32 1e-05, %v1532_v41  ;;  %v5775_v29 = vmul.f32 0.02, %v1258_v10  ;;  %v1629_v39 = vsub.f32 %v5479_v51, %v5739_v16 }
 0x2fe   :  { %v1249_v62 = vpop.xlane.xlu1 %1248  ;;  %v1728_v38 = vadd.f32 %v5684_v18, %v1692_v54  ;;  %v1759_v24 = vmax.f32 %v1727_v46, 0.0  ;;  %v1794_v42 = vmul.f32 %v1762_v19, %v1762_v19  ;;  %v1630_v14 = vsub.f32 %v5483_v20, %v5741_v57 }
 0x2ff   :  { %4431 = vrsqrt.f32 %v1564_v8  ;;  %v5781_v1 = vmul.f32 0.02, %v1249_v62  ;;  %v1627_v52 = vsub.f32 %v5487_v40, %v5747_v35  ;;  %v1505_v11 = vmul.f32 %v5773_v30, %v5773_v30 }
 0x300   :  { %v1252_v31 = vpop.xlane.xlu0 %1251  ;;  %v1760_v26 = vmax.f32 %v1728_v38, 0.0  ;;  %v1791_v0 = vmul.f32 %v1759_v24, %v1759_v24  ;;  %v1826_v32 = vmul.f32 %v1794_v42, %v1762_v19  ;;  %v1506_v9 = vmul.f32 %v5775_v29, %v5775_v29 }
 0x301   :  { %v5788_v44 = vmul.f32 0.02, %v1252_v31  ;;  %v1825_v50 = vmul.f32 %v1793_v2, %v1761_v55  ;;  %v1503_v35 = vmul.f32 %v5781_v1, %v5781_v1  ;;  %v1628_v2 = vsub.f32 %v5492_v22, %v5754_v56 }
 0x302   :  { %v1415_v28 = vpop.xlane.xlu1 %1414  ;;  %v1792_v53 = vmul.f32 %v1760_v26, %v1760_v26  ;;  %v1823_v16 = vmul.f32 %v1791_v0, %v1759_v24 }
 0x303   :  { %v4426_v36 = vpop.eup %4425  ;;  %v1473_v63 = vmul.f32 0.02, %v1415_v28  ;;  %v1860_v19 = vpack.c.bf16 %v1826_v32, %v1825_v50  ;;  %v1504_v62 = vmul.f32 %v5788_v44, %v5788_v44 }
 0x304   :  { %v1665_v5 = vmul.f32 %v4426_v36, %v5670_v48  ;;  %v1418_v51 = vpop.xlane.xlu0 %1417  ;;  %v1824_v20 = vmul.f32 %v1792_v53, %v1760_v26 }
 0x305   :  { %v4428_v57 = vpop.eup %4427  ;;  %v1537_v12 = vsub.f32 %v1473_v63, %v1505_v11  ;;  %v1474_v3 = vmul.f32 0.02, %v1418_v51 }
 0x306   :  { %v1666_v40 = vmul.f32 %v4428_v57, %v5670_v48  ;;  %v1409_v58 = vpop.xlane.xlu1 %1408  ;;  %v1859_v33 = vpack.c.bf16 %v1824_v20, %v1823_v16  ;;  %v1697_v15 = vmul.f32 %v1665_v5, %v1629_v39 }
 0x307   :  { %v4430_v41 = vpop.eup %4429  ;;  %v1569_v10 = vadd.f32 1e-05, %v1537_v12  ;;  %v1538_v54 = vsub.f32 %v1474_v3, %v1506_v9  ;;  %v1471_v46 = vmul.f32 0.02, %v1409_v58  ;;  %v1633_v58 = vsub.f32 %v5520_v25, %v5773_v30 }
 0x308   :  { %v1663_v8 = vmul.f32 %v4430_v41, %v5670_v48  ;;  %4207 = vmatprep.mubr.msk.bf16.mxu1 %vm288_vm0, %v1859_v33  ;;  %v1412_v55 = vpop.xlane.xlu0 %1411  ;;  %v1698_v38 = vmul.f32 %v1666_v40, %v1630_v14  ;;  %v1733_v24 = vadd.f32 %v5684_v18, %v1697_v15  ;;  %v1634_v33 = vsub.f32 %v5524_v7, %v5775_v29 }
 0x309   :  { %v4432_v42 = vpop.eup %4431  ;;  %4433 = vrsqrt.f32 %v1569_v10  ;;  %v1570_v31 = vadd.f32 1e-05, %v1538_v54  ;;  %v1535_v26 = vsub.f32 %v1471_v46, %v1503_v35  ;;  %v1472_v0 = vmul.f32 0.02, %v1412_v55  ;;  %4208 = vmatmul.mubr.msk.bf16.gmra.mrb[8].mxu1 %vm288_vm0, %v1860_v19 }
 0x30a   :  { %v1664_v39 = vmul.f32 %v4432_v42, %v5670_v48  ;;  %v1267_v28 = vpop.xlane.xlu1 %1266  ;;  %v1695_v53 = vmul.f32 %v1663_v8, %v1627_v52  ;;  %v1734_v36 = vadd.f32 %v5684_v18, %v1698_v38  ;;  %v1765_v20 = vmax.f32 %v1733_v24, 0.0 }
 0x30b   :  { %4435 = vrsqrt.f32 %v1570_v31  ;;  %v1567_v14 = vadd.f32 1e-05, %v1535_v26  ;;  %v1536_v11 = vsub.f32 %v1472_v0, %v1504_v62  ;;  %v5807_v9 = vmul.f32 0.02, %v1267_v28 }
 0x30c   :  { %v1270_v63 = vpop.xlane.xlu0 %1269  ;;  %v1696_v32 = vmul.f32 %v1664_v39, %v1628_v2  ;;  %v1731_v5 = vadd.f32 %v5684_v18, %v1695_v53  ;;  %v1766_v51 = vmax.f32 %v1734_v36, 0.0  ;;  %v1797_v35 = vmul.f32 %v1765_v20, %v1765_v20 }
 0x30d   :  { %4437 = vrsqrt.f32 %v1567_v14  ;;  %v1568_v16 = vadd.f32 1e-05, %v1536_v11  ;;  %v5809_v40 = vmul.f32 0.02, %v1270_v63  ;;  %v1631_v46 = vsub.f32 %v5531_v23, %v5781_v1 }
 0x30e   :  { %v1261_v57 = vpop.xlane.xlu1 %1260  ;;  %v1732_v22 = vadd.f32 %v5684_v18, %v1696_v32  ;;  %v1763_v56 = vmax.f32 %v1731_v5, 0.0  ;;  %v1798_v52 = vmul.f32 %v1766_v51, %v1766_v51  ;;  %v1509_v19 = vmul.f32 %v5807_v9, %v5807_v9 }
 0x30f   :  { %4439 = vrsqrt.f32 %v1568_v16  ;;  %v5815_v15 = vmul.f32 0.02, %v1261_v57  ;;  %v1510_v24 = vmul.f32 %v5809_v40, %v5809_v40  ;;  %v1829_v26 = vmul.f32 %v1797_v35, %v1765_v20 }
 0x310   :  { %v1264_v12 = vpop.xlane.xlu0 %1263  ;;  %v1764_v3 = vmax.f32 %v1732_v22, 0.0  ;;  %v1795_v50 = vmul.f32 %v1763_v56, %v1763_v56  ;;  %v1830_v62 = vmul.f32 %v1798_v52, %v1766_v51  ;;  %v1632_v52 = vsub.f32 %v5538_v13, %v5788_v44 }
 0x311   :  { %v5822_v38 = vmul.f32 0.02, %v1264_v12  ;;  %v1507_v1 = vmul.f32 %v5815_v15, %v5815_v15 }
 0x312   :  { %v1427_v41 = vpop.xlane.xlu1 %1426  ;;  %v1796_v10 = vmul.f32 %v1764_v3, %v1764_v3  ;;  %v1827_v30 = vmul.f32 %v1795_v50, %v1763_v56  ;;  %v1862_v11 = vpack.c.bf16 %v1830_v62, %v1829_v26  ;;  %v1638_v26 = vsub.f32 %v5561_v43, %v5809_v40 }
 0x313   :  { %v4434_v54 = vpop.eup %4433  ;;  %v1477_v8 = vmul.f32 0.02, %v1427_v41  ;;  %v1508_v32 = vmul.f32 %v5822_v38, %v5822_v38 }
 0x314   :  { %v1669_v55 = vmul.f32 %v4434_v54, %v5670_v48  ;;  %v1430_v25 = vpop.xlane.xlu0 %1429  ;;  %v1828_v7 = vmul.f32 %v1796_v10, %v1764_v3 }
 0x315   :  { %v4436_v29 = vpop.eup %4435  ;;  %v1541_v42 = vsub.f32 %v1477_v8, %v1509_v19  ;;  %v1478_v31 = vmul.f32 0.02, %v1430_v25 }
 0x316   :  { %v1670_v23 = vmul.f32 %v4436_v29, %v5670_v48  ;;  %v1421_v0 = vpop.xlane.xlu1 %1420  ;;  %v1861_v2 = vpack.c.bf16 %v1828_v7, %v1827_v30  ;;  %v1701_v39 = vmul.f32 %v1669_v55, %v1633_v58 }
 0x317   :  { %v4438_v28 = vpop.eup %4437  ;;  %v1573_v53 = vadd.f32 1e-05, %v1541_v42  ;;  %v1542_v36 = vsub.f32 %v1478_v31, %v1510_v24  ;;  %v1475_v14 = vmul.f32 0.02, %v1421_v0  ;;  %v1637_v31 = vsub.f32 %v5557_v37, %v5807_v9 }
 0x318   :  { %v1667_v63 = vmul.f32 %v4438_v28, %v5670_v48  ;;  %4211 = vmatprep.mubr.msk.bf16.mxu1 %vm288_vm0, %v1861_v2  ;;  %v1424_v5 = vpop.xlane.xlu0 %1423  ;;  %v1702_v51 = vmul.f32 %v1670_v23, %v1634_v33  ;;  %v1737_v16 = vadd.f32 %v5684_v18, %v1701_v39  ;;  %v1635_v39 = vsub.f32 %v5565_v27, %v5815_v15 }
 0x319   :  { %v4440_v20 = vpop.eup %4439  ;;  %4441 = vrsqrt.f32 %v1573_v53  ;;  %v1574_v57 = vadd.f32 1e-05, %v1542_v36  ;;  %v1539_v22 = vsub.f32 %v1475_v14, %v1507_v1  ;;  %v1476_v56 = vmul.f32 0.02, %v1424_v5  ;;  %4212 = vmatmul.mubr.msk.bf16.gmra.mrb[12].mxu1 %vm288_vm0, %v1862_v11 }
 0x31a   :  { %v1668_v12 = vmul.f32 %v4440_v20, %v5670_v48  ;;  %v1279_v3 = vpop.xlane.xlu1 %1278  ;;  %v1699_v50 = vmul.f32 %v1667_v63, %v1631_v46  ;;  %v1738_v35 = vadd.f32 %v5684_v18, %v1702_v51  ;;  %v1769_v62 = vmax.f32 %v1737_v16, 0.0 }
 0x31b   :  { %4443 = vrsqrt.f32 %v1574_v57  ;;  %v1571_v58 = vadd.f32 1e-05, %v1539_v22  ;;  %v1540_v33 = vsub.f32 %v1476_v56, %v1508_v32  ;;  %v5841_v25 = vmul.f32 0.02, %v1279_v3 }
 0x31c   :  { %v1282_v41 = vpop.xlane.xlu0 %1281  ;;  %v1700_v10 = vmul.f32 %v1668_v12, %v1632_v52  ;;  %v1735_v54 = vadd.f32 %v5684_v18, %v1699_v50  ;;  %v1770_v19 = vmax.f32 %v1738_v35, 0.0  ;;  %v1801_v42 = vmul.f32 %v1769_v62, %v1769_v62 }
 0x31d   :  { %4445 = vrsqrt.f32 %v1571_v58  ;;  %v1572_v8 = vadd.f32 1e-05, %v1540_v33  ;;  %v5843_v24 = vmul.f32 0.02, %v1282_v41  ;;  %v1513_v28 = vmul.f32 %v5841_v25, %v5841_v25 }
 0x31e   :  { %v1273_v55 = vpop.xlane.xlu1 %1272  ;;  %v1736_v13 = vadd.f32 %v5684_v18, %v1700_v10  ;;  %v1767_v44 = vmax.f32 %v1735_v54, 0.0  ;;  %v1802_v46 = vmul.f32 %v1770_v19, %v1770_v19  ;;  %v1833_v51 = vmul.f32 %v1801_v42, %v1769_v62 }
 0x31f   :  { %4447 = vrsqrt.f32 %v1572_v8  ;;  %v5849_v23 = vmul.f32 0.02, %v1273_v55  ;;  %v1514_v63 = vmul.f32 %v5843_v24, %v5843_v24  ;;  %v1636_v62 = vsub.f32 %v5570_v17, %v5822_v38 }
 0x320   :  { %v1276_v30 = vpop.xlane.xlu0 %1275  ;;  %v1768_v7 = vmax.f32 %v1736_v13, 0.0  ;;  %v1799_v29 = vmul.f32 %v1767_v44, %v1767_v44  ;;  %v1834_v36 = vmul.f32 %v1802_v46, %v1770_v19 }
 0x321   :  { %v5856_v11 = vmul.f32 0.02, %v1276_v30  ;;  %v1511_v15 = vmul.f32 %v5849_v23, %v5849_v23 }
 0x322   :  { %v1439_v1 = vpop.xlane.xlu1 %1438  ;;  %v1800_v0 = vmul.f32 %v1768_v7, %v1768_v7  ;;  %v1831_v9 = vmul.f32 %v1799_v29, %v1767_v44  ;;  %v1864_v3 = vpack.c.bf16 %v1834_v36, %v1833_v51 }
 0x323   :  { %v4442_v2 = vpop.eup %4441  ;;  %v1481_v53 = vmul.f32 0.02, %v1439_v1  ;;  %v1512_v35 = vmul.f32 %v5856_v11, %v5856_v11 }
 0x324   :  { %v1673_v14 = vmul.f32 %v4442_v2, %v5670_v48  ;;  %v1442_v37 = vpop.xlane.xlu0 %1441  ;;  %v1832_v43 = vmul.f32 %v1800_v0, %v1768_v7 }
 0x325   :  { %v4444_v40 = vpop.eup %4443  ;;  %v1545_v32 = vsub.f32 %v1481_v53, %v1513_v28  ;;  %v1482_v5 = vmul.f32 0.02, %v1442_v37 }
 0x326   :  { %v1674_v27 = vmul.f32 %v4444_v40, %v5670_v48  ;;  %v1433_v16 = vpop.xlane.xlu1 %1432  ;;  %v1863_v20 = vpack.c.bf16 %v1832_v43, %v1831_v9  ;;  %v1705_v57 = vmul.f32 %v1673_v14, %v1637_v31  ;;  %v1641_v43 = vsub.f32 %v5589_v60, %v5841_v25 }
 0x327   :  { %v4446_v22 = vpop.eup %4445  ;;  %v1577_v56 = vadd.f32 1e-05, %v1545_v32  ;;  %v1546_v52 = vsub.f32 %v1482_v5, %v1514_v63  ;;  %v1479_v12 = vmul.f32 0.02, %v1433_v16  ;;  %v1642_v40 = vsub.f32 %v5593_v4, %v5843_v24 }
 0x328   :  { %v1671_v50 = vmul.f32 %v4446_v22, %v5670_v48  ;;  %4215 = vmatprep.mubr.msk.bf16.mxu1 %vm288_vm0, %v1863_v20  ;;  %v1436_v58 = vpop.xlane.xlu0 %1435  ;;  %v1706_v33 = vmul.f32 %v1674_v27, %v1638_v26  ;;  %v1741_v41 = vadd.f32 %v5684_v18, %v1705_v57  ;;  %v1639_v27 = vsub.f32 %v5597_v49, %v5849_v23 }
 0x329   :  { %v4448_v10 = vpop.eup %4447  ;;  %4449 = vrsqrt.f32 %v1577_v56  ;;  %v1578_v54 = vadd.f32 1e-05, %v1546_v52  ;;  %v1543_v19 = vsub.f32 %v1479_v12, %v1511_v15  ;;  %v1480_v8 = vmul.f32 0.02, %v1436_v58  ;;  %4216 = vmatmul.mubr.msk.bf16.gmra.mrb[16].mxu1 %vm288_vm0, %v1864_v3 }
 0x32a   :  { %v1672_v55 = vmul.f32 %v4448_v10, %v5670_v48  ;;  %v1291_v13 = vpop.xlane.xlu1 %1290  ;;  %v1703_v44 = vmul.f32 %v1671_v50, %v1635_v39  ;;  %v1742_v46 = vadd.f32 %v5684_v18, %v1706_v33  ;;  %v1773_v0 = vmax.f32 %v1741_v41, 0.0 }
 0x32b   :  { %4451 = vrsqrt.f32 %v1578_v54  ;;  %v1575_v30 = vadd.f32 1e-05, %v1543_v19  ;;  %v1544_v7 = vsub.f32 %v1480_v8, %v1512_v35  ;;  %v5883_v63 = vmul.f32 0.02, %v1291_v13 }
 0x32c   :  { %v1294_v29 = vpop.xlane.xlu0 %1293  ;;  %v1704_v42 = vmul.f32 %v1672_v55, %v1636_v62  ;;  %v1739_v31 = vadd.f32 %v5684_v18, %v1703_v44  ;;  %v1774_v26 = vmax.f32 %v1742_v46, 0.0  ;;  %v1805_v9 = vmul.f32 %v1773_v0, %v1773_v0 }
 0x32d   :  { %4453 = vrsqrt.f32 %v1575_v30  ;;  %v1576_v1 = vadd.f32 1e-05, %v1544_v7  ;;  %v5890_v22 = vmul.f32 0.02, %v1294_v29  ;;  %v1517_v23 = vmul.f32 %v5883_v63, %v5883_v63 }
 0x32e   :  { %v1285_v2 = vpop.xlane.xlu1 %1284  ;;  %v1740_v17 = vadd.f32 %v5684_v18, %v1704_v42  ;;  %v1771_v38 = vmax.f32 %v1739_v31, 0.0  ;;  %v1806_v39 = vmul.f32 %v1774_v26, %v1774_v26  ;;  %v1837_v3 = vmul.f32 %v1805_v9, %v1773_v0 }
 0x32f   :  { %4455 = vrsqrt.f32 %v1576_v1  ;;  %v5875_v28 = vmul.f32 0.02, %v1285_v2  ;;  %v1518_v62 = vmul.f32 %v5890_v22, %v5890_v22  ;;  %v1640_v42 = vsub.f32 %v5602_v47, %v5856_v11 }
 0x330   :  { %v1288_v53 = vpop.xlane.xlu0 %1287  ;;  %v1772_v36 = vmax.f32 %v1740_v17, 0.0  ;;  %v1803_v14 = vmul.f32 %v1771_v38, %v1771_v38  ;;  %v1838_v20 = vmul.f32 %v1806_v39, %v1774_v26 }
 0x331   :  { %v5877_v37 = vmul.f32 0.02, %v1288_v53  ;;  %v1515_v15 = vmul.f32 %v5875_v28, %v5875_v28 }
 0x332   :  { %v1445_v32 = vpop.xlane.xlu1 %1444  ;;  %v1804_v5 = vmul.f32 %v1772_v36, %v1772_v36  ;;  %v1835_v25 = vmul.f32 %v1803_v14, %v1771_v38  ;;  %v1866_v19 = vpack.c.bf16 %v1838_v20, %v1837_v3  ;;  %v1645_v3 = vsub.f32 %v5621_v59, %v5883_v63 }
 0x333   :  { %v4450_v51 = vpop.eup %4449  ;;  %v1483_v16 = vmul.f32 0.02, %v1445_v32  ;;  %v1516_v56 = vmul.f32 %v5877_v37, %v5877_v37 }
 0x334   :  { %v1677_v57 = vmul.f32 %v4450_v51, %v5670_v48  ;;  %v1448_v60 = vpop.xlane.xlu0 %1447  ;;  %v1836_v4 = vmul.f32 %v1804_v5, %v1772_v36 }
 0x335   :  { %v4452_v24 = vpop.eup %4451  ;;  %v1547_v52 = vsub.f32 %v1483_v16, %v1515_v15  ;;  %v1484_v12 = vmul.f32 0.02, %v1448_v60 }
 0x336   :  { %v1678_v49 = vmul.f32 %v4452_v24, %v5670_v48  ;;  %v1451_v50 = vpop.xlane.xlu1 %1450  ;;  %v1865_v35 = vpack.c.bf16 %v1836_v4, %v1835_v25  ;;  %v1709_v58 = vmul.f32 %v1677_v57, %v1641_v43  ;;  %v1644_v25 = vsub.f32 %v5634_v34, %v5877_v37 }
 0x337   :  { %v4454_v33 = vpop.eup %4453  ;;  %v1579_v41 = vadd.f32 1e-05, %v1547_v52  ;;  %v1548_v10 = vsub.f32 %v1484_v12, %v1516_v56  ;;  %v1485_v54 = vmul.f32 0.02, %v1451_v50  ;;  %v1646_v34 = vsub.f32 %v5625_v61, %v5890_v22 }
 0x338   :  { %v1675_v8 = vmul.f32 %v4454_v33, %v5670_v48  ;;  %4219 = vmatprep.mubr.msk.bf16.mxu1 %vm288_vm0, %v1865_v35  ;;  %v1454_v55 = vpop.xlane.xlu0 %1453  ;;  %v1710_v13 = vmul.f32 %v1678_v49, %v1642_v40  ;;  %v1745_v44 = vadd.f32 %v5684_v18, %v1709_v58 }
 0x339   :  { %v4456_v46 = vpop.eup %4455  ;;  %4457 = vrsqrt.f32 %v1579_v41  ;;  %v1580_v30 = vadd.f32 1e-05, %v1548_v10  ;;  %v1549_v7 = vsub.f32 %v1485_v54, %v1517_v23  ;;  %v1486_v29 = vmul.f32 0.02, %v1454_v55  ;;  %4220 = vmatmul.mubr.msk.bf16.gmra.mrb[20].mxu1 %vm288_vm0, %v1866_v19 }
 0x33a   :  { %v1676_v31 = vmul.f32 %v4456_v46, %v5670_v48  ;;  %v1707_v26 = vmul.f32 %v1675_v8, %v1639_v27  ;;  %v1746_v1 = vadd.f32 %v5684_v18, %v1710_v13  ;;  %v1777_v36 = vmax.f32 %v1745_v44, 0.0 }
 0x33b   :  { %4459 = vrsqrt.f32 %v1580_v30  ;;  %v1581_v0 = vadd.f32 1e-05, %v1549_v7  ;;  %v1550_v2 = vsub.f32 %v1486_v29, %v1518_v62  ;;  %v1643_v27 = vsub.f32 %v5629_v21, %v5875_v28  ;;  %v4329_v29 = vld [vmem:[%s7081_s2 + $0x38] sm:$0xff]  }
 0x33c   :  { %v1708_v17 = vmul.f32 %v1676_v31, %v1640_v42  ;;  %v1743_v38 = vadd.f32 %v5684_v18, %v1707_v26  ;;  %v1778_v39 = vmax.f32 %v1746_v1, 0.0  ;;  %v1809_v40 = vmul.f32 %v1777_v36, %v1777_v36  ;;  %4231 = vmatprep.subr.bf16.mxu0 %v4329_v29 }
 0x33d   :  { %4461 = vrsqrt.f32 %v1581_v0  ;;  %v1582_v53 = vadd.f32 1e-05, %v1550_v2  ;;  %v1873_v30 = vsub.s32 7, %v7113_v6  ;;  %4232 = vmatpush3.bf16.msra.mxu0 %v4329_v29  ;;  %v4330_v0 = vld [vmem:[%s7081_s2 + $0x40] sm:$0xff]  }
 0x33e   :  { %v1744_v14 = vadd.f32 %v5684_v18, %v1708_v17  ;;  %v1775_v9 = vmax.f32 %v1743_v38, 0.0  ;;  %v1810_v47 = vmul.f32 %v1778_v39, %v1778_v39  ;;  %v1841_v60 = vmul.f32 %v1809_v40, %v1777_v36  ;;  %4233 = vmatprep.subr.bf16.mxu0 %v4330_v0 }
 0x33f   :  { %4463 = vrsqrt.f32 %v1582_v53 }
 0x340   :  { %v1776_v11 = vmax.f32 %v1744_v14, 0.0  ;;  %v1807_v43 = vmul.f32 %v1775_v9, %v1775_v9  ;;  %v1842_v51 = vmul.f32 %v1810_v47, %v1778_v39 }
 0x341   :  { %4234 = vmatpush3.bf16.msra.mxu0 %v4330_v0 }
 0x342   :  { %v1808_v32 = vmul.f32 %v1776_v11, %v1776_v11  ;;  %v1839_v16 = vmul.f32 %v1807_v43, %v1775_v9  ;;  %v1868_v12 = vpack.c.bf16 %v1842_v51, %v1841_v60 }
 0x343   :  { %v4458_v5 = vpop.eup %4457 }
 0x344   :  { %v1679_v15 = vmul.f32 %v4458_v5, %v5670_v48  ;;  %v1840_v20 = vmul.f32 %v1808_v32, %v1776_v11 }
 0x345   :  { %v4460_v57 = vpop.eup %4459 }
 0x346   :  { %v1680_v4 = vmul.f32 %v4460_v57, %v5670_v48  ;;  %v1867_v24 = vpack.c.bf16 %v1840_v20, %v1839_v16  ;;  %v1711_v56 = vmul.f32 %v1679_v15, %v1643_v27 }
 0x347   :  { %v4462_v52 = vpop.eup %4461 }
 0x348   :  { %v1681_v21 = vmul.f32 %v4462_v52, %v5670_v48  ;;  %4223 = vmatprep.mubr.msk.bf16.mxu1 %vm288_vm0, %v1867_v24  ;;  %v1712_v28 = vmul.f32 %v1680_v4, %v1644_v25  ;;  %v1747_v49 = vadd.f32 %v5684_v18, %v1711_v56 }
 0x349   :  { %v4464_v23 = vpop.eup %4463  ;;  %4224 = vmatmul.mubr.msk.bf16.gmra.mrb[24].mxu1 %vm288_vm0, %v1868_v12 }
 0x34a   :  { %v1682_v37 = vmul.f32 %v4464_v23, %v5670_v48  ;;  %v1748_v50 = vadd.f32 %v5684_v18, %v1712_v28  ;;  %v1779_v35 = vmax.f32 %v1747_v49, 0.0  ;;  %v1713_v58 = vmul.f32 %v1681_v21, %v1645_v3 }
 0x34c   :  { %v1780_v59 = vmax.f32 %v1748_v50, 0.0  ;;  %v1811_v63 = vmul.f32 %v1779_v35, %v1779_v35  ;;  %v1714_v33 = vmul.f32 %v1682_v37, %v1646_v34  ;;  %v1749_v41 = vadd.f32 %v5684_v18, %v1713_v58 }
 0x34e   :  { %v1812_v10 = vmul.f32 %v1780_v59, %v1780_v59  ;;  %v1750_v54 = vadd.f32 %v5684_v18, %v1714_v33  ;;  %v1781_v19 = vmax.f32 %v1749_v41, 0.0  ;;  %v1843_v8 = vmul.f32 %v1811_v63, %v1779_v35  ;;  %v4594_v18 = vld [vmem:[%s7080_s1] sm:$0xff] }
 0x34f   :  { %v5933_v7 = vrot.slane %v4594_v18, %v1873_v30 }
 0x350   :  { %v1844_v62 = vmul.f32 %v1812_v10, %v1780_v59  ;;  %v1782_v61 = vmax.f32 %v1750_v54, 0.0  ;;  %v1813_v22 = vmul.f32 %v1781_v19, %v1781_v19 }
 0x352   :  { %v1869_v55 = vpack.c.bf16 %v1844_v62, %v1843_v8  ;;  %v1814_v13 = vmul.f32 %v1782_v61, %v1782_v61  ;;  %v1845_v48 = vmul.f32 %v1813_v22, %v1781_v19 }
 0x354   :  { %4227 = vmatprep.mubr.msk.bf16.mxu1 %vm288_vm0, %v1869_v55  ;;  %v1846_v44 = vmul.f32 %v1814_v13, %v1782_v61 }
 0x356   :  { %v1870_v46 = vpack.c.bf16 %v1846_v44, %v1845_v48 }
 0x358   :  { %4228 = vmatmul.mubr.msk.bf16.gmra.mrb[28].mxu1 %vm288_vm0, %v1870_v46 }
 0x3bc   :  { %v4201_v42 = vpop.f32.mrb[0].mxu1 }
 0x3bd   :  { %v5939_v31 = vadd.f32 %v4201_v42, %v5933_v7  ;;  %v1981_v26 = vpop.f32.mrb[1].mxu1 }
 0x3be   :  { %v4202_v1 = vpop.f32.mrb[2].mxu1  ;;  %v5945_v2 = vadd.f32 %v1981_v26, %v5933_v7 }
 0x3bf   :  { %v5948_v17 = vadd.f32 %v4202_v1, %v5933_v7  ;;  %v1984_v38 = vpop.f32.mrb[3].mxu1  ;;  %v2114_v39 = vsel %vm288_vm0, %v5939_v31, 0.0  ;;  %v2238_v9 = vmul.f32 %v5939_v31, %v5939_v31 }
 0x3c0   :  { %2115 = vadd.xlane.f32.xlu1 %v2114_v39  ;;  %v5953_v53 = vadd.f32 %v1984_v38, %v5933_v7  ;;  %v2108_v14 = vsel %vm288_vm0, %v5945_v2, 0.0  ;;  %v2236_v40 = vmul.f32 %v5945_v2, %v5945_v2 }
 0x3c1   :  { %v2117_v36 = vsel %vm288_vm0, %v5948_v17, 0.0  ;;  %v2239_v11 = vmul.f32 %v5948_v17, %v5948_v17  ;;  %v2274_v43 = vsel %vm288_vm0, %v2238_v9, 0.0  ;;  %v4331_v9 = vld [vmem:[%s7081_s2 + $0x48] sm:$0xff]  }
 0x3c2   :  { %2118 = vadd.xlane.f32.xlu0 %v2117_v36  ;;  %v2111_v47 = vsel %vm288_vm0, %v5953_v53, 0.0  ;;  %v2237_v5 = vmul.f32 %v5953_v53, %v5953_v53  ;;  %v2268_v51 = vsel %vm288_vm0, %v2236_v40, 0.0  ;;  %4235 = vmatprep.subr.bf16.mxu0 %v4331_v9 }
 0x3c3   :  { %v2277_v32 = vsel %vm288_vm0, %v2239_v11, 0.0  ;;  %4236 = vmatpush3.bf16.msra.mxu0 %v4331_v9 }
 0x3c4   :  { %2109 = vadd.xlane.f32.xlu1 %v2108_v14  ;;  %v2271_v20 = vsel %vm288_vm0, %v2237_v5, 0.0 }
 0x3c6   :  { %2112 = vadd.xlane.f32.xlu0 %v2111_v47 }
 0x3c8   :  { %2275 = vadd.xlane.f32.xlu1 %v2274_v43 }
 0x3ca   :  { %2278 = vadd.xlane.f32.xlu0 %v2277_v32 }
 0x3cc   :  { %2269 = vadd.xlane.f32.xlu1 %v2268_v51  ;;  %v4205_v27 = vpop.f32.mrb[4].mxu1 }
 0x3cd   :  { %v5973_v15 = vadd.f32 %v4205_v27, %v5933_v7  ;;  %v1997_v16 = vpop.f32.mrb[5].mxu1 }
 0x3ce   :  { %2272 = vadd.xlane.f32.xlu0 %v2271_v20  ;;  %v4206_v57 = vpop.f32.mrb[6].mxu1  ;;  %v5977_v60 = vadd.f32 %v1997_v16, %v5933_v7 }
 0x3cf   :  { %v5980_v25 = vadd.f32 %v4206_v57, %v5933_v7  ;;  %v2000_v4 = vpop.f32.mrb[7].mxu1  ;;  %v2126_v24 = vsel %vm288_vm0, %v5973_v15, 0.0  ;;  %v2242_v3 = vmul.f32 %v5973_v15, %v5973_v15 }
 0x3d0   :  { %2127 = vadd.xlane.f32.xlu1 %v2126_v24  ;;  %v5985_v56 = vadd.f32 %v2000_v4, %v5933_v7  ;;  %v2120_v12 = vsel %vm288_vm0, %v5977_v60, 0.0  ;;  %v2240_v23 = vmul.f32 %v5977_v60, %v5977_v60  ;;  %v4332_v4 = vld [vmem:[%s7081_s2 + $0x50] ss:$0 sps:$4 sm:$0x11]  }
 0x3d1   :  { %v2129_v52 = vsel %vm288_vm0, %v5980_v25, 0.0  ;;  %v2243_v28 = vmul.f32 %v5980_v25, %v5980_v25  ;;  %v2286_v49 = vsel %vm288_vm0, %v2242_v3, 0.0  ;;  %4313 = vmatprep.subr.msk.bf16.mxu0 %vm1034_vm1, %v4332_v4 }
 0x3d2   :  { %2130 = vadd.xlane.f32.xlu0 %v2129_v52  ;;  %v2123_v21 = vsel %vm288_vm0, %v5985_v56, 0.0  ;;  %v2241_v37 = vmul.f32 %v5985_v56, %v5985_v56  ;;  %v2280_v50 = vsel %vm288_vm0, %v2240_v23, 0.0 }
 0x3d3   :  { %v2289_v34 = vsel %vm288_vm0, %v2243_v28, 0.0 }
 0x3d4   :  { %2121 = vadd.xlane.f32.xlu1 %v2120_v12  ;;  %v2283_v63 = vsel %vm288_vm0, %v2241_v37, 0.0 }
 0x3d6   :  { %2124 = vadd.xlane.f32.xlu0 %v2123_v21  ;;  %v2854_v21 = vsel %vm1034_vm1, %v4332_v4, 0 }
 0x3d7   :  { %4238 = vmatpush3.bf16.msra.mxu0 %v2854_v21 }
 0x3d8   :  { %2287 = vadd.xlane.f32.xlu1 %v2286_v49 }
 0x3da   :  { %2290 = vadd.xlane.f32.xlu0 %v2289_v34 }
 0x3dc   :  { %2281 = vadd.xlane.f32.xlu1 %v2280_v50  ;;  %v4209_v35 = vpop.f32.mrb[8].mxu1 }
 0x3dd   :  { %v6005_v58 = vadd.f32 %v4209_v35, %v5933_v7  ;;  %v2013_v59 = vpop.f32.mrb[9].mxu1 }
 0x3de   :  { %2284 = vadd.xlane.f32.xlu0 %v2283_v63  ;;  %v4210_v33 = vpop.f32.mrb[10].mxu1  ;;  %v6009_v41 = vadd.f32 %v2013_v59, %v5933_v7 }
 0x3df   :  { %v6012_v10 = vadd.f32 %v4210_v33, %v5933_v7  ;;  %v2016_v54 = vpop.f32.mrb[11].mxu1  ;;  %v2138_v19 = vsel %vm288_vm0, %v6005_v58, 0.0  ;;  %v2246_v22 = vmul.f32 %v6005_v58, %v6005_v58 }
 0x3e0   :  { %2139 = vadd.xlane.f32.xlu1 %v2138_v19  ;;  %v6017_v8 = vadd.f32 %v2016_v54, %v5933_v7  ;;  %v2132_v61 = vsel %vm288_vm0, %v6009_v41, 0.0  ;;  %v2244_v44 = vmul.f32 %v6009_v41, %v6009_v41 }
 0x3e1   :  { %v2141_v62 = vsel %vm288_vm0, %v6012_v10, 0.0  ;;  %v2247_v13 = vmul.f32 %v6012_v10, %v6012_v10  ;;  %v2298_v48 = vsel %vm288_vm0, %v2246_v22, 0.0 }
 0x3e2   :  { %2142 = vadd.xlane.f32.xlu0 %v2141_v62  ;;  %v2135_v55 = vsel %vm288_vm0, %v6017_v8, 0.0  ;;  %v2245_v30 = vmul.f32 %v6017_v8, %v6017_v8  ;;  %v2292_v18 = vsel %vm288_vm0, %v2244_v44, 0.0 }
 0x3e3   :  { %v2301_v46 = vsel %vm288_vm0, %v2247_v13, 0.0 }
 0x3e4   :  { %2133 = vadd.xlane.f32.xlu1 %v2132_v61  ;;  %v2295_v1 = vsel %vm288_vm0, %v2245_v30, 0.0 }
 0x3e6   :  { %2136 = vadd.xlane.f32.xlu0 %v2135_v55 }
 0x3e8   :  { %2299 = vadd.xlane.f32.xlu1 %v2298_v48 }
 0x3ea   :  { %2302 = vadd.xlane.f32.xlu0 %v2301_v46 }
 0x3ec   :  { %2293 = vadd.xlane.f32.xlu1 %v2292_v18  ;;  %v4213_v29 = vpop.f32.mrb[12].mxu1 }
 0x3ed   :  { %v6037_v42 = vadd.f32 %v4213_v29, %v5933_v7  ;;  %v2029_v26 = vpop.f32.mrb[13].mxu1 }
 0x3ee   :  { %2296 = vadd.xlane.f32.xlu0 %v2295_v1  ;;  %v4214_v0 = vpop.f32.mrb[14].mxu1  ;;  %v6041_v38 = vadd.f32 %v2029_v26, %v5933_v7 }
 0x3ef   :  { %v6044_v39 = vadd.f32 %v4214_v0, %v5933_v7  ;;  %v2032_v36 = vpop.f32.mrb[15].mxu1  ;;  %v2150_v14 = vsel %vm288_vm0, %v6037_v42, 0.0  ;;  %v2250_v40 = vmul.f32 %v6037_v42, %v6037_v42 }
 0x3f0   :  { %2151 = vadd.xlane.f32.xlu1 %v2150_v14  ;;  %v6052_v47 = vadd.f32 %v2032_v36, %v5933_v7  ;;  %v2144_v43 = vsel %vm288_vm0, %v6041_v38, 0.0  ;;  %v2248_v27 = vmul.f32 %v6041_v38, %v6041_v38 }
 0x3f1   :  { %v2153_v11 = vsel %vm288_vm0, %v6044_v39, 0.0  ;;  %v2251_v5 = vmul.f32 %v6044_v39, %v6044_v39  ;;  %v2310_v51 = vsel %vm288_vm0, %v2250_v40, 0.0 }
 0x3f2   :  { %2154 = vadd.xlane.f32.xlu0 %v2153_v11  ;;  %v2147_v32 = vsel %vm288_vm0, %v6052_v47, 0.0  ;;  %v2249_v20 = vmul.f32 %v6052_v47, %v6052_v47  ;;  %v2304_v57 = vsel %vm288_vm0, %v2248_v27, 0.0 }
 0x3f3   :  { %v2313_v16 = vsel %vm288_vm0, %v2251_v5, 0.0 }
 0x3f4   :  { %2145 = vadd.xlane.f32.xlu1 %v2144_v43  ;;  %v2307_v3 = vsel %vm288_vm0, %v2249_v20, 0.0 }
 0x3f6   :  { %2148 = vadd.xlane.f32.xlu0 %v2147_v32 }
 0x3f8   :  { %2311 = vadd.xlane.f32.xlu1 %v2310_v51 }
 0x3fa   :  { %2314 = vadd.xlane.f32.xlu0 %v2313_v16 }
 0x3fc   :  { %2305 = vadd.xlane.f32.xlu1 %v2304_v57  ;;  %v4217_v24 = vpop.f32.mrb[16].mxu1 }
 0x3fd   :  { %v6075_v52 = vadd.f32 %v4217_v24, %v5933_v7  ;;  %v2045_v12 = vpop.f32.mrb[17].mxu1 }
 0x3fe   :  { %2308 = vadd.xlane.f32.xlu0 %v2307_v3  ;;  %v4218_v28 = vpop.f32.mrb[18].mxu1  ;;  %v6081_v49 = vadd.f32 %v2045_v12, %v5933_v7 }
 0x3ff   :  { %v6084_v23 = vadd.f32 %v4218_v28, %v5933_v7  ;;  %v2048_v34 = vpop.f32.mrb[19].mxu1  ;;  %v2162_v37 = vsel %vm288_vm0, %v6075_v52, 0.0  ;;  %v2254_v63 = vmul.f32 %v6075_v52, %v6075_v52 }
 0x400   :  { %2163 = vadd.xlane.f32.xlu1 %v2162_v37  ;;  %v6089_v50 = vadd.f32 %v2048_v34, %v5933_v7  ;;  %v2156_v59 = vsel %vm288_vm0, %v6081_v49, 0.0  ;;  %v2252_v62 = vmul.f32 %v6081_v49, %v6081_v49 }
 0x401   :  { %v2165_v35 = vsel %vm288_vm0, %v6084_v23, 0.0  ;;  %v2255_v54 = vmul.f32 %v6084_v23, %v6084_v23  ;;  %v2322_v19 = vsel %vm288_vm0, %v2254_v63, 0.0 }
 0x402   :  { %2166 = vadd.xlane.f32.xlu0 %v2165_v35  ;;  %v2159_v33 = vsel %vm288_vm0, %v6089_v50, 0.0  ;;  %v2253_v22 = vmul.f32 %v6089_v50, %v6089_v50  ;;  %v2316_v55 = vsel %vm288_vm0, %v2252_v62, 0.0 }
 0x403   :  { %v2325_v61 = vsel %vm288_vm0, %v2255_v54, 0.0 }
 0x404   :  { %2157 = vadd.xlane.f32.xlu1 %v2156_v59  ;;  %v2319_v46 = vsel %vm288_vm0, %v2253_v22, 0.0 }
 0x406   :  { %2160 = vadd.xlane.f32.xlu0 %v2159_v33 }
 0x408   :  { %2323 = vadd.xlane.f32.xlu1 %v2322_v19 }
 0x40a   :  { %2326 = vadd.xlane.f32.xlu0 %v2325_v61 }
 0x40c   :  { %2317 = vadd.xlane.f32.xlu1 %v2316_v55  ;;  %v4221_v13 = vpop.f32.mrb[20].mxu1 }
 0x40d   :  { %v6109_v48 = vadd.f32 %v4221_v13, %v5933_v7  ;;  %v2061_v44 = vpop.f32.mrb[21].mxu1 }
 0x40e   :  { %2320 = vadd.xlane.f32.xlu0 %v2319_v46  ;;  %v4222_v30 = vpop.f32.mrb[22].mxu1  ;;  %v6113_v18 = vadd.f32 %v2061_v44, %v5933_v7 }
 0x40f   :  { %v6116_v29 = vadd.f32 %v4222_v30, %v5933_v7  ;;  %v2064_v26 = vpop.f32.mrb[23].mxu1  ;;  %v2174_v1 = vsel %vm288_vm0, %v6109_v48, 0.0  ;;  %v2258_v9 = vmul.f32 %v6109_v48, %v6109_v48 }
 0x410   :  { %2175 = vadd.xlane.f32.xlu1 %v2174_v1  ;;  %v6121_v0 = vadd.f32 %v2064_v26, %v5933_v7  ;;  %v2168_v14 = vsel %vm288_vm0, %v6113_v18, 0.0  ;;  %v2256_v32 = vmul.f32 %v6113_v18, %v6113_v18 }
 0x411   :  { %v2177_v36 = vsel %vm288_vm0, %v6116_v29, 0.0  ;;  %v2259_v43 = vmul.f32 %v6116_v29, %v6116_v29  ;;  %v2334_v40 = vsel %vm288_vm0, %v2258_v9, 0.0 }
 0x412   :  { %2178 = vadd.xlane.f32.xlu0 %v2177_v36  ;;  %v2171_v11 = vsel %vm288_vm0, %v6121_v0, 0.0  ;;  %v2257_v51 = vmul.f32 %v6121_v0, %v6121_v0  ;;  %v2328_v27 = vsel %vm288_vm0, %v2256_v32, 0.0 }
 0x413   :  { %v2337_v5 = vsel %vm288_vm0, %v2259_v43, 0.0 }
 0x414   :  { %2169 = vadd.xlane.f32.xlu1 %v2168_v14  ;;  %v2331_v4 = vsel %vm288_vm0, %v2257_v51, 0.0 }
 0x416   :  { %2172 = vadd.xlane.f32.xlu0 %v2171_v11 }
 0x418   :  { %2335 = vadd.xlane.f32.xlu1 %v2334_v40 }
 0x41a   :  { %2338 = vadd.xlane.f32.xlu0 %v2337_v5 }
 0x41c   :  { %2329 = vadd.xlane.f32.xlu1 %v2328_v27  ;;  %v4225_v16 = vpop.f32.mrb[24].mxu1 }
 0x41d   :  { %v6141_v20 = vadd.f32 %v4225_v16, %v5933_v7  ;;  %v2077_v57 = vpop.f32.mrb[25].mxu1 }
 0x41e   :  { %2332 = vadd.xlane.f32.xlu0 %v2331_v4  ;;  %v4226_v24 = vpop.f32.mrb[26].mxu1  ;;  %v6145_v12 = vadd.f32 %v2077_v57, %v5933_v7 }
 0x41f   :  { %v6148_v3 = vadd.f32 %v4226_v24, %v5933_v7  ;;  %v2080_v21 = vpop.f32.mrb[27].mxu1  ;;  %v2186_v28 = vsel %vm288_vm0, %v6141_v20, 0.0  ;;  %v2262_v59 = vmul.f32 %v6141_v20, %v6141_v20 }
 0x420   :  { %2187 = vadd.xlane.f32.xlu1 %v2186_v28  ;;  %v6153_v34 = vadd.f32 %v2080_v21, %v5933_v7  ;;  %v2180_v35 = vsel %vm288_vm0, %v6145_v12, 0.0  ;;  %v2260_v19 = vmul.f32 %v6145_v12, %v6145_v12 }
 0x421   :  { %v2189_v37 = vsel %vm288_vm0, %v6148_v3, 0.0  ;;  %v2263_v33 = vmul.f32 %v6148_v3, %v6148_v3  ;;  %v2346_v54 = vsel %vm288_vm0, %v2262_v59, 0.0 }
 0x422   :  { %2190 = vadd.xlane.f32.xlu0 %v2189_v37  ;;  %v2183_v63 = vsel %vm288_vm0, %v6153_v34, 0.0  ;;  %v2261_v61 = vmul.f32 %v6153_v34, %v6153_v34  ;;  %v2340_v55 = vsel %vm288_vm0, %v2260_v19, 0.0 }
 0x423   :  { %v2349_v62 = vsel %vm288_vm0, %v2263_v33, 0.0 }
 0x424   :  { %2181 = vadd.xlane.f32.xlu1 %v2180_v35  ;;  %v2343_v30 = vsel %vm288_vm0, %v2261_v61, 0.0 }
 0x426   :  { %2184 = vadd.xlane.f32.xlu0 %v2183_v63 }
 0x428   :  { %2347 = vadd.xlane.f32.xlu1 %v2346_v54 }
 0x42a   :  { %2350 = vadd.xlane.f32.xlu0 %v2349_v62 }
 0x42b   :  { %v4229_v22 = vpop.f32.mrb[28].mxu1 }
 0x42c   :  { %v6173_v13 = vadd.f32 %v4229_v22, %v5933_v7  ;;  %2341 = vadd.xlane.f32.xlu1 %v2340_v55  ;;  %v2093_v44 = vpop.f32.mrb[29].mxu1 }
 0x42d   :  { %v4230_v46 = vpop.f32.mrb[30].mxu1  ;;  %v6182_v14 = vadd.f32 %v2093_v44, %v5933_v7 }
 0x42e   :  { %v6177_v26 = vadd.f32 %v4230_v46, %v5933_v7  ;;  %2344 = vadd.xlane.f32.xlu0 %v2343_v30  ;;  %v2096_v1 = vpop.f32.mrb[31].mxu1  ;;  %v2198_v36 = vsel %vm288_vm0, %v6173_v13, 0.0 }
 0x42f   :  { %v6187_v11 = vadd.f32 %v2096_v1, %v5933_v7  ;;  %v2192_v43 = vsel %vm288_vm0, %v6182_v14, 0.0  ;;  %v2264_v40 = vmul.f32 %v6182_v14, %v6182_v14  ;;  %v2266_v7 = vmul.f32 %v6173_v13, %v6173_v13 }
 0x430   :  { %2199 = vadd.xlane.f32.xlu1 %v2198_v36  ;;  %v2201_v9 = vsel %vm288_vm0, %v6177_v26, 0.0  ;;  %v2267_v16 = vmul.f32 %v6177_v26, %v6177_v26 }
 0x431   :  { %v2195_v32 = vsel %vm288_vm0, %v6187_v11, 0.0  ;;  %v2265_v5 = vmul.f32 %v6187_v11, %v6187_v11  ;;  %v2352_v51 = vsel %vm288_vm0, %v2264_v40, 0.0  ;;  %v2358_v57 = vsel %vm288_vm0, %v2266_v7, 0.0 }
 0x432   :  { %2202 = vadd.xlane.f32.xlu0 %v2201_v9  ;;  %v2361_v4 = vsel %vm288_vm0, %v2267_v16, 0.0 }
 0x433   :  { %v2355_v27 = vsel %vm288_vm0, %v2265_v5, 0.0 }
 0x434   :  { %2193 = vadd.xlane.f32.xlu1 %v2192_v43 }
 0x436   :  { %2196 = vadd.xlane.f32.xlu0 %v2195_v32 }
 0x438   :  { %2353 = vadd.xlane.f32.xlu1 %v2352_v51 }
 0x43a   :  { %2356 = vadd.xlane.f32.xlu0 %v2355_v27 }
 0x43c   :  { %2359 = vadd.xlane.f32.xlu1 %v2358_v57 }
 0x43e   :  { %2362 = vadd.xlane.f32.xlu0 %v2361_v4  ;;  %v55_v4 = vld [vmem:[%s7080_s1 + $0x8] sm:$0x1f] }
 0x44d   :  { %v2116_v24 = vpop.xlane.xlu1 %2115 }
 0x44e   :  { %v2206_v37 = vmul.f32 0.02, %v2116_v24 }
 0x44f   :  { %v2119_v21 = vpop.xlane.xlu0 %2118 }
 0x450   :  { %v2207_v59 = vmul.f32 0.02, %v2119_v21  ;;  %v2398_v33 = vmul.f32 %v2206_v37, %v2206_v37 }
 0x451   :  { %v2110_v28 = vpop.xlane.xlu1 %2109 }
 0x452   :  { %v6205_v54 = vmul.f32 0.02, %v2110_v28  ;;  %v2399_v22 = vmul.f32 %v2207_v59, %v2207_v59 }
 0x453   :  { %v2113_v35 = vpop.xlane.xlu0 %2112 }
 0x454   :  { %v6207_v62 = vmul.f32 0.02, %v2113_v35  ;;  %v2396_v30 = vmul.f32 %v6205_v54, %v6205_v54  ;;  %v7114_v35 = vsub.s32 0, %v7113_v6 }
 0x455   :  { %v2276_v63 = vpop.xlane.xlu1 %2275 }
 0x456   :  { %v2366_v19 = vmul.f32 0.02, %v2276_v63  ;;  %v2397_v43 = vmul.f32 %v6207_v62, %v6207_v62  ;;  %v6220_v63 = vrot.slane %v55_v4, %v7114_v35 }
 0x457   :  { %v2279_v61 = vpop.xlane.xlu0 %2278 }
 0x458   :  { %v2430_v55 = vsub.f32 %v2366_v19, %v2398_v33  ;;  %v2367_v44 = vmul.f32 0.02, %v2279_v61 }
 0x459   :  { %v2270_v46 = vpop.xlane.xlu1 %2269 }
 0x45a   :  { %v2462_v1 = vadd.f32 1e-05, %v2430_v55  ;;  %v2431_v36 = vsub.f32 %v2367_v44, %v2399_v22  ;;  %v2364_v9 = vmul.f32 0.02, %v2270_v46 }
 0x45b   :  { %v2273_v40 = vpop.xlane.xlu0 %2272 }
 0x45c   :  { %4465 = vrsqrt.f32 %v2462_v1  ;;  %v2463_v32 = vadd.f32 1e-05, %v2431_v36  ;;  %v2428_v5 = vsub.f32 %v2364_v9, %v2396_v30  ;;  %v2365_v51 = vmul.f32 0.02, %v2273_v40 }
 0x45d   :  { %v2128_v7 = vpop.xlane.xlu1 %2127  ;;  %v7115_v30 = vsub.s32 1, %v7113_v6  ;;  %v2526_v36 = vsub.f32 %v5939_v31, %v2206_v37 }
 0x45e   :  { %4467 = vrsqrt.f32 %v2463_v32  ;;  %v2460_v27 = vadd.f32 1e-05, %v2428_v5  ;;  %v2429_v16 = vsub.f32 %v2365_v51, %v2397_v43  ;;  %v6216_v28 = vmul.f32 0.02, %v2128_v7 }
 0x45f   :  { %v2131_v57 = vpop.xlane.xlu0 %2130  ;;  %v6230_v1 = vrot.slane %v55_v4, %v7115_v30 }
 0x460   :  { %4469 = vrsqrt.f32 %v2460_v27  ;;  %v2461_v24 = vadd.f32 1e-05, %v2429_v16  ;;  %v6222_v19 = vmul.f32 0.02, %v2131_v57  ;;  %v2402_v55 = vmul.f32 %v6216_v28, %v6216_v28 }
 0x461   :  { %v2122_v21 = vpop.xlane.xlu1 %2121  ;;  %v2527_v27 = vsub.f32 %v5948_v17, %v2207_v59  ;;  %v2524_v16 = vsub.f32 %v5945_v2, %v6205_v54 }
 0x462   :  { %4471 = vrsqrt.f32 %v2461_v24  ;;  %v6226_v44 = vmul.f32 0.02, %v2122_v21  ;;  %v2403_v5 = vmul.f32 %v6222_v19, %v6222_v19 }
 0x463   :  { %v2125_v33 = vpop.xlane.xlu0 %2124 }
 0x464   :  { %v6234_v43 = vmul.f32 0.02, %v2125_v33  ;;  %v2400_v24 = vmul.f32 %v6226_v44, %v6226_v44 }
 0x465   :  { %v2288_v61 = vpop.xlane.xlu1 %2287 }
 0x466   :  { %v4466_v22 = vpop.eup %4465  ;;  %v2370_v46 = vmul.f32 0.02, %v2288_v61  ;;  %v2401_v17 = vmul.f32 %v6234_v43, %v6234_v43 }
 0x467   :  { %v2562_v9 = vmul.f32 %v4466_v22, %v6220_v63  ;;  %v2291_v40 = vpop.xlane.xlu0 %2290 }
 0x468   :  { %v4468_v32 = vpop.eup %4467  ;;  %v2434_v51 = vsub.f32 %v2370_v46, %v2402_v55  ;;  %v2371_v7 = vmul.f32 0.02, %v2291_v40 }
 0x469   :  { %v2594_v57 = vmul.f32 %v2562_v9, %v2526_v36  ;;  %v2563_v4 = vmul.f32 %v4468_v32, %v6220_v63  ;;  %v2282_v31 = vpop.xlane.xlu1 %2281  ;;  %v2525_v36 = vsub.f32 %v5953_v53, %v6207_v62 }
 0x46a   :  { %v4470_v37 = vpop.eup %4469  ;;  %v2466_v21 = vadd.f32 1e-05, %v2434_v51  ;;  %v2435_v35 = vsub.f32 %v2371_v7, %v2403_v5  ;;  %v2368_v33 = vmul.f32 0.02, %v2282_v31 }
 0x46b   :  { %v2630_v61 = vadd.f32 %v6230_v1, %v2594_v57  ;;  %v2595_v22 = vmul.f32 %v2563_v4, %v2527_v27  ;;  %v2560_v55 = vmul.f32 %v4470_v37, %v6220_v63  ;;  %v2285_v2 = vpop.xlane.xlu0 %2284 }
 0x46c   :  { %v4472_v59 = vpop.eup %4471  ;;  %4473 = vrsqrt.f32 %v2466_v21  ;;  %v2467_v54 = vadd.f32 1e-05, %v2435_v35  ;;  %v2432_v46 = vsub.f32 %v2368_v33, %v2400_v24  ;;  %v2369_v30 = vmul.f32 0.02, %v2285_v2 }
 0x46d   :  { %v2631_v9 = vadd.f32 %v6230_v1, %v2595_v22  ;;  %v2561_v40 = vmul.f32 %v4472_v59, %v6220_v63  ;;  %v2140_v32 = vpop.xlane.xlu1 %2139  ;;  %v2592_v5 = vmul.f32 %v2560_v55, %v2524_v16  ;;  %v2662_v37 = vmax.f32 %v2630_v61, 0.0 }
 0x46e   :  { %4475 = vrsqrt.f32 %v2467_v54  ;;  %v2464_v51 = vadd.f32 1e-05, %v2432_v46  ;;  %v2433_v7 = vsub.f32 %v2369_v30, %v2401_v17  ;;  %v6254_v35 = vmul.f32 0.02, %v2140_v32 }
 0x46f   :  { %v2663_v27 = vmax.f32 %v2631_v9, 0.0  ;;  %v2143_v57 = vpop.xlane.xlu0 %2142  ;;  %v2593_v4 = vmul.f32 %v2561_v40, %v2525_v36  ;;  %v2628_v31 = vadd.f32 %v6230_v1, %v2592_v5  ;;  %v2694_v2 = vmul.f32 %v2662_v37, %v2662_v37 }
 0x470   :  { %4477 = vrsqrt.f32 %v2464_v51  ;;  %v2465_v24 = vadd.f32 1e-05, %v2433_v7  ;;  %v6256_v17 = vmul.f32 0.02, %v2143_v57  ;;  %v2530_v59 = vsub.f32 %v5973_v15, %v6216_v28 }
 0x471   :  { %v2134_v21 = vpop.xlane.xlu1 %2133  ;;  %v2629_v53 = vadd.f32 %v6230_v1, %v2593_v4  ;;  %v2660_v62 = vmax.f32 %v2628_v31, 0.0  ;;  %v2695_v33 = vmul.f32 %v2663_v27, %v2663_v27  ;;  %v2531_v61 = vsub.f32 %v5980_v25, %v6222_v19 }
 0x472   :  { %4479 = vrsqrt.f32 %v2465_v24  ;;  %v6262_v54 = vmul.f32 0.02, %v2134_v21  ;;  %v2528_v9 = vsub.f32 %v5977_v60, %v6226_v44  ;;  %v2406_v40 = vmul.f32 %v6254_v35, %v6254_v35 }
 0x473   :  { %v2137_v16 = vpop.xlane.xlu0 %2136  ;;  %v2661_v22 = vmax.f32 %v2629_v53, 0.0  ;;  %v2692_v55 = vmul.f32 %v2660_v62, %v2660_v62  ;;  %v2727_v5 = vmul.f32 %v2695_v33, %v2663_v27  ;;  %v2407_v57 = vmul.f32 %v6256_v17, %v6256_v17 }
 0x474   :  { %v6269_v7 = vmul.f32 0.02, %v2137_v16  ;;  %v2726_v24 = vmul.f32 %v2694_v2, %v2662_v37  ;;  %v2404_v44 = vmul.f32 %v6262_v54, %v6262_v54 }
 0x475   :  { %v2300_v46 = vpop.xlane.xlu1 %2299  ;;  %v2693_v30 = vmul.f32 %v2661_v22, %v2661_v22  ;;  %v2724_v28 = vmul.f32 %v2692_v55, %v2660_v62 }
 0x476   :  { %v4474_v36 = vpop.eup %4473  ;;  %v2374_v32 = vmul.f32 0.02, %v2300_v46 }
 0x477   :  { %v2566_v51 = vmul.f32 %v4474_v36, %v6220_v63  ;;  %v2303_v15 = vpop.xlane.xlu0 %2302  ;;  %v2725_v25 = vmul.f32 %v2693_v30, %v2661_v22  ;;  %v2765_v22 = vpack.c.bf16 %v2727_v5, %v2726_v24  ;;  %v2405_v30 = vmul.f32 %v6269_v7, %v6269_v7 }
 0x478   :  { %v4476_v19 = vpop.eup %4475  ;;  %v2438_v4 = vsub.f32 %v2374_v32, %v2406_v40  ;;  %v2375_v31 = vmul.f32 0.02, %v2303_v15  ;;  %v2529_v5 = vsub.f32 %v5985_v56, %v6234_v43 }
 0x479   :  { %v2567_v60 = vmul.f32 %v4476_v19, %v6220_v63  ;;  %v2294_v27 = vpop.xlane.xlu1 %2293  ;;  %v2764_v21 = vpack.c.bf16 %v2725_v25, %v2724_v28  ;;  %v2598_v53 = vmul.f32 %v2566_v51, %v2530_v59 }
 0x47a   :  { %v4478_v33 = vpop.eup %4477  ;;  %v2470_v16 = vadd.f32 1e-05, %v2438_v4  ;;  %v2439_v46 = vsub.f32 %v2375_v31, %v2407_v57  ;;  %v2372_v62 = vmul.f32 0.02, %v2294_v27 }
 0x47b   :  { %v2564_v55 = vmul.f32 %v4478_v33, %v6220_v63  ;;  %4239 = vmatprep.mubr.msk.bf16.mxu0 %vm288_vm0, %v2764_v21  ;;  %v2297_v37 = vpop.xlane.xlu0 %2296  ;;  %v2599_v2 = vmul.f32 %v2567_v60, %v2531_v61  ;;  %v2634_v36 = vadd.f32 %v6230_v1, %v2598_v53 }
 0x47c   :  { %v4480_v40 = vpop.eup %4479  ;;  %4481 = vrsqrt.f32 %v2470_v16  ;;  %v2471_v32 = vadd.f32 1e-05, %v2439_v46  ;;  %v2436_v59 = vsub.f32 %v2372_v62, %v2404_v44  ;;  %v2373_v51 = vmul.f32 0.02, %v2297_v37  ;;  %4240 = vmatmul.mubr.msk.bf16.vlgmr.msra.gmra.mrb[32].mxu0 %vm288_vm0, %v2765_v22 }
 0x47d   :  { %v2565_v15 = vmul.f32 %v4480_v40, %v6220_v63  ;;  %v2152_v28 = vpop.xlane.xlu1 %2151  ;;  %v2596_v25 = vmul.f32 %v2564_v55, %v2528_v9  ;;  %v2635_v19 = vadd.f32 %v6230_v1, %v2599_v2  ;;  %v2666_v27 = vmax.f32 %v2634_v36, 0.0 }
 0x47e   :  { %4483 = vrsqrt.f32 %v2471_v32  ;;  %v2468_v61 = vadd.f32 1e-05, %v2436_v59  ;;  %v2437_v57 = vsub.f32 %v2373_v51, %v2405_v30  ;;  %v6288_v53 = vmul.f32 0.02, %v2152_v28 }
 0x47f   :  { %v2155_v4 = vpop.xlane.xlu0 %2154  ;;  %v2597_v31 = vmul.f32 %v2565_v15, %v2529_v5  ;;  %v2632_v24 = vadd.f32 %v6230_v1, %v2596_v25  ;;  %v2667_v60 = vmax.f32 %v2635_v19, 0.0  ;;  %v2698_v22 = vmul.f32 %v2666_v27, %v2666_v27 }
 0x480   :  { %4485 = vrsqrt.f32 %v2468_v61  ;;  %v2469_v44 = vadd.f32 1e-05, %v2437_v57  ;;  %v6290_v62 = vmul.f32 0.02, %v2155_v4  ;;  %v2534_v55 = vsub.f32 %v6005_v58, %v6254_v35 }
 0x481   :  { %v2146_v21 = vpop.xlane.xlu1 %2145  ;;  %v2633_v56 = vadd.f32 %v6230_v1, %v2597_v31  ;;  %v2664_v43 = vmax.f32 %v2632_v24, 0.0  ;;  %v2699_v9 = vmul.f32 %v2667_v60, %v2667_v60  ;;  %v2535_v30 = vsub.f32 %v6012_v10, %v6256_v17 }
 0x482   :  { %4487 = vrsqrt.f32 %v2469_v44  ;;  %v6296_v37 = vmul.f32 0.02, %v2146_v21  ;;  %v2532_v32 = vsub.f32 %v6009_v41, %v6262_v54  ;;  %v2410_v59 = vmul.f32 %v6288_v53, %v6288_v53 }
 0x483   :  { %v2149_v33 = vpop.xlane.xlu0 %2148  ;;  %v2665_v16 = vmax.f32 %v2633_v56, 0.0  ;;  %v2696_v46 = vmul.f32 %v2664_v43, %v2664_v43  ;;  %v2731_v5 = vmul.f32 %v2699_v9, %v2667_v60  ;;  %v2411_v25 = vmul.f32 %v6290_v62, %v6290_v62 }
 0x484   :  { %v6303_v28 = vmul.f32 0.02, %v2149_v33  ;;  %v2730_v57 = vmul.f32 %v2698_v22, %v2666_v27  ;;  %v2408_v54 = vmul.f32 %v6296_v37, %v6296_v37 }
 0x485   :  { %v2312_v2 = vpop.xlane.xlu1 %2311  ;;  %v2697_v36 = vmul.f32 %v2665_v16, %v2665_v16  ;;  %v2728_v35 = vmul.f32 %v2696_v46, %v2664_v43 }
 0x486   :  { %v4482_v40 = vpop.eup %4481  ;;  %v2378_v51 = vmul.f32 0.02, %v2312_v2  ;;  %v2767_v43 = vpack.c.bf16 %v2731_v5, %v2730_v57  ;;  %v2409_v33 = vmul.f32 %v6303_v28, %v6303_v28 }
 0x487   :  { %v2570_v15 = vmul.f32 %v4482_v40, %v6220_v63  ;;  %v2315_v58 = vpop.xlane.xlu0 %2314  ;;  %v2729_v10 = vmul.f32 %v2697_v36, %v2665_v16  ;;  %v2533_v40 = vsub.f32 %v6017_v8, %v6269_v7 }
 0x488   :  { %v4484_v17 = vpop.eup %4483  ;;  %v2442_v19 = vsub.f32 %v2378_v51, %v2410_v59  ;;  %v2379_v61 = vmul.f32 0.02, %v2315_v58 }
 0x489   :  { %v2571_v41 = vmul.f32 %v4484_v17, %v6220_v63  ;;  %v2306_v4 = vpop.xlane.xlu1 %2305  ;;  %v2766_v31 = vpack.c.bf16 %v2729_v10, %v2728_v35  ;;  %v2602_v24 = vmul.f32 %v2570_v15, %v2534_v55 }
 0x48a   :  { %v4486_v60 = vpop.eup %4485  ;;  %v2474_v44 = vadd.f32 1e-05, %v2442_v19  ;;  %v2443_v21 = vsub.f32 %v2379_v61, %v2411_v25  ;;  %v2376_v56 = vmul.f32 0.02, %v2306_v4 }
 0x48b   :  { %v2568_v9 = vmul.f32 %v4486_v60, %v6220_v63  ;;  %4243 = vmatprep.mubr.msk.bf16.mxu0 %vm288_vm0, %v2766_v31  ;;  %v2309_v27 = vpop.xlane.xlu0 %2308  ;;  %v2603_v16 = vmul.f32 %v2571_v41, %v2535_v30  ;;  %v2638_v46 = vadd.f32 %v6230_v1, %v2602_v24 }
 0x48c   :  { %v4488_v22 = vpop.eup %4487  ;;  %4489 = vrsqrt.f32 %v2474_v44  ;;  %v2475_v2 = vadd.f32 1e-05, %v2443_v21  ;;  %v2440_v55 = vsub.f32 %v2376_v56, %v2408_v54  ;;  %v2377_v36 = vmul.f32 0.02, %v2309_v27  ;;  %4244 = vmatmul.mubr.msk.bf16.gmra.mrb[36].mxu0 %vm288_vm0, %v2767_v43 }
 0x48d   :  { %v2569_v59 = vmul.f32 %v4488_v22, %v6220_v63  ;;  %v2164_v51 = vpop.xlane.xlu1 %2163  ;;  %v2600_v5 = vmul.f32 %v2568_v9, %v2532_v32  ;;  %v2639_v15 = vadd.f32 %v6230_v1, %v2603_v16  ;;  %v2670_v61 = vmax.f32 %v2638_v46, 0.0 }
 0x48e   :  { %4491 = vrsqrt.f32 %v2475_v2  ;;  %v2472_v30 = vadd.f32 1e-05, %v2440_v55  ;;  %v2441_v58 = vsub.f32 %v2377_v36, %v2409_v33  ;;  %v6322_v41 = vmul.f32 0.02, %v2164_v51 }
 0x48f   :  { %v2167_v35 = vpop.xlane.xlu0 %2166  ;;  %v2601_v10 = vmul.f32 %v2569_v59, %v2533_v40  ;;  %v2636_v17 = vadd.f32 %v6230_v1, %v2600_v5  ;;  %v2671_v25 = vmax.f32 %v2639_v15, 0.0  ;;  %v2702_v60 = vmul.f32 %v2670_v61, %v2670_v61 }
 0x490   :  { %4493 = vrsqrt.f32 %v2472_v30  ;;  %v2473_v19 = vadd.f32 1e-05, %v2441_v58  ;;  %v6324_v24 = vmul.f32 0.02, %v2167_v35  ;;  %v2538_v44 = vsub.f32 %v6037_v42, %v6288_v53 }
 0x491   :  { %v2158_v57 = vpop.xlane.xlu1 %2157  ;;  %v2637_v8 = vadd.f32 %v6230_v1, %v2601_v10  ;;  %v2668_v7 = vmax.f32 %v2636_v17, 0.0  ;;  %v2703_v32 = vmul.f32 %v2671_v25, %v2671_v25  ;;  %v2539_v21 = vsub.f32 %v6044_v39, %v6290_v62 }
 0x492   :  { %4495 = vrsqrt.f32 %v2473_v19  ;;  %v6330_v56 = vmul.f32 0.02, %v2158_v57  ;;  %v2536_v27 = vsub.f32 %v6041_v38, %v6296_v37  ;;  %v2414_v16 = vmul.f32 %v6322_v41, %v6322_v41 }
 0x493   :  { %v2161_v54 = vpop.xlane.xlu0 %2160  ;;  %v2669_v4 = vmax.f32 %v2637_v8, 0.0  ;;  %v2700_v31 = vmul.f32 %v2668_v7, %v2668_v7  ;;  %v2735_v22 = vmul.f32 %v2703_v32, %v2671_v25  ;;  %v2415_v36 = vmul.f32 %v6324_v24, %v6324_v24 }
 0x494   :  { %v6337_v55 = vmul.f32 0.02, %v2161_v54  ;;  %v2734_v51 = vmul.f32 %v2702_v60, %v2670_v61  ;;  %v2412_v37 = vmul.f32 %v6330_v56, %v6330_v56  ;;  %v2537_v60 = vsub.f32 %v6052_v47, %v6303_v28 }
 0x495   :  { %v2324_v43 = vpop.xlane.xlu1 %2323  ;;  %v2701_v9 = vmul.f32 %v2669_v4, %v2669_v4  ;;  %v2732_v53 = vmul.f32 %v2700_v31, %v2668_v7 }
 0x496   :  { %v4490_v33 = vpop.eup %4489  ;;  %v2382_v46 = vmul.f32 0.02, %v2324_v43  ;;  %v2769_v25 = vpack.c.bf16 %v2735_v22, %v2734_v51  ;;  %v2413_v57 = vmul.f32 %v6337_v55, %v6337_v55 }
 0x497   :  { %v2574_v2 = vmul.f32 %v4490_v33, %v6220_v63  ;;  %v2327_v42 = vpop.xlane.xlu0 %2326  ;;  %v2733_v39 = vmul.f32 %v2701_v9, %v2669_v4 }
 0x498   :  { %v4492_v62 = vpop.eup %4491  ;;  %v2446_v40 = vsub.f32 %v2382_v46, %v2414_v16  ;;  %v2383_v59 = vmul.f32 0.02, %v2327_v42 }
 0x499   :  { %v2575_v38 = vmul.f32 %v4492_v62, %v6220_v63  ;;  %v2318_v5 = vpop.xlane.xlu1 %2317  ;;  %v2768_v15 = vpack.c.bf16 %v2733_v39, %v2732_v53  ;;  %v2606_v30 = vmul.f32 %v2574_v2, %v2538_v44 }
 0x49a   :  { %v4494_v58 = vpop.eup %4493  ;;  %v2478_v35 = vadd.f32 1e-05, %v2446_v40  ;;  %v2447_v10 = vsub.f32 %v2383_v59, %v2415_v36  ;;  %v2380_v17 = vmul.f32 0.02, %v2318_v5  ;;  %v2542_v5 = vsub.f32 %v6075_v52, %v6322_v41 }
 0x49b   :  { %v2572_v19 = vmul.f32 %v4494_v58, %v6220_v63  ;;  %4247 = vmatprep.mubr.msk.bf16.mxu0 %vm288_vm0, %v2768_v15  ;;  %v2321_v61 = vpop.xlane.xlu0 %2320  ;;  %v2607_v8 = vmul.f32 %v2575_v38, %v2539_v21  ;;  %v2642_v7 = vadd.f32 %v6230_v1, %v2606_v30  ;;  %v2543_v15 = vsub.f32 %v6084_v23, %v6324_v24 }
 0x49c   :  { %v4496_v32 = vpop.eup %4495  ;;  %4497 = vrsqrt.f32 %v2478_v35  ;;  %v2479_v54 = vadd.f32 1e-05, %v2447_v10  ;;  %v2444_v4 = vsub.f32 %v2380_v17, %v2412_v37  ;;  %v2381_v31 = vmul.f32 0.02, %v2321_v61  ;;  %4248 = vmatmul.mubr.msk.bf16.gmra.mrb[40].mxu0 %vm288_vm0, %v2769_v25 }
 0x49d   :  { %v2573_v44 = vmul.f32 %v4496_v32, %v6220_v63  ;;  %v2176_v43 = vpop.xlane.xlu1 %2175  ;;  %v2604_v9 = vmul.f32 %v2572_v19, %v2536_v27  ;;  %v2643_v33 = vadd.f32 %v6230_v1, %v2607_v8  ;;  %v2674_v39 = vmax.f32 %v2642_v7, 0.0 }
 0x49e   :  { %4499 = vrsqrt.f32 %v2479_v54  ;;  %v2476_v21 = vadd.f32 1e-05, %v2444_v4  ;;  %v2445_v16 = vsub.f32 %v2381_v31, %v2413_v57  ;;  %v6356_v36 = vmul.f32 0.02, %v2176_v43 }
 0x49f   :  { %v2179_v46 = vpop.xlane.xlu0 %2178  ;;  %v2605_v22 = vmul.f32 %v2573_v44, %v2537_v60  ;;  %v2640_v2 = vadd.f32 %v6230_v1, %v2604_v9  ;;  %v2675_v42 = vmax.f32 %v2643_v33, 0.0  ;;  %v2706_v37 = vmul.f32 %v2674_v39, %v2674_v39 }
 0x4a0   :  { %4501 = vrsqrt.f32 %v2476_v21  ;;  %v2477_v53 = vadd.f32 1e-05, %v2445_v16  ;;  %v6358_v38 = vmul.f32 0.02, %v2179_v46  ;;  %v2540_v17 = vsub.f32 %v6081_v49, %v6330_v56 }
 0x4a1   :  { %v2170_v62 = vpop.xlane.xlu1 %2169  ;;  %v2641_v47 = vadd.f32 %v6230_v1, %v2605_v22  ;;  %v2672_v28 = vmax.f32 %v2640_v2, 0.0  ;;  %v2707_v27 = vmul.f32 %v2675_v42, %v2675_v42  ;;  %v2418_v25 = vmul.f32 %v6356_v36, %v6356_v36 }
 0x4a2   :  { %4503 = vrsqrt.f32 %v2477_v53  ;;  %v6364_v30 = vmul.f32 0.02, %v2170_v62  ;;  %v2419_v7 = vmul.f32 %v6358_v38, %v6358_v38  ;;  %v2738_v4 = vmul.f32 %v2706_v37, %v2674_v39 }
 0x4a3   :  { %v2173_v40 = vpop.xlane.xlu0 %2172  ;;  %v2673_v59 = vmax.f32 %v2641_v47, 0.0  ;;  %v2704_v51 = vmul.f32 %v2672_v28, %v2672_v28  ;;  %v2739_v57 = vmul.f32 %v2707_v27, %v2675_v42  ;;  %v2541_v27 = vsub.f32 %v6089_v50, %v6337_v55 }
 0x4a4   :  { %v6371_v8 = vmul.f32 0.02, %v2173_v40  ;;  %v2416_v56 = vmul.f32 %v6364_v30, %v6364_v30 }
 0x4a5   :  { %v2336_v58 = vpop.xlane.xlu1 %2335  ;;  %v2705_v35 = vmul.f32 %v2673_v59, %v2673_v59  ;;  %v2736_v41 = vmul.f32 %v2704_v51, %v2672_v28  ;;  %v2771_v16 = vpack.c.bf16 %v2739_v57, %v2738_v4  ;;  %v2547_v4 = vsub.f32 %v6116_v29, %v6358_v38 }
 0x4a6   :  { %v4498_v10 = vpop.eup %4497  ;;  %v2386_v19 = vmul.f32 0.02, %v2336_v58  ;;  %v2417_v22 = vmul.f32 %v6371_v8, %v6371_v8 }
 0x4a7   :  { %v2578_v61 = vmul.f32 %v4498_v10, %v6220_v63  ;;  %v2339_v52 = vpop.xlane.xlu0 %2338  ;;  %v2737_v23 = vmul.f32 %v2705_v35, %v2673_v59 }
 0x4a8   :  { %v4500_v24 = vpop.eup %4499  ;;  %v2450_v32 = vsub.f32 %v2386_v19, %v2418_v25  ;;  %v2387_v54 = vmul.f32 0.02, %v2339_v52 }
 0x4a9   :  { %v2579_v49 = vmul.f32 %v4500_v24, %v6220_v63  ;;  %v2330_v31 = vpop.xlane.xlu1 %2329  ;;  %v2770_v60 = vpack.c.bf16 %v2737_v23, %v2736_v41  ;;  %v2610_v44 = vmul.f32 %v2578_v61, %v2542_v5 }
 0x4aa   :  { %v4502_v43 = vpop.eup %4501  ;;  %v2482_v9 = vadd.f32 1e-05, %v2450_v32  ;;  %v2451_v33 = vsub.f32 %v2387_v54, %v2419_v7  ;;  %v2384_v21 = vmul.f32 0.02, %v2330_v31  ;;  %v2546_v54 = vsub.f32 %v6109_v48, %v6356_v36 }
 0x4ab   :  { %v2576_v46 = vmul.f32 %v4502_v43, %v6220_v63  ;;  %4251 = vmatprep.mubr.msk.bf16.mxu0 %vm288_vm0, %v2770_v60  ;;  %v2333_v2 = vpop.xlane.xlu0 %2332  ;;  %v2611_v42 = vmul.f32 %v2579_v49, %v2543_v15  ;;  %v2646_v53 = vadd.f32 %v6230_v1, %v2610_v44  ;;  %v2544_v44 = vsub.f32 %v6113_v18, %v6364_v30 }
 0x4ac   :  { %v4504_v39 = vpop.eup %4503  ;;  %4505 = vrsqrt.f32 %v2482_v9  ;;  %v2483_v62 = vadd.f32 1e-05, %v2451_v33  ;;  %v2448_v47 = vsub.f32 %v2384_v21, %v2416_v56  ;;  %v2385_v28 = vmul.f32 0.02, %v2333_v2  ;;  %4252 = vmatmul.mubr.msk.bf16.gmra.mrb[44].mxu0 %vm288_vm0, %v2771_v16 }
 0x4ad   :  { %v2577_v40 = vmul.f32 %v4504_v39, %v6220_v63  ;;  %v2188_v59 = vpop.xlane.xlu1 %2187  ;;  %v2608_v51 = vmul.f32 %v2576_v46, %v2540_v17  ;;  %v2647_v37 = vadd.f32 %v6230_v1, %v2611_v42  ;;  %v2678_v57 = vmax.f32 %v2646_v53, 0.0 }
 0x4ae   :  { %4507 = vrsqrt.f32 %v2483_v62  ;;  %v2480_v5 = vadd.f32 1e-05, %v2448_v47  ;;  %v2449_v15 = vsub.f32 %v2385_v28, %v2417_v22  ;;  %v6390_v52 = vmul.f32 0.02, %v2188_v59 }
 0x4af   :  { %v2191_v58 = vpop.xlane.xlu0 %2190  ;;  %v2609_v35 = vmul.f32 %v2577_v40, %v2541_v27  ;;  %v2644_v10 = vadd.f32 %v6230_v1, %v2608_v51  ;;  %v2679_v25 = vmax.f32 %v2647_v37, 0.0  ;;  %v2710_v32 = vmul.f32 %v2678_v57, %v2678_v57 }
 0x4b0   :  { %4509 = vrsqrt.f32 %v2480_v5  ;;  %v2481_v19 = vadd.f32 1e-05, %v2449_v15  ;;  %v6392_v7 = vmul.f32 0.02, %v2191_v58  ;;  %v2422_v43 = vmul.f32 %v6390_v52, %v6390_v52 }
 0x4b1   :  { %v2182_v61 = vpop.xlane.xlu1 %2181  ;;  %v2645_v50 = vadd.f32 %v6230_v1, %v2609_v35  ;;  %v2676_v55 = vmax.f32 %v2644_v10, 0.0  ;;  %v2711_v17 = vmul.f32 %v2679_v25, %v2679_v25  ;;  %v2742_v42 = vmul.f32 %v2710_v32, %v2678_v57 }
 0x4b2   :  { %4511 = vrsqrt.f32 %v2481_v19  ;;  %v6398_v49 = vmul.f32 0.02, %v2182_v61  ;;  %v2423_v46 = vmul.f32 %v6392_v7, %v6392_v7  ;;  %v2545_v57 = vsub.f32 %v6121_v0, %v6371_v8 }
 0x4b3   :  { %v2185_v41 = vpop.xlane.xlu0 %2184  ;;  %v2677_v23 = vmax.f32 %v2645_v50, 0.0  ;;  %v2708_v24 = vmul.f32 %v2676_v55, %v2676_v55  ;;  %v2743_v33 = vmul.f32 %v2711_v17, %v2679_v25 }
 0x4b4   :  { %v6405_v16 = vmul.f32 0.02, %v2185_v41  ;;  %v2420_v30 = vmul.f32 %v6398_v49, %v6398_v49 }
 0x4b5   :  { %v2348_v56 = vpop.xlane.xlu1 %2347  ;;  %v2709_v31 = vmul.f32 %v2677_v23, %v2677_v23  ;;  %v2740_v36 = vmul.f32 %v2708_v24, %v2676_v55  ;;  %v2773_v59 = vpack.c.bf16 %v2743_v33, %v2742_v42 }
 0x4b6   :  { %v4506_v60 = vpop.eup %4505  ;;  %v2390_v9 = vmul.f32 0.02, %v2348_v56  ;;  %v2421_v37 = vmul.f32 %v6405_v16, %v6405_v16 }
 0x4b7   :  { %v2582_v21 = vmul.f32 %v4506_v60, %v6220_v63  ;;  %v2351_v48 = vpop.xlane.xlu0 %2350  ;;  %v2741_v29 = vmul.f32 %v2709_v31, %v2677_v23 }
 0x4b8   :  { %v4508_v38 = vpop.eup %4507  ;;  %v2454_v22 = vsub.f32 %v2390_v9, %v2422_v43  ;;  %v2391_v2 = vmul.f32 0.02, %v2351_v48 }
 0x4b9   :  { %v2583_v18 = vmul.f32 %v4508_v38, %v6220_v63  ;;  %v2342_v53 = vpop.xlane.xlu1 %2341  ;;  %v2772_v39 = vpack.c.bf16 %v2741_v29, %v2740_v36  ;;  %v2614_v62 = vmul.f32 %v2582_v21, %v2546_v54  ;;  %v2550_v29 = vsub.f32 %v6141_v20, %v6390_v52 }
 0x4ba   :  { %v4510_v47 = vpop.eup %4509  ;;  %v2486_v28 = vadd.f32 1e-05, %v2454_v22  ;;  %v2455_v27 = vsub.f32 %v2391_v2, %v2423_v46  ;;  %v2388_v40 = vmul.f32 0.02, %v2342_v53  ;;  %v2551_v38 = vsub.f32 %v6148_v3, %v6392_v7 }
 0x4bb   :  { %v2580_v51 = vmul.f32 %v4510_v47, %v6220_v63  ;;  %4255 = vmatprep.mubr.msk.bf16.mxu0 %vm288_vm0, %v2772_v39  ;;  %v2345_v5 = vpop.xlane.xlu0 %2344  ;;  %v2615_v15 = vmul.f32 %v2583_v18, %v2547_v4  ;;  %v2650_v58 = vadd.f32 %v6230_v1, %v2614_v62  ;;  %v2548_v18 = vsub.f32 %v6145_v12, %v6398_v49 }
 0x4bc   :  { %v4512_v35 = vpop.eup %4511  ;;  %4513 = vrsqrt.f32 %v2486_v28  ;;  %v2487_v10 = vadd.f32 1e-05, %v2455_v27  ;;  %v2452_v25 = vsub.f32 %v2388_v40, %v2420_v30  ;;  %v2389_v19 = vmul.f32 0.02, %v2345_v5  ;;  %4256 = vmatmul.mubr.msk.bf16.gmra.mrb[48].mxu0 %vm288_vm0, %v2773_v59 }
 0x4bd   :  { %v2581_v61 = vmul.f32 %v4512_v35, %v6220_v63  ;;  %v2200_v50 = vpop.xlane.xlu1 %2199  ;;  %v2612_v55 = vmul.f32 %v2580_v51, %v2544_v44  ;;  %v2651_v17 = vadd.f32 %v6230_v1, %v2615_v15  ;;  %v2682_v31 = vmax.f32 %v2650_v58, 0.0 }
 0x4be   :  { %4515 = vrsqrt.f32 %v2487_v10  ;;  %v2484_v41 = vadd.f32 1e-05, %v2452_v25  ;;  %v2453_v23 = vsub.f32 %v2389_v19, %v2421_v37  ;;  %v6432_v46 = vmul.f32 0.02, %v2200_v50 }
 0x4bf   :  { %v2203_v24 = vpop.xlane.xlu0 %2202  ;;  %v2613_v32 = vmul.f32 %v2581_v61, %v2545_v57  ;;  %v2648_v54 = vadd.f32 %v6230_v1, %v2612_v55  ;;  %v2683_v4 = vmax.f32 %v2651_v17, 0.0  ;;  %v2714_v36 = vmul.f32 %v2682_v31, %v2682_v31 }
 0x4c0   :  { %4517 = vrsqrt.f32 %v2484_v41  ;;  %v2485_v56 = vadd.f32 1e-05, %v2453_v23  ;;  %v6439_v47 = vmul.f32 0.02, %v2203_v24  ;;  %v2426_v49 = vmul.f32 %v6432_v46, %v6432_v46 }
 0x4c1   :  { %v2194_v60 = vpop.xlane.xlu1 %2193  ;;  %v2649_v0 = vadd.f32 %v6230_v1, %v2613_v32  ;;  %v2680_v8 = vmax.f32 %v2648_v54, 0.0  ;;  %v2715_v44 = vmul.f32 %v2683_v4, %v2683_v4  ;;  %v2746_v59 = vmul.f32 %v2714_v36, %v2682_v31 }
 0x4c2   :  { %4519 = vrsqrt.f32 %v2485_v56  ;;  %v6424_v43 = vmul.f32 0.02, %v2194_v60  ;;  %v2427_v57 = vmul.f32 %v6439_v47, %v6439_v47  ;;  %v2549_v32 = vsub.f32 %v6153_v34, %v6405_v16 }
 0x4c3   :  { %v2197_v9 = vpop.xlane.xlu0 %2196  ;;  %v2681_v33 = vmax.f32 %v2649_v0, 0.0  ;;  %v2712_v21 = vmul.f32 %v2680_v8, %v2680_v8  ;;  %v2747_v39 = vmul.f32 %v2715_v44, %v2683_v4 }
 0x4c4   :  { %v6426_v48 = vmul.f32 0.02, %v2197_v9  ;;  %v2424_v30 = vmul.f32 %v6424_v43, %v6424_v43 }
 0x4c5   :  { %v2354_v22 = vpop.xlane.xlu1 %2353  ;;  %v2713_v2 = vmul.f32 %v2681_v33, %v2681_v33  ;;  %v2744_v52 = vmul.f32 %v2712_v21, %v2680_v8  ;;  %v2775_v25 = vpack.c.bf16 %v2747_v39, %v2746_v59  ;;  %v2554_v59 = vsub.f32 %v6173_v13, %v6432_v46 }
 0x4c6   :  { %v4514_v42 = vpop.eup %4513  ;;  %v2392_v53 = vmul.f32 0.02, %v2354_v22  ;;  %v2425_v28 = vmul.f32 %v6426_v48, %v6426_v48 }
 0x4c7   :  { %v2586_v62 = vmul.f32 %v4514_v42, %v6220_v63  ;;  %v2357_v20 = vpop.xlane.xlu0 %2356  ;;  %v2745_v3 = vmul.f32 %v2713_v2, %v2681_v33 }
 0x4c8   :  { %v4516_v7 = vpop.eup %4515  ;;  %v2456_v27 = vsub.f32 %v2392_v53, %v2424_v30  ;;  %v2393_v40 = vmul.f32 0.02, %v2357_v20 }
 0x4c9   :  { %v2587_v12 = vmul.f32 %v4516_v7, %v6220_v63  ;;  %v2360_v51 = vpop.xlane.xlu1 %2359  ;;  %v2774_v37 = vpack.c.bf16 %v2745_v3, %v2744_v52  ;;  %v2618_v5 = vmul.f32 %v2586_v62, %v2550_v29  ;;  %v2553_v52 = vsub.f32 %v6187_v11, %v6426_v48 }
 0x4ca   :  { %v4518_v15 = vpop.eup %4517  ;;  %v2488_v58 = vadd.f32 1e-05, %v2456_v27  ;;  %v2457_v35 = vsub.f32 %v2393_v40, %v2425_v28  ;;  %v2394_v10 = vmul.f32 0.02, %v2360_v51  ;;  %v2555_v11 = vsub.f32 %v6177_v26, %v6439_v47 }
 0x4cb   :  { %v2584_v19 = vmul.f32 %v4518_v15, %v6220_v63  ;;  %4259 = vmatprep.mubr.msk.bf16.mxu0 %vm288_vm0, %v2774_v37  ;;  %v2363_v61 = vpop.xlane.xlu0 %2362  ;;  %v2619_v50 = vmul.f32 %v2587_v12, %v2551_v38  ;;  %v2654_v55 = vadd.f32 %v6230_v1, %v2618_v5 }
 0x4cc   :  { %v4520_v17 = vpop.eup %4519  ;;  %4521 = vrsqrt.f32 %v2488_v58  ;;  %v2489_v41 = vadd.f32 1e-05, %v2457_v35  ;;  %v2458_v23 = vsub.f32 %v2394_v10, %v2426_v49  ;;  %v2395_v24 = vmul.f32 0.02, %v2363_v61  ;;  %4260 = vmatmul.mubr.msk.bf16.gmra.mrb[52].mxu0 %vm288_vm0, %v2775_v25 }
 0x4cd   :  { %v2585_v54 = vmul.f32 %v4520_v17, %v6220_v63  ;;  %v2616_v4 = vmul.f32 %v2584_v19, %v2548_v18  ;;  %v2655_v56 = vadd.f32 %v6230_v1, %v2619_v50  ;;  %v2686_v33 = vmax.f32 %v2654_v55, 0.0 }
 0x4ce   :  { %4523 = vrsqrt.f32 %v2489_v41  ;;  %v2490_v31 = vadd.f32 1e-05, %v2458_v23  ;;  %v2459_v60 = vsub.f32 %v2395_v24, %v2427_v57  ;;  %v2552_v18 = vsub.f32 %v6182_v14, %v6424_v43  ;;  %v6481_v41 = vld [vmem:[%s7080_s1 + $0x8] sm:$0x1f] }
 0x4cf   :  { %v2617_v0 = vmul.f32 %v2585_v54, %v2549_v32  ;;  %v2652_v8 = vadd.f32 %v6230_v1, %v2616_v4  ;;  %v2687_v44 = vmax.f32 %v2655_v56, 0.0  ;;  %v2718_v38 = vmul.f32 %v2686_v33, %v2686_v33 }
 0x4d0   :  { %4525 = vrsqrt.f32 %v2490_v31  ;;  %v2491_v9 = vadd.f32 1e-05, %v2459_v60 }
 0x4d1   :  { %v2653_v21 = vadd.f32 %v6230_v1, %v2617_v0  ;;  %v2684_v36 = vmax.f32 %v2652_v8, 0.0  ;;  %v2719_v34 = vmul.f32 %v2687_v44, %v2687_v44  ;;  %v2750_v20 = vmul.f32 %v2718_v38, %v2686_v33 }
 0x4d2   :  { %4527 = vrsqrt.f32 %v2491_v9 }
 0x4d3   :  { %v2685_v16 = vmax.f32 %v2653_v21, 0.0  ;;  %v2716_v29 = vmul.f32 %v2684_v36, %v2684_v36  ;;  %v2751_v42 = vmul.f32 %v2719_v34, %v2687_v44 }
 0x4d5   :  { %v2717_v22 = vmul.f32 %v2685_v16, %v2685_v16  ;;  %v2748_v53 = vmul.f32 %v2716_v29, %v2684_v36  ;;  %v2777_v40 = vpack.c.bf16 %v2751_v42, %v2750_v20 }
 0x4d6   :  { %v4522_v2 = vpop.eup %4521 }
 0x4d7   :  { %v2588_v30 = vmul.f32 %v4522_v2, %v6220_v63  ;;  %v2749_v39 = vmul.f32 %v2717_v22, %v2685_v16 }
 0x4d8   :  { %v4524_v62 = vpop.eup %4523 }
 0x4d9   :  { %v2589_v3 = vmul.f32 %v4524_v62, %v6220_v63  ;;  %v2776_v7 = vpack.c.bf16 %v2749_v39, %v2748_v53  ;;  %v2620_v28 = vmul.f32 %v2588_v30, %v2552_v18 }
 0x4da   :  { %v4526_v27 = vpop.eup %4525 }
 0x4db   :  { %v2590_v14 = vmul.f32 %v4526_v27, %v6220_v63  ;;  %4263 = vmatprep.mubr.msk.bf16.mxu0 %vm288_vm0, %v2776_v7  ;;  %v2621_v43 = vmul.f32 %v2589_v3, %v2553_v52  ;;  %v2656_v12 = vadd.f32 %v6230_v1, %v2620_v28 }
 0x4dc   :  { %v4528_v49 = vpop.eup %4527  ;;  %4264 = vmatmul.mubr.msk.bf16.gmra.mrb[56].mxu0 %vm288_vm0, %v2777_v40 }
 0x4dd   :  { %v2591_v48 = vmul.f32 %v4528_v49, %v6220_v63  ;;  %v2657_v51 = vadd.f32 %v6230_v1, %v2621_v43  ;;  %v2688_v37 = vmax.f32 %v2656_v12, 0.0  ;;  %v2622_v5 = vmul.f32 %v2590_v14, %v2554_v59 }
 0x4df   :  { %v2689_v13 = vmax.f32 %v2657_v51, 0.0  ;;  %v2720_v46 = vmul.f32 %v2688_v37, %v2688_v37  ;;  %v2623_v15 = vmul.f32 %v2591_v48, %v2555_v11  ;;  %v2658_v58 = vadd.f32 %v6230_v1, %v2622_v5 }
 0x4e1   :  { %v2721_v35 = vmul.f32 %v2689_v13, %v2689_v13  ;;  %v2659_v10 = vadd.f32 %v6230_v1, %v2623_v15  ;;  %v2690_v25 = vmax.f32 %v2658_v58, 0.0  ;;  %v2752_v19 = vmul.f32 %v2720_v46, %v2688_v37 }
 0x4e2   :  { %v7116_v1 = vsub.s32 2, %v7113_v6 }
 0x4e3   :  { %v2753_v57 = vmul.f32 %v2721_v35, %v2689_v13  ;;  %v2691_v26 = vmax.f32 %v2659_v10, 0.0  ;;  %v2722_v47 = vmul.f32 %v2690_v25, %v2690_v25 }
 0x4e4   :  { %v6486_v23 = vrot.slane %v6481_v41, %v7116_v1 }
 0x4e5   :  { %v2778_v61 = vpack.c.bf16 %v2753_v57, %v2752_v19  ;;  %v2723_v50 = vmul.f32 %v2691_v26, %v2691_v26  ;;  %v2754_v63 = vmul.f32 %v2722_v47, %v2690_v25 }
 0x4e7   :  { %4267 = vmatprep.mubr.msk.bf16.mxu0 %vm288_vm0, %v2778_v61  ;;  %v2755_v55 = vmul.f32 %v2723_v50, %v2691_v26 }
 0x4e9   :  { %v2779_v17 = vpack.c.bf16 %v2755_v55, %v2754_v63 }
 0x4eb   :  { %4268 = vmatmul.mubr.msk.bf16.gmra.mrb[60].mxu0 %vm288_vm0, %v2779_v17 }
 0x54f   :  { %v4241_v24 = vpop.f32.mrb[32].mxu0 }
 0x550   :  { %v6489_v32 = vadd.f32 %v4241_v24, %v6486_v23  ;;  %v2890_v54 = vpop.f32.mrb[33].mxu0 }
 0x551   :  { %v4242_v4 = vpop.f32.mrb[34].mxu0  ;;  %v6492_v56 = vadd.f32 %v2890_v54, %v6486_v23 }
 0x552   :  { %v6495_v31 = vadd.f32 %v4242_v4, %v6486_v23  ;;  %v2893_v60 = vpop.f32.mrb[35].mxu0  ;;  %v3023_v0 = vsel %vm288_vm0, %v6489_v32, 0.0  ;;  %v3147_v33 = vmul.f32 %v6489_v32, %v6489_v32 }
 0x553   :  { %3024 = vadd.xlane.f32.xlu1 %v3023_v0  ;;  %v6500_v8 = vadd.f32 %v2893_v60, %v6486_v23  ;;  %v3017_v9 = vsel %vm288_vm0, %v6492_v56, 0.0  ;;  %v3145_v16 = vmul.f32 %v6492_v56, %v6492_v56 }
 0x554   :  { %v3026_v44 = vsel %vm288_vm0, %v6495_v31, 0.0  ;;  %v3148_v36 = vmul.f32 %v6495_v31, %v6495_v31  ;;  %v3183_v34 = vsel %vm288_vm0, %v3147_v33, 0.0 }
 0x555   :  { %3027 = vadd.xlane.f32.xlu0 %v3026_v44  ;;  %v3020_v21 = vsel %vm288_vm0, %v6500_v8, 0.0  ;;  %v3146_v38 = vmul.f32 %v6500_v8, %v6500_v8  ;;  %v3177_v22 = vsel %vm288_vm0, %v3145_v16, 0.0 }
 0x556   :  { %v3186_v29 = vsel %vm288_vm0, %v3148_v36, 0.0 }
 0x557   :  { %3018 = vadd.xlane.f32.xlu1 %v3017_v9  ;;  %v3180_v30 = vsel %vm288_vm0, %v3146_v38, 0.0 }
 0x559   :  { %3021 = vadd.xlane.f32.xlu0 %v3020_v21 }
 0x55b   :  { %3184 = vadd.xlane.f32.xlu1 %v3183_v34  ;;  %v4333_v34 = vld [vmem:[%s7082_s3] sm:$0xff]  }
 0x55c   :  { %4271 = vmatprep.subr.bf16.mxu1 %v4333_v34 }
 0x55d   :  { %3187 = vadd.xlane.f32.xlu0 %v3186_v29  ;;  %4272 = vmatpush3.bf16.msra.mxu1 %v4333_v34 }
 0x55f   :  { %3178 = vadd.xlane.f32.xlu1 %v3177_v22  ;;  %v4245_v2 = vpop.f32.mrb[36].mxu0 }
 0x560   :  { %v6520_v42 = vadd.f32 %v4245_v2, %v6486_v23  ;;  %v2906_v18 = vpop.f32.mrb[37].mxu0  ;;  %v4334_v2 = vld [vmem:[%s7082_s3 + $0x8] sm:$0xff]  }
 0x561   :  { %3181 = vadd.xlane.f32.xlu0 %v3180_v30  ;;  %v4246_v53 = vpop.f32.mrb[38].mxu0  ;;  %v6524_v39 = vadd.f32 %v2906_v18, %v6486_v23  ;;  %4273 = vmatprep.subr.bf16.mxu1 %v4334_v2 }
 0x562   :  { %v6527_v62 = vadd.f32 %v4246_v53, %v6486_v23  ;;  %v2909_v20 = vpop.f32.mrb[39].mxu0  ;;  %v3035_v52 = vsel %vm288_vm0, %v6520_v42, 0.0  ;;  %v3151_v27 = vmul.f32 %v6520_v42, %v6520_v42  ;;  %4274 = vmatpush3.bf16.msra.mxu1 %v4334_v2 }
 0x563   :  { %3036 = vadd.xlane.f32.xlu1 %v3035_v52  ;;  %v6532_v3 = vadd.f32 %v2909_v20, %v6486_v23  ;;  %v3029_v28 = vsel %vm288_vm0, %v6524_v39, 0.0  ;;  %v3149_v43 = vmul.f32 %v6524_v39, %v6524_v39  ;;  %v4335_v52 = vld [vmem:[%s7082_s3 + $0x10] sm:$0xff]  }
 0x564   :  { %v3038_v7 = vsel %vm288_vm0, %v6527_v62, 0.0  ;;  %v3152_v59 = vmul.f32 %v6527_v62, %v6527_v62  ;;  %v3195_v14 = vsel %vm288_vm0, %v3151_v27, 0.0  ;;  %4275 = vmatprep.subr.bf16.mxu1 %v4335_v52 }
 0x565   :  { %3039 = vadd.xlane.f32.xlu0 %v3038_v7  ;;  %v3032_v40 = vsel %vm288_vm0, %v6532_v3, 0.0  ;;  %v3150_v49 = vmul.f32 %v6532_v3, %v6532_v3  ;;  %v3189_v11 = vsel %vm288_vm0, %v3149_v43, 0.0  ;;  %v4336_v43 = vld [vmem:[%s7082_s3 + $0x18] ss:$0 sps:$4 sm:$0x11]  }
 0x566   :  { %v3198_v12 = vsel %vm288_vm0, %v3152_v59, 0.0  ;;  %4276 = vmatpush3.bf16.msra.mxu1 %v4335_v52 }
 0x567   :  { %3030 = vadd.xlane.f32.xlu1 %v3029_v28  ;;  %v3192_v5 = vsel %vm288_vm0, %v3150_v49, 0.0  ;;  %4314 = vmatprep.subr.msk.bf16.mxu1 %vm1034_vm1, %v4336_v43 }
 0x569   :  { %3033 = vadd.xlane.f32.xlu0 %v3032_v40 }
 0x56b   :  { %3196 = vadd.xlane.f32.xlu1 %v3195_v14 }
 0x56d   :  { %3199 = vadd.xlane.f32.xlu0 %v3198_v12 }
 0x56f   :  { %3190 = vadd.xlane.f32.xlu1 %v3189_v11  ;;  %v4249_v48 = vpop.f32.mrb[40].mxu0 }
 0x570   :  { %v6552_v51 = vadd.f32 %v4249_v48, %v6486_v23  ;;  %v2922_v37 = vpop.f32.mrb[41].mxu0 }
 0x571   :  { %3193 = vadd.xlane.f32.xlu0 %v3192_v5  ;;  %v4250_v13 = vpop.f32.mrb[42].mxu0  ;;  %v6556_v46 = vadd.f32 %v2922_v37, %v6486_v23  ;;  %v3765_v37 = vsel %vm1034_vm1, %v4336_v43, 0 }
 0x572   :  { %v6559_v15 = vadd.f32 %v4250_v13, %v6486_v23  ;;  %v2925_v58 = vpop.f32.mrb[43].mxu0  ;;  %v3047_v35 = vsel %vm288_vm0, %v6552_v51, 0.0  ;;  %v3155_v57 = vmul.f32 %v6552_v51, %v6552_v51  ;;  %4278 = vmatpush3.bf16.msra.mxu1 %v3765_v37 }
 0x573   :  { %3048 = vadd.xlane.f32.xlu1 %v3047_v35  ;;  %v6564_v10 = vadd.f32 %v2925_v58, %v6486_v23  ;;  %v3041_v19 = vsel %vm288_vm0, %v6556_v46, 0.0  ;;  %v3153_v50 = vmul.f32 %v6556_v46, %v6556_v46 }
 0x574   :  { %v3050_v25 = vsel %vm288_vm0, %v6559_v15, 0.0  ;;  %v3156_v47 = vmul.f32 %v6559_v15, %v6559_v15  ;;  %v3207_v61 = vsel %vm288_vm0, %v3155_v57, 0.0 }
 0x575   :  { %3051 = vadd.xlane.f32.xlu0 %v3050_v25  ;;  %v3044_v26 = vsel %vm288_vm0, %v6564_v10, 0.0  ;;  %v3154_v55 = vmul.f32 %v6564_v10, %v6564_v10  ;;  %v3201_v17 = vsel %vm288_vm0, %v3153_v50, 0.0 }
 0x576   :  { %v3210_v63 = vsel %vm288_vm0, %v3156_v47, 0.0 }
 0x577   :  { %3042 = vadd.xlane.f32.xlu1 %v3041_v19  ;;  %v3204_v4 = vsel %vm288_vm0, %v3154_v55, 0.0 }
 0x579   :  { %3045 = vadd.xlane.f32.xlu0 %v3044_v26 }
 0x57b   :  { %3208 = vadd.xlane.f32.xlu1 %v3207_v61 }
 0x57d   :  { %3211 = vadd.xlane.f32.xlu0 %v3210_v63 }
 0x57f   :  { %3202 = vadd.xlane.f32.xlu1 %v3201_v17  ;;  %v4253_v1 = vpop.f32.mrb[44].mxu0 }
 0x580   :  { %v6584_v24 = vadd.f32 %v4253_v1, %v6486_v23  ;;  %v2938_v54 = vpop.f32.mrb[45].mxu0 }
 0x581   :  { %3205 = vadd.xlane.f32.xlu0 %v3204_v4  ;;  %v4254_v60 = vpop.f32.mrb[46].mxu0  ;;  %v6588_v0 = vadd.f32 %v2938_v54, %v6486_v23 }
 0x582   :  { %v6591_v44 = vadd.f32 %v4254_v60, %v6486_v23  ;;  %v2941_v9 = vpop.f32.mrb[47].mxu0  ;;  %v3059_v33 = vsel %vm288_vm0, %v6584_v24, 0.0  ;;  %v3159_v29 = vmul.f32 %v6584_v24, %v6584_v24 }
 0x583   :  { %3060 = vadd.xlane.f32.xlu1 %v3059_v33  ;;  %v6596_v21 = vadd.f32 %v2941_v9, %v6486_v23  ;;  %v3053_v16 = vsel %vm288_vm0, %v6588_v0, 0.0  ;;  %v3157_v30 = vmul.f32 %v6588_v0, %v6588_v0 }
 0x584   :  { %v3062_v36 = vsel %vm288_vm0, %v6591_v44, 0.0  ;;  %v3160_v22 = vmul.f32 %v6591_v44, %v6591_v44  ;;  %v3219_v18 = vsel %vm288_vm0, %v3159_v29, 0.0 }
 0x585   :  { %3063 = vadd.xlane.f32.xlu0 %v3062_v36  ;;  %v3056_v38 = vsel %vm288_vm0, %v6596_v21, 0.0  ;;  %v3158_v20 = vmul.f32 %v6596_v21, %v6596_v21  ;;  %v3213_v7 = vsel %vm288_vm0, %v3157_v30, 0.0 }
 0x586   :  { %v3222_v53 = vsel %vm288_vm0, %v3160_v22, 0.0 }
 0x587   :  { %3054 = vadd.xlane.f32.xlu1 %v3053_v16  ;;  %v3216_v59 = vsel %vm288_vm0, %v3158_v20, 0.0 }
 0x589   :  { %3057 = vadd.xlane.f32.xlu0 %v3056_v38 }
 0x58b   :  { %3220 = vadd.xlane.f32.xlu1 %v3219_v18 }
 0x58d   :  { %3223 = vadd.xlane.f32.xlu0 %v3222_v53 }
 0x58f   :  { %3214 = vadd.xlane.f32.xlu1 %v3213_v7  ;;  %v4257_v28 = vpop.f32.mrb[48].mxu0 }
 0x590   :  { %v6625_v27 = vadd.f32 %v4257_v28, %v6486_v23  ;;  %v2954_v40 = vpop.f32.mrb[49].mxu0 }
 0x591   :  { %3217 = vadd.xlane.f32.xlu0 %v3216_v59  ;;  %v4258_v14 = vpop.f32.mrb[50].mxu0  ;;  %v6632_v12 = vadd.f32 %v2954_v40, %v6486_v23 }
 0x592   :  { %v6635_v49 = vadd.f32 %v4258_v14, %v6486_v23  ;;  %v2957_v11 = vpop.f32.mrb[51].mxu0  ;;  %v3071_v48 = vsel %vm288_vm0, %v6625_v27, 0.0  ;;  %v3163_v35 = vmul.f32 %v6625_v27, %v6625_v27 }
 0x593   :  { %3072 = vadd.xlane.f32.xlu1 %v3071_v48  ;;  %v6642_v5 = vadd.f32 %v2957_v11, %v6486_v23  ;;  %v3065_v58 = vsel %vm288_vm0, %v6632_v12, 0.0  ;;  %v3161_v26 = vmul.f32 %v6632_v12, %v6632_v12 }
 0x594   :  { %v3074_v13 = vsel %vm288_vm0, %v6635_v49, 0.0  ;;  %v3164_v19 = vmul.f32 %v6635_v49, %v6635_v49  ;;  %v3231_v57 = vsel %vm288_vm0, %v3163_v35, 0.0 }
 0x595   :  { %3075 = vadd.xlane.f32.xlu0 %v3074_v13  ;;  %v3068_v25 = vsel %vm288_vm0, %v6642_v5, 0.0  ;;  %v3162_v61 = vmul.f32 %v6642_v5, %v6642_v5  ;;  %v3225_v50 = vsel %vm288_vm0, %v3161_v26, 0.0 }
 0x596   :  { %v3234_v47 = vsel %vm288_vm0, %v3164_v19, 0.0 }
 0x597   :  { %3066 = vadd.xlane.f32.xlu1 %v3065_v58  ;;  %v3228_v1 = vsel %vm288_vm0, %v3162_v61, 0.0 }
 0x599   :  { %3069 = vadd.xlane.f32.xlu0 %v3068_v25 }
 0x59b   :  { %3232 = vadd.xlane.f32.xlu1 %v3231_v57 }
 0x59d   :  { %3235 = vadd.xlane.f32.xlu0 %v3234_v47 }
 0x59f   :  { %3226 = vadd.xlane.f32.xlu1 %v3225_v50  ;;  %v4261_v63 = vpop.f32.mrb[52].mxu0 }
 0x5a0   :  { %v6662_v55 = vadd.f32 %v4261_v63, %v6486_v23  ;;  %v2970_v17 = vpop.f32.mrb[53].mxu0 }
 0x5a1   :  { %3229 = vadd.xlane.f32.xlu0 %v3228_v1  ;;  %v4262_v54 = vpop.f32.mrb[54].mxu0  ;;  %v6666_v4 = vadd.f32 %v2970_v17, %v6486_v23 }
 0x5a2   :  { %v6669_v60 = vadd.f32 %v4262_v54, %v6486_v23  ;;  %v2973_v9 = vpop.f32.mrb[55].mxu0  ;;  %v3083_v33 = vsel %vm288_vm0, %v6662_v55, 0.0  ;;  %v3167_v29 = vmul.f32 %v6662_v55, %v6662_v55 }
 0x5a3   :  { %3084 = vadd.xlane.f32.xlu1 %v3083_v33  ;;  %v6674_v36 = vadd.f32 %v2973_v9, %v6486_v23  ;;  %v3077_v16 = vsel %vm288_vm0, %v6666_v4, 0.0  ;;  %v3165_v18 = vmul.f32 %v6666_v4, %v6666_v4 }
 0x5a4   :  { %v3086_v34 = vsel %vm288_vm0, %v6669_v60, 0.0  ;;  %v3168_v22 = vmul.f32 %v6669_v60, %v6669_v60  ;;  %v3243_v2 = vsel %vm288_vm0, %v3167_v29, 0.0 }
 0x5a5   :  { %3087 = vadd.xlane.f32.xlu0 %v3086_v34  ;;  %v3080_v38 = vsel %vm288_vm0, %v6674_v36, 0.0  ;;  %v3166_v53 = vmul.f32 %v6674_v36, %v6674_v36  ;;  %v3237_v20 = vsel %vm288_vm0, %v3165_v18, 0.0 }
 0x5a6   :  { %v3246_v30 = vsel %vm288_vm0, %v3168_v22, 0.0 }
 0x5a7   :  { %3078 = vadd.xlane.f32.xlu1 %v3077_v16  ;;  %v3240_v40 = vsel %vm288_vm0, %v3166_v53, 0.0 }
 0x5a9   :  { %3081 = vadd.xlane.f32.xlu0 %v3080_v38 }
 0x5ab   :  { %3244 = vadd.xlane.f32.xlu1 %v3243_v2 }
 0x5ad   :  { %3247 = vadd.xlane.f32.xlu0 %v3246_v30 }
 0x5af   :  { %3238 = vadd.xlane.f32.xlu1 %v3237_v20  ;;  %v4265_v52 = vpop.f32.mrb[56].mxu0 }
 0x5b0   :  { %v6694_v7 = vadd.f32 %v4265_v52, %v6486_v23  ;;  %v2986_v28 = vpop.f32.mrb[57].mxu0 }
 0x5b1   :  { %3241 = vadd.xlane.f32.xlu0 %v3240_v40  ;;  %v4266_v59 = vpop.f32.mrb[58].mxu0  ;;  %v6698_v14 = vadd.f32 %v2986_v28, %v6486_v23 }
 0x5b2   :  { %v6701_v43 = vadd.f32 %v4266_v59, %v6486_v23  ;;  %v2989_v11 = vpop.f32.mrb[59].mxu0  ;;  %v3095_v48 = vsel %vm288_vm0, %v6694_v7, 0.0  ;;  %v3171_v35 = vmul.f32 %v6694_v7, %v6694_v7 }
 0x5b3   :  { %3096 = vadd.xlane.f32.xlu1 %v3095_v48  ;;  %v6706_v37 = vadd.f32 %v2989_v11, %v6486_v23  ;;  %v3089_v58 = vsel %vm288_vm0, %v6698_v14, 0.0  ;;  %v3169_v26 = vmul.f32 %v6698_v14, %v6698_v14 }
 0x5b4   :  { %v3098_v13 = vsel %vm288_vm0, %v6701_v43, 0.0  ;;  %v3172_v19 = vmul.f32 %v6701_v43, %v6701_v43  ;;  %v3255_v57 = vsel %vm288_vm0, %v3171_v35, 0.0 }
 0x5b5   :  { %3099 = vadd.xlane.f32.xlu0 %v3098_v13  ;;  %v3092_v25 = vsel %vm288_vm0, %v6706_v37, 0.0  ;;  %v3170_v61 = vmul.f32 %v6706_v37, %v6706_v37  ;;  %v3249_v63 = vsel %vm288_vm0, %v3169_v26, 0.0 }
 0x5b6   :  { %v3258_v47 = vsel %vm288_vm0, %v3172_v19, 0.0 }
 0x5b7   :  { %3090 = vadd.xlane.f32.xlu1 %v3089_v58  ;;  %v3252_v9 = vsel %vm288_vm0, %v3170_v61, 0.0 }
 0x5b9   :  { %3093 = vadd.xlane.f32.xlu0 %v3092_v25 }
 0x5bb   :  { %3256 = vadd.xlane.f32.xlu1 %v3255_v57 }
 0x5bd   :  { %3259 = vadd.xlane.f32.xlu0 %v3258_v47 }
 0x5be   :  { %v4269_v50 = vpop.f32.mrb[60].mxu0 }
 0x5bf   :  { %v6726_v17 = vadd.f32 %v4269_v50, %v6486_v23  ;;  %3250 = vadd.xlane.f32.xlu1 %v3249_v63  ;;  %v3002_v1 = vpop.f32.mrb[61].mxu0 }
 0x5c0   :  { %v4270_v54 = vpop.f32.mrb[62].mxu0  ;;  %v6735_v29 = vadd.f32 %v3002_v1, %v6486_v23 }
 0x5c1   :  { %v6730_v33 = vadd.f32 %v4270_v54, %v6486_v23  ;;  %3253 = vadd.xlane.f32.xlu0 %v3252_v9  ;;  %v3005_v34 = vpop.f32.mrb[63].mxu0  ;;  %v3107_v16 = vsel %vm288_vm0, %v6726_v17, 0.0 }
 0x5c2   :  { %v6740_v22 = vadd.f32 %v3005_v34, %v6486_v23  ;;  %v3101_v2 = vsel %vm288_vm0, %v6735_v29, 0.0  ;;  %v3173_v18 = vmul.f32 %v6735_v29, %v6735_v29  ;;  %v3175_v23 = vmul.f32 %v6726_v17, %v6726_v17 }
 0x5c3   :  { %3108 = vadd.xlane.f32.xlu1 %v3107_v16  ;;  %v3110_v38 = vsel %vm288_vm0, %v6730_v33, 0.0  ;;  %v3176_v28 = vmul.f32 %v6730_v33, %v6730_v33 }
 0x5c4   :  { %v3104_v30 = vsel %vm288_vm0, %v6740_v22, 0.0  ;;  %v3174_v53 = vmul.f32 %v6740_v22, %v6740_v22  ;;  %v3261_v20 = vsel %vm288_vm0, %v3173_v18, 0.0  ;;  %v3267_v40 = vsel %vm288_vm0, %v3175_v23, 0.0 }
 0x5c5   :  { %3111 = vadd.xlane.f32.xlu0 %v3110_v38  ;;  %v3270_v59 = vsel %vm288_vm0, %v3176_v28, 0.0 }
 0x5c6   :  { %v3264_v52 = vsel %vm288_vm0, %v3174_v53, 0.0 }
 0x5c7   :  { %3102 = vadd.xlane.f32.xlu1 %v3101_v2 }
 0x5c9   :  { %3105 = vadd.xlane.f32.xlu0 %v3104_v30 }
 0x5cb   :  { %3262 = vadd.xlane.f32.xlu1 %v3261_v20 }
 0x5cd   :  { %3265 = vadd.xlane.f32.xlu0 %v3264_v52 }
 0x5cf   :  { %3268 = vadd.xlane.f32.xlu1 %v3267_v40 }
 0x5d1   :  { %3271 = vadd.xlane.f32.xlu0 %v3270_v59 }
 0x5e0   :  { %v3025_v11 = vpop.xlane.xlu1 %3024 }
 0x5e1   :  { %v3115_v58 = vmul.f32 0.02, %v3025_v11 }
 0x5e2   :  { %v3028_v48 = vpop.xlane.xlu0 %3027 }
 0x5e3   :  { %v3116_v25 = vmul.f32 0.02, %v3028_v48  ;;  %v3307_v57 = vmul.f32 %v3115_v58, %v3115_v58 }
 0x5e4   :  { %v3019_v13 = vpop.xlane.xlu1 %3018 }
 0x5e5   :  { %v6758_v26 = vmul.f32 0.02, %v3019_v13  ;;  %v3308_v63 = vmul.f32 %v3116_v25, %v3116_v25 }
 0x5e6   :  { %v3022_v35 = vpop.xlane.xlu0 %3021 }
 0x5e7   :  { %v6760_v61 = vmul.f32 0.02, %v3022_v35  ;;  %v3305_v34 = vmul.f32 %v6758_v26, %v6758_v26  ;;  %v7117_v35 = vsub.s32 3, %v7113_v6  ;;  %v3433_v6 = vsub.f32 %v6492_v56, %v6758_v26 }
 0x5e8   :  { %v3185_v19 = vpop.xlane.xlu1 %3184 }
 0x5e9   :  { %v3275_v47 = vmul.f32 0.02, %v3185_v19  ;;  %v3306_v18 = vmul.f32 %v6760_v61, %v6760_v61  ;;  %v6771_v19 = vrot.slane %v6481_v41, %v7117_v35 }
 0x5ea   :  { %v3188_v50 = vpop.xlane.xlu0 %3187 }
 0x5eb   :  { %v3339_v1 = vsub.f32 %v3275_v47, %v3307_v57  ;;  %v3276_v54 = vmul.f32 0.02, %v3188_v50 }
 0x5ec   :  { %v3179_v9 = vpop.xlane.xlu1 %3178 }
 0x5ed   :  { %v3371_v16 = vadd.f32 1e-05, %v3339_v1  ;;  %v3340_v38 = vsub.f32 %v3276_v54, %v3308_v63  ;;  %v3273_v2 = vmul.f32 0.02, %v3179_v9 }
 0x5ee   :  { %v3182_v30 = vpop.xlane.xlu0 %3181 }
 0x5ef   :  { %4529 = vrsqrt.f32 %v3371_v16  ;;  %v3372_v53 = vadd.f32 1e-05, %v3340_v38  ;;  %v3337_v20 = vsub.f32 %v3273_v2, %v3305_v34  ;;  %v3274_v23 = vmul.f32 0.02, %v3182_v30 }
 0x5f0   :  { %v3037_v52 = vpop.xlane.xlu1 %3036  ;;  %v6782_v34 = vrot.slane %v6481_v41, %v963_v45  ;;  %v3435_v16 = vsub.f32 %v6489_v32, %v3115_v58 }
 0x5f1   :  { %4531 = vrsqrt.f32 %v3372_v53  ;;  %v3369_v28 = vadd.f32 1e-05, %v3337_v20  ;;  %v3338_v40 = vsub.f32 %v3274_v23, %v3306_v18  ;;  %v6766_v13 = vmul.f32 0.02, %v3037_v52 }
 0x5f2   :  { %v3040_v59 = vpop.xlane.xlu0 %3039  ;;  %v3436_v52 = vsub.f32 %v6495_v31, %v3116_v25 }
 0x5f3   :  { %4533 = vrsqrt.f32 %v3369_v28  ;;  %v3370_v11 = vadd.f32 1e-05, %v3338_v40  ;;  %v6773_v47 = vmul.f32 0.02, %v3040_v59  ;;  %v3311_v1 = vmul.f32 %v6766_v13, %v6766_v13 }
 0x5f4   :  { %v3031_v48 = vpop.xlane.xlu1 %3030 }
 0x5f5   :  { %4535 = vrsqrt.f32 %v3370_v11  ;;  %v6777_v54 = vmul.f32 0.02, %v3031_v48  ;;  %v3312_v53 = vmul.f32 %v6773_v47, %v6773_v47 }
 0x5f6   :  { %v3034_v57 = vpop.xlane.xlu0 %3033 }
 0x5f7   :  { %v6786_v2 = vmul.f32 0.02, %v3034_v57  ;;  %v3309_v28 = vmul.f32 %v6777_v54, %v6777_v54 }
 0x5f8   :  { %v3197_v50 = vpop.xlane.xlu1 %3196 }
 0x5f9   :  { %v4530_v63 = vpop.eup %4529  ;;  %v3279_v9 = vmul.f32 0.02, %v3197_v50  ;;  %v3310_v31 = vmul.f32 %v6786_v2, %v6786_v2 }
 0x5fa   :  { %v3471_v38 = vmul.f32 %v4530_v63, %v6771_v19  ;;  %v3200_v18 = vpop.xlane.xlu0 %3199 }
 0x5fb   :  { %v4532_v30 = vpop.eup %4531  ;;  %v3343_v20 = vsub.f32 %v3279_v9, %v3311_v1  ;;  %v3280_v23 = vmul.f32 0.02, %v3200_v18  ;;  %v3434_v1 = vsub.f32 %v6500_v8, %v6760_v61 }
 0x5fc   :  { %v3503_v45 = vmul.f32 %v3471_v38, %v3435_v16  ;;  %v3472_v41 = vmul.f32 %v4532_v30, %v6771_v19  ;;  %v3191_v32 = vpop.xlane.xlu1 %3190 }
 0x5fd   :  { %v4534_v58 = vpop.eup %4533  ;;  %v3375_v40 = vadd.f32 1e-05, %v3343_v20  ;;  %v3344_v59 = vsub.f32 %v3280_v23, %v3312_v53  ;;  %v3277_v11 = vmul.f32 0.02, %v3191_v32 }
 0x5fe   :  { %v3539_v48 = vadd.f32 %v6782_v34, %v3503_v45  ;;  %v3504_v35 = vmul.f32 %v3472_v41, %v3436_v52  ;;  %v3469_v57 = vmul.f32 %v4534_v58, %v6771_v19  ;;  %v3194_v56 = vpop.xlane.xlu0 %3193 }
 0x5ff   :  { %v4536_v25 = vpop.eup %4535  ;;  %4537 = vrsqrt.f32 %v3375_v40  ;;  %v3376_v26 = vadd.f32 1e-05, %v3344_v59  ;;  %v3341_v50 = vsub.f32 %v3277_v11, %v3309_v28  ;;  %v3278_v63 = vmul.f32 0.02, %v3194_v56 }
 0x600   :  { %v3540_v9 = vadd.f32 %v6782_v34, %v3504_v35  ;;  %v3470_v16 = vmul.f32 %v4536_v25, %v6771_v19  ;;  %v3049_v38 = vpop.xlane.xlu1 %3048  ;;  %v3501_v18 = vmul.f32 %v3469_v57, %v3433_v6  ;;  %v3571_v41 = vmax.f32 %v3539_v48, 0.0 }
 0x601   :  { %4539 = vrsqrt.f32 %v3376_v26  ;;  %v3373_v30 = vadd.f32 1e-05, %v3341_v50  ;;  %v3342_v53 = vsub.f32 %v3278_v63, %v3310_v31  ;;  %v6806_v40 = vmul.f32 0.02, %v3049_v38 }
 0x602   :  { %v3572_v20 = vmax.f32 %v3540_v9, 0.0  ;;  %v3052_v23 = vpop.xlane.xlu0 %3051  ;;  %v3502_v52 = vmul.f32 %v3470_v16, %v3434_v1  ;;  %v3537_v45 = vadd.f32 %v6782_v34, %v3501_v18  ;;  %v3603_v35 = vmul.f32 %v3571_v41, %v3571_v41 }
 0x603   :  { %4541 = vrsqrt.f32 %v3373_v30  ;;  %v3374_v32 = vadd.f32 1e-05, %v3342_v53  ;;  %v6808_v57 = vmul.f32 0.02, %v3052_v23  ;;  %v3439_v31 = vsub.f32 %v6520_v42, %v6766_v13 }
 0x604   :  { %v3043_v58 = vpop.xlane.xlu1 %3042  ;;  %v3538_v8 = vadd.f32 %v6782_v34, %v3502_v52  ;;  %v3569_v61 = vmax.f32 %v3537_v45, 0.0  ;;  %v3604_v28 = vmul.f32 %v3572_v20, %v3572_v20  ;;  %v3440_v48 = vsub.f32 %v6527_v62, %v6773_v47 }
 0x605   :  { %4543 = vrsqrt.f32 %v3374_v32  ;;  %v6814_v56 = vmul.f32 0.02, %v3043_v58  ;;  %v3437_v63 = vsub.f32 %v6524_v39, %v6777_v54  ;;  %v3315_v1 = vmul.f32 %v6806_v40, %v6806_v40 }
 0x606   :  { %v3046_v6 = vpop.xlane.xlu0 %3045  ;;  %v3570_v59 = vmax.f32 %v3538_v8, 0.0  ;;  %v3601_v11 = vmul.f32 %v3569_v61, %v3569_v61  ;;  %v3636_v16 = vmul.f32 %v3604_v28, %v3572_v20  ;;  %v3316_v30 = vmul.f32 %v6808_v57, %v6808_v57 }
 0x607   :  { %v6821_v18 = vmul.f32 0.02, %v3046_v6  ;;  %v3635_v52 = vmul.f32 %v3603_v35, %v3571_v41  ;;  %v3313_v54 = vmul.f32 %v6814_v56, %v6814_v56 }
 0x608   :  { %v3209_v25 = vpop.xlane.xlu1 %3208  ;;  %v3602_v26 = vmul.f32 %v3570_v59, %v3570_v59  ;;  %v3633_v13 = vmul.f32 %v3601_v11, %v3569_v61 }
 0x609   :  { %v4538_v50 = vpop.eup %4537  ;;  %v3283_v9 = vmul.f32 0.02, %v3209_v25  ;;  %v3666_v6 = vpack.c.bf16 %v3636_v16, %v3635_v52  ;;  %v3314_v11 = vmul.f32 %v6821_v18, %v6821_v18 }
 0x60a   :  { %v3475_v38 = vmul.f32 %v4538_v50, %v6771_v19  ;;  %v3212_v42 = vpop.xlane.xlu0 %3211  ;;  %v3634_v62 = vmul.f32 %v3602_v26, %v3570_v59 }
 0x60b   :  { %v4540_v47 = vpop.eup %4539  ;;  %v3347_v53 = vsub.f32 %v3283_v9, %v3315_v1  ;;  %v3284_v23 = vmul.f32 0.02, %v3212_v42  ;;  %v3438_v9 = vsub.f32 %v6532_v3, %v6786_v2 }
 0x60c   :  { %v3476_v39 = vmul.f32 %v4540_v47, %v6771_v19  ;;  %v3203_v20 = vpop.xlane.xlu1 %3202  ;;  %v3665_v45 = vpack.c.bf16 %v3634_v62, %v3633_v13  ;;  %v3507_v32 = vmul.f32 %v3475_v38, %v3439_v31 }
 0x60d   :  { %v4542_v58 = vpop.eup %4541  ;;  %v3379_v8 = vadd.f32 1e-05, %v3347_v53  ;;  %v3348_v28 = vsub.f32 %v3284_v23, %v3316_v30  ;;  %v3281_v61 = vmul.f32 0.02, %v3203_v20 }
 0x60e   :  { %v3473_v59 = vmul.f32 %v4542_v58, %v6771_v19  ;;  %4279 = vmatprep.mubr.msk.bf16.mxu1 %vm288_vm0, %v3665_v45  ;;  %v3206_v41 = vpop.xlane.xlu0 %3205  ;;  %v3508_v35 = vmul.f32 %v3476_v39, %v3440_v48  ;;  %v3543_v25 = vadd.f32 %v6782_v34, %v3507_v32 }
 0x60f   :  { %v4544_v26 = vpop.eup %4543  ;;  %4545 = vrsqrt.f32 %v3379_v8  ;;  %v3380_v50 = vadd.f32 1e-05, %v3348_v28  ;;  %v3345_v31 = vsub.f32 %v3281_v61, %v3313_v54  ;;  %v3282_v1 = vmul.f32 0.02, %v3206_v41  ;;  %4280 = vmatmul.mubr.msk.bf16.vlgmr.msra.gmra.mrb[32].mxu1 %vm288_vm0, %v3666_v6 }
 0x610   :  { %v3474_v16 = vmul.f32 %v4544_v26, %v6771_v19  ;;  %v3061_v38 = vpop.xlane.xlu1 %3060  ;;  %v3505_v42 = vmul.f32 %v3473_v59, %v3437_v63  ;;  %v3544_v13 = vadd.f32 %v6782_v34, %v3508_v35  ;;  %v3575_v39 = vmax.f32 %v3543_v25, 0.0 }
 0x611   :  { %4547 = vrsqrt.f32 %v3380_v50  ;;  %v3377_v48 = vadd.f32 1e-05, %v3345_v31  ;;  %v3346_v62 = vsub.f32 %v3282_v1, %v3314_v11  ;;  %v6840_v20 = vmul.f32 0.02, %v3061_v38 }
 0x612   :  { %v3064_v47 = vpop.xlane.xlu0 %3063  ;;  %v3506_v30 = vmul.f32 %v3474_v16, %v3438_v9  ;;  %v3541_v53 = vadd.f32 %v6782_v34, %v3505_v42  ;;  %v3576_v23 = vmax.f32 %v3544_v13, 0.0  ;;  %v3607_v28 = vmul.f32 %v3575_v39, %v3575_v39 }
 0x613   :  { %4549 = vrsqrt.f32 %v3377_v48  ;;  %v3378_v52 = vadd.f32 1e-05, %v3346_v62  ;;  %v6842_v8 = vmul.f32 0.02, %v3064_v47  ;;  %v3443_v61 = vsub.f32 %v6552_v51, %v6806_v40 }
 0x614   :  { %v3055_v54 = vpop.xlane.xlu1 %3054  ;;  %v3542_v3 = vadd.f32 %v6782_v34, %v3506_v30  ;;  %v3573_v2 = vmax.f32 %v3541_v53, 0.0  ;;  %v3608_v63 = vmul.f32 %v3576_v23, %v3576_v23  ;;  %v3444_v6 = vsub.f32 %v6559_v15, %v6808_v57 }
 0x615   :  { %4551 = vrsqrt.f32 %v3378_v52  ;;  %v6848_v59 = vmul.f32 0.02, %v3055_v54  ;;  %v3441_v25 = vsub.f32 %v6556_v46, %v6814_v56  ;;  %v3319_v26 = vmul.f32 %v6840_v20, %v6840_v20 }
 0x616   :  { %v3058_v45 = vpop.xlane.xlu0 %3057  ;;  %v3574_v32 = vmax.f32 %v3542_v3, 0.0  ;;  %v3605_v58 = vmul.f32 %v3573_v2, %v3573_v2  ;;  %v3640_v31 = vmul.f32 %v3608_v63, %v3576_v23  ;;  %v3320_v16 = vmul.f32 %v6842_v8, %v6842_v8 }
 0x617   :  { %v6855_v9 = vmul.f32 0.02, %v3058_v45  ;;  %v3639_v13 = vmul.f32 %v3607_v28, %v3575_v39  ;;  %v3317_v56 = vmul.f32 %v6848_v59, %v6848_v59 }
 0x618   :  { %v3221_v11 = vpop.xlane.xlu1 %3220  ;;  %v3606_v41 = vmul.f32 %v3574_v32, %v3574_v32  ;;  %v3637_v40 = vmul.f32 %v3605_v58, %v3573_v2 }
 0x619   :  { %v4546_v35 = vpop.eup %4545  ;;  %v3287_v50 = vmul.f32 0.02, %v3221_v11  ;;  %v3668_v54 = vpack.c.bf16 %v3640_v31, %v3639_v13  ;;  %v3318_v2 = vmul.f32 %v6855_v9, %v6855_v9  ;;  %v3442_v11 = vsub.f32 %v6564_v10, %v6821_v18 }
 0x61a   :  { %v3479_v1 = vmul.f32 %v4546_v35, %v6771_v19  ;;  %v3224_v51 = vpop.xlane.xlu0 %3223  ;;  %v3638_v15 = vmul.f32 %v3606_v41, %v3574_v32 }
 0x61b   :  { %v4548_v57 = vpop.eup %4547  ;;  %v3351_v38 = vsub.f32 %v3287_v50, %v3319_v26  ;;  %v3288_v42 = vmul.f32 0.02, %v3224_v51 }
 0x61c   :  { %v3480_v46 = vmul.f32 %v4548_v57, %v6771_v19  ;;  %v3215_v48 = vpop.xlane.xlu1 %3214  ;;  %v3667_v62 = vpack.c.bf16 %v3638_v15, %v3637_v40  ;;  %v3511_v47 = vmul.f32 %v3479_v1, %v3443_v61 }
 0x61d   :  { %v4550_v30 = vpop.eup %4549  ;;  %v3383_v53 = vadd.f32 1e-05, %v3351_v38  ;;  %v3352_v23 = vsub.f32 %v3288_v42, %v3320_v16  ;;  %v3285_v52 = vmul.f32 0.02, %v3215_v48 }
 0x61e   :  { %v3477_v3 = vmul.f32 %v4550_v30, %v6771_v19  ;;  %4283 = vmatprep.mubr.msk.bf16.mxu1 %vm288_vm0, %v3667_v62  ;;  %v3218_v39 = vpop.xlane.xlu0 %3217  ;;  %v3512_v63 = vmul.f32 %v3480_v46, %v3444_v6  ;;  %v3547_v45 = vadd.f32 %v6782_v34, %v3511_v47  ;;  %v3447_v47 = vsub.f32 %v6584_v24, %v6840_v20 }
 0x61f   :  { %v4552_v32 = vpop.eup %4551  ;;  %4553 = vrsqrt.f32 %v3383_v53  ;;  %v3384_v58 = vadd.f32 1e-05, %v3352_v23  ;;  %v3349_v28 = vsub.f32 %v3285_v52, %v3317_v56  ;;  %v3286_v61 = vmul.f32 0.02, %v3218_v39  ;;  %4284 = vmatmul.mubr.msk.bf16.gmra.mrb[36].mxu1 %vm288_vm0, %v3668_v54 }
 0x620   :  { %v3478_v41 = vmul.f32 %v4552_v32, %v6771_v19  ;;  %v3073_v35 = vpop.xlane.xlu1 %3072  ;;  %v3509_v26 = vmul.f32 %v3477_v3, %v3441_v25  ;;  %v3548_v50 = vadd.f32 %v6782_v34, %v3512_v63  ;;  %v3579_v16 = vmax.f32 %v3547_v45, 0.0 }
 0x621   :  { %4555 = vrsqrt.f32 %v3384_v58  ;;  %v3381_v6 = vadd.f32 1e-05, %v3349_v28  ;;  %v3350_v31 = vsub.f32 %v3286_v61, %v3318_v2  ;;  %v6874_v42 = vmul.f32 0.02, %v3073_v35 }
 0x622   :  { %v3076_v1 = vpop.xlane.xlu0 %3075  ;;  %v3510_v51 = vmul.f32 %v3478_v41, %v3442_v11  ;;  %v3545_v40 = vadd.f32 %v6782_v34, %v3509_v26  ;;  %v3580_v15 = vmax.f32 %v3548_v50, 0.0  ;;  %v3611_v62 = vmul.f32 %v3579_v16, %v3579_v16 }
 0x623   :  { %4557 = vrsqrt.f32 %v3381_v6  ;;  %v3382_v57 = vadd.f32 1e-05, %v3350_v31  ;;  %v6876_v48 = vmul.f32 0.02, %v3076_v1  ;;  %v3448_v30 = vsub.f32 %v6591_v44, %v6842_v8 }
 0x624   :  { %v3067_v38 = vpop.xlane.xlu1 %3066  ;;  %v3546_v10 = vadd.f32 %v6782_v34, %v3510_v51  ;;  %v3577_v18 = vmax.f32 %v3545_v40, 0.0  ;;  %v3612_v25 = vmul.f32 %v3580_v15, %v3580_v15  ;;  %v3445_v3 = vsub.f32 %v6588_v0, %v6848_v59 }
 0x625   :  { %4559 = vrsqrt.f32 %v3382_v57  ;;  %v6882_v53 = vmul.f32 0.02, %v3067_v38  ;;  %v3323_v2 = vmul.f32 %v6874_v42, %v6874_v42  ;;  %v3324_v58 = vmul.f32 %v6876_v48, %v6876_v48 }
 0x626   :  { %v3070_v13 = vpop.xlane.xlu0 %3069  ;;  %v3578_v46 = vmax.f32 %v3546_v10, 0.0  ;;  %v3609_v56 = vmul.f32 %v3577_v18, %v3577_v18  ;;  %v3644_v63 = vmul.f32 %v3612_v25, %v3580_v15  ;;  %v3643_v11 = vmul.f32 %v3611_v62, %v3579_v16 }
 0x627   :  { %v6889_v32 = vmul.f32 0.02, %v3070_v13  ;;  %v3321_v59 = vmul.f32 %v6882_v53, %v6882_v53 }
 0x628   :  { %v3233_v23 = vpop.xlane.xlu1 %3232  ;;  %v3610_v52 = vmul.f32 %v3578_v46, %v3578_v46  ;;  %v3641_v20 = vmul.f32 %v3609_v56, %v3577_v18  ;;  %v3670_v51 = vpack.c.bf16 %v3644_v63, %v3643_v11 }
 0x629   :  { %v4554_v54 = vpop.eup %4553  ;;  %v3291_v39 = vmul.f32 0.02, %v3233_v23  ;;  %v3322_v15 = vmul.f32 %v6889_v32, %v6889_v32 }
 0x62a   :  { %v3483_v45 = vmul.f32 %v4554_v54, %v6771_v19  ;;  %v3236_v24 = vpop.xlane.xlu0 %3235  ;;  %v3642_v44 = vmul.f32 %v3610_v52, %v3578_v46  ;;  %v3446_v46 = vsub.f32 %v6596_v21, %v6855_v9 }
 0x62b   :  { %v4556_v8 = vpop.eup %4555  ;;  %v3355_v28 = vsub.f32 %v3291_v39, %v3323_v2  ;;  %v3292_v61 = vmul.f32 0.02, %v3236_v24 }
 0x62c   :  { %v3484_v0 = vmul.f32 %v4556_v8, %v6771_v19  ;;  %v3227_v41 = vpop.xlane.xlu1 %3226  ;;  %v3669_v35 = vpack.c.bf16 %v3642_v44, %v3641_v20  ;;  %v3515_v26 = vmul.f32 %v3483_v45, %v3447_v47 }
 0x62d   :  { %v4558_v50 = vpop.eup %4557  ;;  %v3387_v6 = vadd.f32 1e-05, %v3355_v28  ;;  %v3356_v31 = vsub.f32 %v3292_v61, %v3324_v58  ;;  %v3289_v1 = vmul.f32 0.02, %v3227_v41 }
 0x62e   :  { %v3481_v40 = vmul.f32 %v4558_v50, %v6771_v19  ;;  %4287 = vmatprep.mubr.msk.bf16.mxu1 %vm288_vm0, %v3669_v35  ;;  %v3230_v57 = vpop.xlane.xlu0 %3229  ;;  %v3516_v16 = vmul.f32 %v3484_v0, %v3448_v30  ;;  %v3551_v38 = vadd.f32 %v6782_v34, %v3515_v26  ;;  %v3451_v0 = vsub.f32 %v6625_v27, %v6874_v42 }
 0x62f   :  { %v4560_v10 = vpop.eup %4559  ;;  %4561 = vrsqrt.f32 %v3387_v6  ;;  %v3388_v18 = vadd.f32 1e-05, %v3356_v31  ;;  %v3353_v25 = vsub.f32 %v3289_v1, %v3321_v59  ;;  %v3290_v13 = vmul.f32 0.02, %v3230_v57  ;;  %4288 = vmatmul.mubr.msk.bf16.gmra.mrb[40].mxu1 %vm288_vm0, %v3670_v51 }
 0x630   :  { %v3482_v56 = vmul.f32 %v4560_v10, %v6771_v19  ;;  %v3085_v62 = vpop.xlane.xlu1 %3084  ;;  %v3513_v47 = vmul.f32 %v3481_v40, %v3445_v3  ;;  %v3552_v23 = vadd.f32 %v6782_v34, %v3516_v16  ;;  %v3583_v24 = vmax.f32 %v3551_v38, 0.0 }
 0x631   :  { %4563 = vrsqrt.f32 %v3388_v18  ;;  %v3385_v30 = vadd.f32 1e-05, %v3353_v25  ;;  %v3354_v52 = vsub.f32 %v3290_v13, %v3322_v15  ;;  %v6908_v44 = vmul.f32 0.02, %v3085_v62 }
 0x632   :  { %v3088_v54 = vpop.xlane.xlu0 %3087  ;;  %v3514_v2 = vmul.f32 %v3482_v56, %v3446_v46  ;;  %v3549_v39 = vadd.f32 %v6782_v34, %v3513_v47  ;;  %v3584_v63 = vmax.f32 %v3552_v23, 0.0  ;;  %v3615_v11 = vmul.f32 %v3583_v24, %v3583_v24 }
 0x633   :  { %4565 = vrsqrt.f32 %v3385_v30  ;;  %v3386_v45 = vadd.f32 1e-05, %v3354_v52  ;;  %v6910_v61 = vmul.f32 0.02, %v3088_v54  ;;  %v3452_v59 = vsub.f32 %v6635_v49, %v6876_v48 }
 0x634   :  { %v3079_v20 = vpop.xlane.xlu1 %3078  ;;  %v3550_v21 = vadd.f32 %v6782_v34, %v3514_v2  ;;  %v3581_v9 = vmax.f32 %v3549_v39, 0.0  ;;  %v3616_v3 = vmul.f32 %v3584_v63, %v3584_v63  ;;  %v3449_v6 = vsub.f32 %v6632_v12, %v6882_v53 }
 0x635   :  { %4567 = vrsqrt.f32 %v3386_v45  ;;  %v6916_v41 = vmul.f32 0.02, %v3079_v20  ;;  %v3327_v31 = vmul.f32 %v6908_v44, %v6908_v44  ;;  %v3328_v57 = vmul.f32 %v6910_v61, %v6910_v61 }
 0x636   :  { %v3082_v8 = vpop.xlane.xlu0 %3081  ;;  %v3582_v58 = vmax.f32 %v3550_v21, 0.0  ;;  %v3613_v28 = vmul.f32 %v3581_v9, %v3581_v9  ;;  %v3648_v51 = vmul.f32 %v3616_v3, %v3584_v63  ;;  %v3647_v10 = vmul.f32 %v3615_v11, %v3583_v24 }
 0x637   :  { %v6923_v15 = vmul.f32 0.02, %v3082_v8  ;;  %v3325_v53 = vmul.f32 %v6916_v41, %v6916_v41  ;;  %v3450_v21 = vsub.f32 %v6642_v5, %v6889_v32 }
 0x638   :  { %v3245_v35 = vpop.xlane.xlu1 %3244  ;;  %v3614_v26 = vmul.f32 %v3582_v58, %v3582_v58  ;;  %v3645_v42 = vmul.f32 %v3613_v28, %v3581_v9  ;;  %v3672_v23 = vpack.c.bf16 %v3648_v51, %v3647_v10 }
 0x639   :  { %v4562_v50 = vpop.eup %4561  ;;  %v3295_v1 = vmul.f32 0.02, %v3245_v35  ;;  %v3326_v52 = vmul.f32 %v6923_v15, %v6923_v15 }
 0x63a   :  { %v3487_v40 = vmul.f32 %v4562_v50, %v6771_v19  ;;  %v3248_v27 = vpop.xlane.xlu0 %3247  ;;  %v3646_v49 = vmul.f32 %v3614_v26, %v3582_v58 }
 0x63b   :  { %v4564_v48 = vpop.eup %4563  ;;  %v3359_v16 = vsub.f32 %v3295_v1, %v3327_v31  ;;  %v3296_v38 = vmul.f32 0.02, %v3248_v27 }
 0x63c   :  { %v3488_v12 = vmul.f32 %v4564_v48, %v6771_v19  ;;  %v3239_v18 = vpop.xlane.xlu1 %3238  ;;  %v3671_v25 = vpack.c.bf16 %v3646_v49, %v3645_v42  ;;  %v3519_v13 = vmul.f32 %v3487_v40, %v3451_v0 }
 0x63d   :  { %v4566_v46 = vpop.eup %4565  ;;  %v3391_v56 = vadd.f32 1e-05, %v3359_v16  ;;  %v3360_v62 = vsub.f32 %v3296_v38, %v3328_v57  ;;  %v3293_v47 = vmul.f32 0.02, %v3239_v18  ;;  %v3455_v57 = vsub.f32 %v6662_v55, %v6908_v44 }
 0x63e   :  { %v3485_v30 = vmul.f32 %v4566_v46, %v6771_v19  ;;  %4291 = vmatprep.mubr.msk.bf16.mxu1 %vm288_vm0, %v3671_v25  ;;  %v3242_v54 = vpop.xlane.xlu0 %3241  ;;  %v3520_v2 = vmul.f32 %v3488_v12, %v3452_v59  ;;  %v3555_v39 = vadd.f32 %v6782_v34, %v3519_v13  ;;  %v3456_v16 = vsub.f32 %v6669_v60, %v6910_v61 }
 0x63f   :  { %v4568_v63 = vpop.eup %4567  ;;  %4569 = vrsqrt.f32 %v3391_v56  ;;  %v3392_v45 = vadd.f32 1e-05, %v3360_v62  ;;  %v3357_v24 = vsub.f32 %v3293_v47, %v3325_v53  ;;  %v3294_v20 = vmul.f32 0.02, %v3242_v54  ;;  %4292 = vmatmul.mubr.msk.bf16.gmra.mrb[44].mxu1 %vm288_vm0, %v3672_v23 }
 0x640   :  { %v3486_v9 = vmul.f32 %v4568_v63, %v6771_v19  ;;  %v3097_v3 = vpop.xlane.xlu1 %3096  ;;  %v3517_v8 = vmul.f32 %v3485_v30, %v3449_v6  ;;  %v3556_v58 = vadd.f32 %v6782_v34, %v3520_v2  ;;  %v3587_v31 = vmax.f32 %v3555_v39, 0.0 }
 0x641   :  { %4571 = vrsqrt.f32 %v3392_v45  ;;  %v3389_v28 = vadd.f32 1e-05, %v3357_v24  ;;  %v3358_v11 = vsub.f32 %v3294_v20, %v3326_v52  ;;  %v6942_v51 = vmul.f32 0.02, %v3097_v3 }
 0x642   :  { %v3100_v0 = vpop.xlane.xlu0 %3099  ;;  %v3518_v59 = vmul.f32 %v3486_v9, %v3450_v21  ;;  %v3553_v35 = vadd.f32 %v6782_v34, %v3517_v8  ;;  %v3588_v26 = vmax.f32 %v3556_v58, 0.0  ;;  %v3619_v48 = vmul.f32 %v3587_v31, %v3587_v31 }
 0x643   :  { %4573 = vrsqrt.f32 %v3389_v28  ;;  %v3390_v50 = vadd.f32 1e-05, %v3358_v11  ;;  %v6944_v49 = vmul.f32 0.02, %v3100_v0  ;;  %v3453_v18 = vsub.f32 %v6666_v4, %v6916_v41 }
 0x644   :  { %v3091_v1 = vpop.xlane.xlu1 %3090  ;;  %v3554_v5 = vadd.f32 %v6782_v34, %v3518_v59  ;;  %v3585_v32 = vmax.f32 %v3553_v35, 0.0  ;;  %v3620_v6 = vmul.f32 %v3588_v26, %v3588_v26  ;;  %v3331_v25 = vmul.f32 %v6942_v51, %v6942_v51 }
 0x645   :  { %4575 = vrsqrt.f32 %v3390_v50  ;;  %v6950_v38 = vmul.f32 0.02, %v3091_v1  ;;  %v3332_v47 = vmul.f32 %v6944_v49, %v6944_v49  ;;  %v3651_v52 = vmul.f32 %v3619_v48, %v3587_v31 }
 0x646   :  { %v3094_v40 = vpop.xlane.xlu0 %3093  ;;  %v3586_v27 = vmax.f32 %v3554_v5, 0.0  ;;  %v3617_v42 = vmul.f32 %v3585_v32, %v3585_v32  ;;  %v3652_v46 = vmul.f32 %v3620_v6, %v3588_v26  ;;  %v3454_v26 = vsub.f32 %v6674_v36, %v6923_v15 }
 0x647   :  { %v6957_v62 = vmul.f32 0.02, %v3094_v40  ;;  %v3329_v41 = vmul.f32 %v6950_v38, %v6950_v38 }
 0x648   :  { %v3257_v10 = vpop.xlane.xlu1 %3256  ;;  %v3618_v12 = vmul.f32 %v3586_v27, %v3586_v27  ;;  %v3649_v44 = vmul.f32 %v3617_v42, %v3585_v32  ;;  %v3674_v21 = vpack.c.bf16 %v3652_v46, %v3651_v52 }
 0x649   :  { %v4570_v53 = vpop.eup %4569  ;;  %v3299_v13 = vmul.f32 0.02, %v3257_v10  ;;  %v3330_v3 = vmul.f32 %v6957_v62, %v6957_v62 }
 0x64a   :  { %v3491_v56 = vmul.f32 %v4570_v53, %v6771_v19  ;;  %v3260_v55 = vpop.xlane.xlu0 %3259  ;;  %v3650_v60 = vmul.f32 %v3618_v12, %v3586_v27 }
 0x64b   :  { %v4572_v61 = vpop.eup %4571  ;;  %v3363_v23 = vsub.f32 %v3299_v13, %v3331_v25  ;;  %v3300_v30 = vmul.f32 0.02, %v3260_v55  ;;  %v3459_v55 = vsub.f32 %v6694_v7, %v6942_v51 }
 0x64c   :  { %v3492_v4 = vmul.f32 %v4572_v61, %v6771_v19  ;;  %v3251_v54 = vpop.xlane.xlu1 %3250  ;;  %v3673_v2 = vpack.c.bf16 %v3650_v60, %v3649_v44  ;;  %v3523_v39 = vmul.f32 %v3491_v56, %v3455_v57  ;;  %v3460_v44 = vsub.f32 %v6701_v43, %v6944_v49 }
 0x64d   :  { %v4574_v63 = vpop.eup %4573  ;;  %v3395_v45 = vadd.f32 1e-05, %v3363_v23  ;;  %v3364_v24 = vsub.f32 %v3300_v30, %v3332_v47  ;;  %v3297_v20 = vmul.f32 0.02, %v3251_v54  ;;  %v3457_v30 = vsub.f32 %v6698_v14, %v6950_v38 }
 0x64e   :  { %v3489_v9 = vmul.f32 %v4574_v63, %v6771_v19  ;;  %4295 = vmatprep.mubr.msk.bf16.mxu1 %vm288_vm0, %v3673_v2  ;;  %v3254_v8 = vpop.xlane.xlu0 %3253  ;;  %v3524_v58 = vmul.f32 %v3492_v4, %v3456_v16  ;;  %v3559_v28 = vadd.f32 %v6782_v34, %v3523_v39 }
 0x64f   :  { %v4576_v11 = vpop.eup %4575  ;;  %4577 = vrsqrt.f32 %v3395_v45  ;;  %v3396_v0 = vadd.f32 1e-05, %v3364_v24  ;;  %v3361_v59 = vsub.f32 %v3297_v20, %v3329_v41  ;;  %v3298_v35 = vmul.f32 0.02, %v3254_v8  ;;  %4296 = vmatmul.mubr.msk.bf16.gmra.mrb[48].mxu1 %vm288_vm0, %v3674_v21 }
 0x650   :  { %v3490_v50 = vmul.f32 %v4576_v11, %v6771_v19  ;;  %v3109_v31 = vpop.xlane.xlu1 %3108  ;;  %v3521_v1 = vmul.f32 %v3489_v9, %v3453_v18  ;;  %v3560_v5 = vadd.f32 %v6782_v34, %v3524_v58  ;;  %v3591_v16 = vmax.f32 %v3559_v28, 0.0 }
 0x651   :  { %4579 = vrsqrt.f32 %v3396_v0  ;;  %v3393_v32 = vadd.f32 1e-05, %v3361_v59  ;;  %v3362_v6 = vsub.f32 %v3298_v35, %v3330_v3  ;;  %v6984_v60 = vmul.f32 0.02, %v3109_v31 }
 0x652   :  { %v3112_v40 = vpop.xlane.xlu0 %3111  ;;  %v3522_v27 = vmul.f32 %v3490_v50, %v3454_v26  ;;  %v3557_v42 = vadd.f32 %v6782_v34, %v3521_v1  ;;  %v3592_v48 = vmax.f32 %v3560_v5, 0.0  ;;  %v3623_v56 = vmul.f32 %v3591_v16, %v3591_v16 }
 0x653   :  { %4581 = vrsqrt.f32 %v3393_v32  ;;  %v3394_v57 = vadd.f32 1e-05, %v3362_v6  ;;  %v6991_v2 = vmul.f32 0.02, %v3112_v40  ;;  %v3335_v38 = vmul.f32 %v6984_v60, %v6984_v60 }
 0x654   :  { %v3103_v10 = vpop.xlane.xlu1 %3102  ;;  %v3558_v36 = vadd.f32 %v6782_v34, %v3522_v27  ;;  %v3589_v15 = vmax.f32 %v3557_v42, 0.0  ;;  %v3624_v53 = vmul.f32 %v3592_v48, %v3592_v48  ;;  %v3655_v24 = vmul.f32 %v3623_v56, %v3591_v16 }
 0x655   :  { %4583 = vrsqrt.f32 %v3394_v57  ;;  %v6976_v12 = vmul.f32 0.02, %v3103_v10  ;;  %v3336_v59 = vmul.f32 %v6991_v2, %v6991_v2  ;;  %v3458_v6 = vsub.f32 %v6706_v37, %v6957_v62 }
 0x656   :  { %v3106_v18 = vpop.xlane.xlu0 %3105  ;;  %v3590_v25 = vmax.f32 %v3558_v36, 0.0  ;;  %v3621_v13 = vmul.f32 %v3589_v15, %v3589_v15  ;;  %v3656_v41 = vmul.f32 %v3624_v53, %v3592_v48 }
 0x657   :  { %v6978_v46 = vmul.f32 0.02, %v3106_v18  ;;  %v3333_v52 = vmul.f32 %v6976_v12, %v6976_v12 }
 0x658   :  { %v3263_v61 = vpop.xlane.xlu1 %3262  ;;  %v3622_v47 = vmul.f32 %v3590_v25, %v3590_v25  ;;  %v3653_v51 = vmul.f32 %v3621_v13, %v3589_v15  ;;  %v3676_v11 = vpack.c.bf16 %v3656_v41, %v3655_v24 }
 0x659   :  { %v4578_v23 = vpop.eup %4577  ;;  %v3301_v4 = vmul.f32 0.02, %v3263_v61  ;;  %v3334_v39 = vmul.f32 %v6978_v46, %v6978_v46 }
 0x65a   :  { %v3495_v54 = vmul.f32 %v4578_v23, %v6771_v19  ;;  %v3266_v7 = vpop.xlane.xlu0 %3265  ;;  %v3654_v43 = vmul.f32 %v3622_v47, %v3590_v25  ;;  %v3461_v47 = vsub.f32 %v6735_v29, %v6976_v12 }
 0x65b   :  { %v4580_v49 = vpop.eup %4579  ;;  %v3365_v63 = vsub.f32 %v3301_v4, %v3333_v52  ;;  %v3302_v45 = vmul.f32 0.02, %v3266_v7 }
 0x65c   :  { %v3496_v14 = vmul.f32 %v4580_v49, %v6771_v19  ;;  %v3269_v20 = vpop.xlane.xlu1 %3268  ;;  %v3675_v21 = vpack.c.bf16 %v3654_v43, %v3653_v51  ;;  %v3527_v9 = vmul.f32 %v3495_v54, %v3459_v55  ;;  %v3462_v54 = vsub.f32 %v6740_v22, %v6978_v46 }
 0x65d   :  { %v4582_v3 = vpop.eup %4581  ;;  %v3397_v8 = vadd.f32 1e-05, %v3365_v63  ;;  %v3366_v58 = vsub.f32 %v3302_v45, %v3334_v39  ;;  %v3303_v28 = vmul.f32 0.02, %v3269_v20  ;;  %v3463_v63 = vsub.f32 %v6726_v17, %v6984_v60 }
 0x65e   :  { %v3493_v0 = vmul.f32 %v4582_v3, %v6771_v19  ;;  %4299 = vmatprep.mubr.msk.bf16.mxu1 %vm288_vm0, %v3675_v21  ;;  %v3272_v35 = vpop.xlane.xlu0 %3271  ;;  %v3528_v26 = vmul.f32 %v3496_v14, %v3460_v44  ;;  %v3563_v50 = vadd.f32 %v6782_v34, %v3527_v9  ;;  %v3464_v22 = vsub.f32 %v6730_v33, %v6991_v2 }
 0x65f   :  { %v4584_v31 = vpop.eup %4583  ;;  %4585 = vrsqrt.f32 %v3397_v8  ;;  %v3398_v1 = vadd.f32 1e-05, %v3366_v58  ;;  %v3367_v5 = vsub.f32 %v3303_v28, %v3335_v38  ;;  %v3304_v32 = vmul.f32 0.02, %v3272_v35  ;;  %4300 = vmatmul.mubr.msk.bf16.gmra.mrb[52].mxu1 %vm288_vm0, %v3676_v11 }
 0x660   :  { %v3494_v40 = vmul.f32 %v4584_v31, %v6771_v19  ;;  %v3525_v27 = vmul.f32 %v3493_v0, %v3457_v30  ;;  %v3564_v42 = vadd.f32 %v6782_v34, %v3528_v26  ;;  %v3595_v53 = vmax.f32 %v3563_v50, 0.0  ;;  %v7033_v50 = vld [vmem:[%s7083_s4] ss:$0 sm:$0xff]  ;;  %s4621_s4 = smov [#allocation2]  }
 0x661   :  { %4587 = vrsqrt.f32 %v3398_v1  ;;  %v3399_v48 = vadd.f32 1e-05, %v3367_v5  ;;  %v3368_v57 = vsub.f32 %v3304_v32, %v3336_v59  ;;  %s3965_s21 = sshll.u32 %s4621_s4, 4  ;;  %s3966_s21 = int_to_ptr.vmem [resolvable:$true] %s3965_s21 }
 0x662   :  { %v3526_v16 = vmul.f32 %v3494_v40, %v3458_v6  ;;  %v3561_v10 = vadd.f32 %v6782_v34, %v3525_v27  ;;  %v3596_v36 = vmax.f32 %v3564_v42, 0.0  ;;  %v3627_v56 = vmul.f32 %v3595_v53, %v3595_v53  ;;  %s4596_s22 = scalar_lea.vmem %s3966_s21, 4096  ;;  %p4601_p1 = scmp.lt.s32.totalorder %s3966_s21, %s3966_s21 }
 0x663   :  { %4589 = vrsqrt.f32 %v3399_v48  ;;  %v3400_v15 = vadd.f32 1e-05, %v3368_v57  ;;  %p4597_p0 = scmp.ne.s32.totalorder %s3966_s21, %s4596_s22  ;;  %p4602_p2 = scmp.lt.s32.totalorder %s4596_s22, %s4596_s22 }
 0x664   :  { %v3562_v18 = vadd.f32 %v6782_v34, %v3526_v16  ;;  %v3593_v25 = vmax.f32 %v3561_v10, 0.0  ;;  %v3628_v37 = vmul.f32 %v3596_v36, %v3596_v36  ;;  %v3659_v41 = vmul.f32 %v3627_v56, %v3595_v53 }
 0x665   :  { %4591 = vrsqrt.f32 %v3400_v15  ;;  %p4603_p3 = por %p4602_p2, %p4601_p1 }
 0x666   :  { %v3594_v62 = vmax.f32 %v3562_v18, 0.0  ;;  %v3625_v13 = vmul.f32 %v3593_v25, %v3593_v25  ;;  %v3660_v61 = vmul.f32 %v3628_v37, %v3596_v36 }
 0x667   :  { %p4604_p4 = pnand %p4603_p3, %p4597_p0 }
 0x668   :  { %v3626_v55 = vmul.f32 %v3594_v62, %v3594_v62  ;;  %v3657_v30 = vmul.f32 %v3625_v13, %v3593_v25  ;;  %v3678_v39 = vpack.c.bf16 %v3660_v61, %v3659_v41 }
 0x669   :  { %v4586_v44 = vpop.eup %4585 }
 0x66a   :  { %v3497_v23 = vmul.f32 %v4586_v44, %v6771_v19  ;;  %v3658_v52 = vmul.f32 %v3626_v55, %v3594_v62 }
 0x66b   :  { %v4588_v4 = vpop.eup %4587 }
 0x66c   :  { %v3498_v7 = vmul.f32 %v4588_v4, %v6771_v19  ;;  %v3677_v51 = vpack.c.bf16 %v3658_v52, %v3657_v30  ;;  %v3529_v43 = vmul.f32 %v3497_v23, %v3461_v47 }
 0x66d   :  { %v4590_v49 = vpop.eup %4589 }
 0x66e   :  { %v3499_v29 = vmul.f32 %v4590_v49, %v6771_v19  ;;  %4303 = vmatprep.mubr.msk.bf16.mxu1 %vm288_vm0, %v3677_v51  ;;  %v3530_v12 = vmul.f32 %v3498_v7, %v3462_v54  ;;  %v3565_v45 = vadd.f32 %v6782_v34, %v3529_v43 }
 0x66f   :  { %v4592_v24 = vpop.eup %4591  ;;  %4304 = vmatmul.mubr.msk.bf16.gmra.mrb[56].mxu1 %vm288_vm0, %v3678_v39 }
 0x670   :  { %v3500_v46 = vmul.f32 %v4592_v24, %v6771_v19  ;;  %v3566_v14 = vadd.f32 %v6782_v34, %v3530_v12  ;;  %v3597_v38 = vmax.f32 %v3565_v45, 0.0  ;;  %v3531_v20 = vmul.f32 %v3499_v29, %v3463_v63 }
 0x672   :  { %v3598_v17 = vmax.f32 %v3566_v14, 0.0  ;;  %v3629_v60 = vmul.f32 %v3597_v38, %v3597_v38  ;;  %v3532_v21 = vmul.f32 %v3500_v46, %v3464_v22  ;;  %v3567_v9 = vadd.f32 %v6782_v34, %v3531_v20 }
 0x674   :  { %v3630_v3 = vmul.f32 %v3598_v17, %v3598_v17  ;;  %v3568_v8 = vadd.f32 %v6782_v34, %v3532_v21  ;;  %v3599_v58 = vmax.f32 %v3567_v9, 0.0  ;;  %v3661_v28 = vmul.f32 %v3629_v60, %v3597_v38 }
 0x676   :  { %v3662_v11 = vmul.f32 %v3630_v3, %v3598_v17  ;;  %v3600_v33 = vmax.f32 %v3568_v8, 0.0  ;;  %v3631_v2 = vmul.f32 %v3599_v58, %v3599_v58 }
 0x678   :  { %v3679_v0 = vpack.c.bf16 %v3662_v11, %v3661_v28  ;;  %v3632_v59 = vmul.f32 %v3600_v33, %v3600_v33  ;;  %v3663_v19 = vmul.f32 %v3631_v2, %v3599_v58 }
 0x67a   :  { %4307 = vmatprep.mubr.msk.bf16.mxu1 %vm288_vm0, %v3679_v0  ;;  %v3664_v35 = vmul.f32 %v3632_v59, %v3600_v33 }
 0x67c   :  { %v3680_v26 = vpack.c.bf16 %v3664_v35, %v3663_v19 }
 0x67e   :  { %4308 = vmatmul.mubr.msk.bf16.gmra.mrb[60].mxu1 %vm288_vm0, %v3680_v26 }
 0x6e2   :  { %v4281_v34 = vpop.f32.mrb[32].mxu1 }
 0x6e3   :  { %v3810_v31 = vadd.f32 %v4281_v34, %v7033_v50  ;;  %v3801_v1 = vpop.f32.mrb[33].mxu1 }
 0x6e4   :  { %v3802_v5 = vadd.f32 %v7033_v50, %v3801_v1  ;;  %v4282_v32 = vpop.f32.mrb[34].mxu1 }
 0x6e5   :  { %3930 = vst [vmem:[#allocation2 + $0x10] sm:$0xff] %v3810_v31  ;;  %v3813_v6 = vadd.f32 %v4282_v32, %v7033_v50  ;;  %v3804_v40 = vpop.f32.mrb[35].mxu1 }
 0x6e6   :  { %3928 = vst [vmem:[#allocation2] sm:$0xff] %v3802_v5  ;;  %v3805_v27 = vadd.f32 %v7033_v50, %v3804_v40 }
 0x6e7   :  { %3931 = vst [vmem:[#allocation2 + $0x18] sm:$0xff] %v3813_v6 }
 0x6e8   :  { %3929 = vst [vmem:[#allocation2 + $0x8] sm:$0xff] %v3805_v27 }
 0x6f2   :  { %v4285_v42 = vpop.f32.mrb[36].mxu1 }
 0x6f3   :  { %v3826_v48 = vadd.f32 %v4285_v42, %v7033_v50  ;;  %v3817_v57 = vpop.f32.mrb[37].mxu1 }
 0x6f4   :  { %v3818_v16 = vadd.f32 %v7033_v50, %v3817_v57  ;;  %v4286_v10 = vpop.f32.mrb[38].mxu1 }
 0x6f5   :  { %3934 = vst [vmem:[#allocation2 + $0x30] sm:$0xff] %v3826_v48  ;;  %v3829_v36 = vadd.f32 %v4286_v10, %v7033_v50  ;;  %v3820_v15 = vpop.f32.mrb[39].mxu1 }
 0x6f6   :  { %3932 = vst [vmem:[#allocation2 + $0x20] sm:$0xff] %v3818_v16  ;;  %v3821_v53 = vadd.f32 %v7033_v50, %v3820_v15 }
 0x6f7   :  { %3935 = vst [vmem:[#allocation2 + $0x38] sm:$0xff] %v3829_v36 }
 0x6f8   :  { %3933 = vst [vmem:[#allocation2 + $0x28] sm:$0xff] %v3821_v53 }
 0x702   :  { %v4289_v18 = vpop.f32.mrb[40].mxu1 }
 0x703   :  { %v3842_v25 = vadd.f32 %v4289_v18, %v7033_v50  ;;  %v3833_v37 = vpop.f32.mrb[41].mxu1 }
 0x704   :  { %v3834_v62 = vadd.f32 %v7033_v50, %v3833_v37  ;;  %v4290_v13 = vpop.f32.mrb[42].mxu1 }
 0x705   :  { %3938 = vst [vmem:[#allocation2 + $0x50] sm:$0xff] %v3842_v25  ;;  %v3845_v56 = vadd.f32 %v4290_v13, %v7033_v50  ;;  %v3836_v55 = vpop.f32.mrb[43].mxu1 }
 0x706   :  { %3936 = vst [vmem:[#allocation2 + $0x40] sm:$0xff] %v3834_v62  ;;  %v3837_v44 = vadd.f32 %v7033_v50, %v3836_v55 }
 0x707   :  { %3939 = vst [vmem:[#allocation2 + $0x58] sm:$0xff] %v3845_v56 }
 0x708   :  { %3937 = vst [vmem:[#allocation2 + $0x48] sm:$0xff] %v3837_v44 }
 0x712   :  { %v4293_v61 = vpop.f32.mrb[44].mxu1 }
 0x713   :  { %v3858_v47 = vadd.f32 %v4293_v61, %v7033_v50  ;;  %v3849_v23 = vpop.f32.mrb[45].mxu1 }
 0x714   :  { %v3850_v30 = vadd.f32 %v7033_v50, %v3849_v23  ;;  %v4294_v52 = vpop.f32.mrb[46].mxu1 }
 0x715   :  { %3942 = vst [vmem:[#allocation2 + $0x70] sm:$0xff] %v3858_v47  ;;  %v3861_v4 = vadd.f32 %v4294_v52, %v7033_v50  ;;  %v3852_v41 = vpop.f32.mrb[47].mxu1 }
 0x716   :  { %3940 = vst [vmem:[#allocation2 + $0x60] sm:$0xff] %v3850_v30  ;;  %v3853_v54 = vadd.f32 %v7033_v50, %v3852_v41 }
 0x717   :  { %3943 = vst [vmem:[#allocation2 + $0x78] sm:$0xff] %v3861_v4 }
 0x718   :  { %3941 = vst [vmem:[#allocation2 + $0x68] sm:$0xff] %v3853_v54 }
 0x722   :  { %v4297_v7 = vpop.f32.mrb[48].mxu1 }
 0x723   :  { %v3874_v51 = vadd.f32 %v4297_v7, %v7033_v50  ;;  %v3865_v43 = vpop.f32.mrb[49].mxu1 }
 0x724   :  { %v3866_v49 = vadd.f32 %v7033_v50, %v3865_v43  ;;  %v4298_v39 = vpop.f32.mrb[50].mxu1 }
 0x725   :  { %3946 = vst [vmem:[#allocation2 + $0x90] sm:$0xff] %v3874_v51  ;;  %v3877_v63 = vadd.f32 %v4298_v39, %v7033_v50  ;;  %v3868_v29 = vpop.f32.mrb[51].mxu1 }
 0x726   :  { %3944 = vst [vmem:[#allocation2 + $0x80] sm:$0xff] %v3866_v49  ;;  %v3869_v12 = vadd.f32 %v7033_v50, %v3868_v29 }
 0x727   :  { %3947 = vst [vmem:[#allocation2 + $0x98] sm:$0xff] %v3877_v63 }
 0x728   :  { %3945 = vst [vmem:[#allocation2 + $0x88] sm:$0xff] %v3869_v12 }
 0x732   :  { %v4301_v45 = vpop.f32.mrb[52].mxu1 }
 0x733   :  { %v3890_v24 = vadd.f32 %v4301_v45, %v7033_v50  ;;  %v3881_v22 = vpop.f32.mrb[53].mxu1 }
 0x734   :  { %v3882_v46 = vadd.f32 %v7033_v50, %v3881_v22  ;;  %v4302_v14 = vpop.f32.mrb[54].mxu1 }
 0x735   :  { %3950 = vst [vmem:[#allocation2 + $0xb0] sm:$0xff] %v3890_v24  ;;  %v3893_v38 = vadd.f32 %v4302_v14, %v7033_v50  ;;  %v3884_v20 = vpop.f32.mrb[55].mxu1 }
 0x736   :  { %3948 = vst [vmem:[#allocation2 + $0xa0] sm:$0xff] %v3882_v46  ;;  %v3885_v17 = vadd.f32 %v7033_v50, %v3884_v20 }
 0x737   :  { %3951 = vst [vmem:[#allocation2 + $0xb8] sm:$0xff] %v3893_v38 }
 0x738   :  { %3949 = vst [vmem:[#allocation2 + $0xa8] sm:$0xff] %v3885_v17 }
 0x742   :  { %v4305_v60 = vpop.f32.mrb[56].mxu1 }
 0x743   :  { %v3906_v21 = vadd.f32 %v4305_v60, %v7033_v50  ;;  %v3897_v9 = vpop.f32.mrb[57].mxu1 }
 0x744   :  { %v3898_v3 = vadd.f32 %v7033_v50, %v3897_v9  ;;  %v4306_v8 = vpop.f32.mrb[58].mxu1 }
 0x745   :  { %3954 = vst [vmem:[#allocation2 + $0xd0] sm:$0xff] %v3906_v21  ;;  %v3909_v58 = vadd.f32 %v4306_v8, %v7033_v50  ;;  %v3900_v28 = vpop.f32.mrb[59].mxu1 }
 0x746   :  { %3952 = vst [vmem:[#allocation2 + $0xc0] sm:$0xff] %v3898_v3  ;;  %v3901_v11 = vadd.f32 %v7033_v50, %v3900_v28 }
 0x747   :  { %3955 = vst [vmem:[#allocation2 + $0xd8] sm:$0xff] %v3909_v58 }
 0x748   :  { %3953 = vst [vmem:[#allocation2 + $0xc8] sm:$0xff] %v3901_v11 }
 0x751   :  { %v4309_v33 = vpop.f32.mrb[60].mxu1 }
 0x752   :  { %v3922_v2 = vadd.f32 %v4309_v33, %v7033_v50  ;;  %v3913_v0 = vpop.f32.mrb[61].mxu1 }
 0x753   :  { %v3914_v59 = vadd.f32 %v7033_v50, %v3913_v0  ;;  %v4310_v19 = vpop.f32.mrb[62].mxu1 }
 0x754   :  { %3958 = vst [vmem:[#allocation2 + $0xf0] sm:$0xff] %v3922_v2  ;;  %v3925_v35 = vadd.f32 %v4310_v19, %v7033_v50  ;;  %v3916_v26 = vpop.f32.mrb[63].mxu1 }
 0x755   :  { %3956 = vst [vmem:[#allocation2 + $0xe0] sm:$0xff] %v3914_v59  ;;  %v3917_v34 = vadd.f32 %v7033_v50, %v3916_v26 }
 0x756   :  { %3959 = vst [vmem:[#allocation2 + $0xf8] sm:$0xff] %v3925_v35 }
 0x757   :  { %3957 = vst [vmem:[#allocation2 + $0xe8] sm:$0xff] %v3917_v34 }
 0x758   :  { %4607 = shalt.err (!%p4604_p4)
}
 0x759   :  { %s4608_s25 = scalar_lea.hbm %s7084_s5, 4096 }
 0x75a   :  { %p4609_p5 = scmp.ne.s32.totalorder %s7084_s5, %s4608_s25  ;;  %p4612_p6 = scmp.lt.u32.totalorder %s4608_s25, %s7084_s5 }
 0x75c   :  { %p4614_p7 = pnand %p4612_p6, %p4609_p5 }
 0x75e   :  { %4617 = shalt.err (!%p4614_p7)
}
 0x75f   :  { %s4622_s30 = smov 128   ;;  %s4623_s6 = smov 8  }
 0x760   :  { %3971 = dma.vmem_to_hbm [thread:$0]  %s3966_s21, 4096, %s7084_s5, [#allocation3], %s4622_s30, %s4622_s30, %s4623_s6  }
 0x761   :  { %4618 = dma.done.wait [#allocation3], 4096  }
 0x762   :  { %4619 = vsyncadd [#allocation3], 4294963200 }
 0x763   :  { %3975 = vsyncpa [#allocation3], 1 }

</bundles_post_ra>
